<compile_context>
chip_gen: v5e
topology: v5e:2x2
jax: 0.10.0
libtpu: 0.0.40
codegen_flags: <defaults>
</compile_context>

<pallas_src>
import functools

import jax
import jax.numpy as jnp
from jax.experimental import pallas as pl
from jax.experimental.pallas import tpu as pltpu


_VMEM_LIMIT = 48 * 1024 * 1024     # explicit scoped-VMEM budget (safe on v5e/v6e/v7x)
_FF_HIDDEN_CHUNK = 512             # FF hidden-dim slab width (keeps SiLU in vregs)
_ROW_TILE_CAP = 512                # 512 targets v5e/v6e 128MiB VMEM; use 256 on v7x


# ----------------------------------------------------------------------------
# small helpers
# ----------------------------------------------------------------------------

def _ceil_to(x, m):
    return ((x + m - 1) // m) * m


def _ln(x, g, b, d_real, eps=1e-5):
    """LayerNorm over the first `d_real` feature columns.  Padded columns of x
    are exactly zero, so mean/var over the real columns can be recovered from
    full-width reductions with a cheap mu^2 correction."""
    dp = x.shape[-1]
    inv_d = 1.0 / float(d_real)
    mu = jnp.sum(x, axis=-1, keepdims=True) * inv_d
    xc = x - mu
    ssq = jnp.sum(xc * xc, axis=-1, keepdims=True)
    if dp > d_real:
        ssq = ssq - float(dp - d_real) * mu * mu
    var = ssq * inv_d
    return xc * jax.lax.rsqrt(var + eps) * g + b


def _row_tile(M, cap=_ROW_TILE_CAP):
    """Row tile (multiple of 8) that yields >=2 grid steps whenever M > 8.
    The grid uses pl.cdiv, so M need not divide evenly (tail block is masked)."""
    if M <= 8:
        return max(M, 1)
    half = ((M + 15) // 16) * 8          # ~M/2 rounded up to a multiple of 8
    return max(8, min(cap, half))


def _w_spec(shape):
    """Weight BlockSpec: constant block index, single-buffered (weights never
    change across grid steps, so the second pipeline buffer is pure VMEM waste
    — matters most under v7x's 64 MiB VMEM)."""
    idx = lambda *args: (0,) * len(shape)
    try:
        return pl.BlockSpec(shape, idx, pipeline_mode=pl.Buffered(1))
    except Exception:                     # older JAX without pipeline_mode
        return pl.BlockSpec(shape, idx)


# ----------------------------------------------------------------------------
# Pallas kernels
# ----------------------------------------------------------------------------

def _ff_kernel(*refs, with_final_ln, d_real, hidden_chunk):
    """Fused: LayerNorm -> Linear(D,4D) -> SiLU -> Linear(4D,D) -> x + 0.5*h
    (optionally followed by the block's final LayerNorm).  The hidden dim is
    processed in slabs so the SiLU intermediate never spills."""
    if with_final_ln:
        (x_ref, g_ref, b_ref, w1_ref, b1_ref, w2_ref, b2_ref,
         fg_ref, fb_ref, o_ref) = refs
    else:
        (x_ref, g_ref, b_ref, w1_ref, b1_ref, w2_ref, b2_ref, o_ref) = refs

    x = x_ref[...]                                           # (TM, DP) f32
    tm, dp = x.shape
    h = _ln(x, g_ref[...], b_ref[...], d_real).astype(jnp.bfloat16)

    hp = w1_ref.shape[1]
    acc = jnp.zeros((tm, dp), jnp.float32)
    for c in range(0, hp, hidden_chunk):
        cw = min(hidden_chunk, hp - c)
        hc = jnp.dot(h, w1_ref[:, c:c + cw],
                     preferred_element_type=jnp.float32) + b1_ref[:, c:c + cw]
        hc = hc * jax.nn.sigmoid(hc)                         # SiLU, f32
        acc = acc + jnp.dot(hc.astype(jnp.bfloat16), w2_ref[c:c + cw, :],
                            preferred_element_type=jnp.float32)

    y = x + 0.5 * (acc + b2_ref[...])
    if with_final_ln:
        y = _ln(y, fg_ref[...], fb_ref[...], d_real)
    o_ref[...] = y


def _mhsa_conv_kernel(x_ref,
                      mg_ref, mb_ref, wqkv_ref, bqkv_ref, wo_ref, bo_ref,
                      cg_ref, cb_ref, wglu_ref, bglu_ref, wdw_ref,
                      bns_ref, bnb_ref, wpw_ref, bpw_ref,
                      o_ref,
                      attn_scr, dw_scr,
                      *, num_heads, kernel_size, d_real):
    """Fused MHSA + Conv module (shared grid=(B,), residual stays in VMEM).

    MHSA: LN -> qkv (scale pre-folded into q weights) -> per-head softmax
    attention -> per-head outputs written to a (T, DP) scratch -> ONE full-D
    output projection -> residual add.

    Conv: LN -> pointwise (D->2D) + GLU -> depthwise conv via shifted reads
    from a zero-haloed (T+K-1, DP) scratch -> folded BatchNorm -> SiLU ->
    pointwise (D->D) -> residual add."""
    x = x_ref[...]                                           # (T, DP) f32
    t, dp = x.shape
    dh = d_real // num_heads

    # ---------------- MHSA ----------------
    h = _ln(x, mg_ref[...], mb_ref[...], d_real).astype(jnp.bfloat16)
    qkv = jnp.dot(h, wqkv_ref[...],
                  preferred_element_type=jnp.float32) + bqkv_ref[...]  # (T, 3*DP)

    if dp > d_real:
        # zero the padded columns so stale VMEM (possibly NaN bits) can never
        # leak into the output projection matmul
        attn_scr[:, d_real:] = jnp.zeros((t, dp - d_real), jnp.float32)
    for hd in range(num_heads):
        lo = hd * dh
        q = qkv[:, lo:lo + dh].astype(jnp.bfloat16)          # scale already folded in
        k = qkv[:, dp + lo:dp + lo + dh].astype(jnp.bfloat16)
        v = qkv[:, 2 * dp + lo:2 * dp + lo + dh].astype(jnp.bfloat16)
        s = jax.lax.dot_general(q, k, (((1,), (1,)), ((), ())),
                                preferred_element_type=jnp.float32)    # (T, T)
        m = jnp.max(s, axis=-1, keepdims=True)
        e = jnp.exp(s - m)
        p = e * (1.0 / jnp.sum(e, axis=-1, keepdims=True))
        oh = jnp.dot(p.astype(jnp.bfloat16), v, preferred_element_type=jnp.float32)
        attn_scr[:, lo:lo + dh] = oh
    attn = jnp.dot(attn_scr[...].astype(jnp.bfloat16), wo_ref[...],
                   preferred_element_type=jnp.float32) + bo_ref[...]
    x = x + attn

    # ---------------- Conv module ----------------
    h = _ln(x, cg_ref[...], cb_ref[...], d_real).astype(jnp.bfloat16)
    vg = jnp.dot(h, wglu_ref[...],
                 preferred_element_type=jnp.float32) + bglu_ref[...]   # (T, 2*DP)
    glu = vg[:, :dp] * jax.nn.sigmoid(vg[:, dp:])                      # (T, DP)

    lpad = (kernel_size - 1) // 2
    rpad = kernel_size - 1 - lpad
    # zero the halo rows every grid step (cheap; scratch is per-core, so a
    # program_id==0 guard would be unsafe under megacore batch splitting)
    if lpad > 0:
        dw_scr[pl.ds(0, lpad), :] = jnp.zeros((lpad, dp), jnp.float32)
    if rpad > 0:
        dw_scr[pl.ds(lpad + t, rpad), :] = jnp.zeros((rpad, dp), jnp.float32)
    dw_scr[pl.ds(lpad, t), :] = glu

    wdw = wdw_ref[...]                                       # (K, DP) f32
    acc = jnp.zeros((t, dp), jnp.float32)
    for k in range(kernel_size):
        acc = acc + dw_scr[pl.ds(k, t), :] * wdw[k:k + 1, :]  # shifted read + FMA

    y = acc * bns_ref[...] + bnb_ref[...]                    # folded BatchNorm (eval)
    y = y * jax.nn.sigmoid(y)                                # SiLU
    out = jnp.dot(y.astype(jnp.bfloat16), wpw_ref[...],
                  preferred_element_type=jnp.float32) + bpw_ref[...]
    o_ref[...] = x + out


def _sub_fc1_kernel(patches_ref, w9_ref, b9_ref, w1_ref, b1_ref, o_ref):
    """Fused: 3x3/stride-2 Conv2d(1->1) (from 9 pre-gathered taps) + fc1."""
    acc = patches_ref[0, 0] * w9_ref[0]
    for k in range(1, 9):
        acc = acc + patches_ref[0, k] * w9_ref[k]
    acc = acc + b9_ref[0]                                    # (To, Fo) f32
    y = jnp.dot(acc.astype(jnp.bfloat16), w1_ref[...],
                preferred_element_type=jnp.float32) + b1_ref[...]
    o_ref[0] = y                                             # (To, DP)


def _fc2_kernel(x_ref, w_ref, b_ref, o_ref):
    o_ref[...] = jnp.dot(x_ref[...].astype(jnp.bfloat16), w_ref[...],
                         preferred_element_type=jnp.float32) + b_ref[...]


# ----------------------------------------------------------------------------
# pallas_call wrappers
# ----------------------------------------------------------------------------

def _cparams():
    return pltpu.CompilerParams(dimension_semantics=("parallel",),
                                vmem_limit_bytes=_VMEM_LIMIT)


def ff_module(x, ln_p, w1b1, w2b2, d_real, final_ln=None):
    M, DP = x.shape
    HP = w1b1[0].shape[1]
    TM = _row_tile(M)
    args = [x, ln_p[0], ln_p[1], w1b1[0], w1b1[1], w2b2[0], w2b2[1]]
    in_specs = [pl.BlockSpec((TM, DP), lambda i: (i, 0)),
                _w_spec((1, DP)), _w_spec((1, DP)),
                _w_spec((DP, HP)), _w_spec((1, HP)),
                _w_spec((HP, DP)), _w_spec((1, DP))]
    if final_ln is not None:
        args += [final_ln[0], final_ln[1]]
        in_specs += [_w_spec((1, DP)), _w_spec((1, DP))]
    return pl.pallas_call(
        functools.partial(_ff_kernel, with_final_ln=final_ln is not None,
                          d_real=d_real, hidden_chunk=_FF_HIDDEN_CHUNK),
        grid=(pl.cdiv(M, TM),),
        in_specs=in_specs,
        out_specs=pl.BlockSpec((TM, DP), lambda i: (i, 0)),
        out_shape=jax.ShapeDtypeStruct((M, DP), jnp.float32),
        compiler_params=_cparams(),
    )(*args)


def mhsa_conv_module(x, p, B, T, num_heads, kernel_size, d_real):
    M, DP = x.shape
    K = kernel_size
    return pl.pallas_call(
        functools.partial(_mhsa_conv_kernel, num_heads=num_heads,
                          kernel_size=kernel_size, d_real=d_real),
        grid=(B,),
        in_specs=[pl.BlockSpec((T, DP), lambda b: (b, 0)),
                  _w_spec((1, DP)), _w_spec((1, DP)),
                  _w_spec((DP, 3 * DP)), _w_spec((1, 3 * DP)),
                  _w_spec((DP, DP)), _w_spec((1, DP)),
                  _w_spec((1, DP)), _w_spec((1, DP)),
                  _w_spec((DP, 2 * DP)), _w_spec((1, 2 * DP)),
                  _w_spec((K, DP)),
                  _w_spec((1, DP)), _w_spec((1, DP)),
                  _w_spec((DP, DP)), _w_spec((1, DP))],
        out_specs=pl.BlockSpec((T, DP), lambda b: (b, 0)),
        out_shape=jax.ShapeDtypeStruct((M, DP), jnp.float32),
        scratch_shapes=[pltpu.VMEM((T, DP), jnp.float32),            # per-head attn out
                        pltpu.VMEM((T + K - 1, DP), jnp.float32)],   # dw-conv halo buf
        compiler_params=_cparams(),
    )(x, p["mhsa_ln"][0], p["mhsa_ln"][1],
      p["mhsa_in"][0], p["mhsa_in"][1],
      p["mhsa_out"][0], p["mhsa_out"][1],
      p["conv_ln"][0], p["conv_ln"][1],
      p["conv_glu"][0], p["conv_glu"][1],
      p["conv_dw"],
      p["conv_scale"], p["conv_shift"],
      p["conv_pw2"][0], p["conv_pw2"][1])


def subsample_fc1(patches, w9, b9, w1, b1):
    B, _, To, Fo = patches.shape
    DP = w1.shape[1]
    return pl.pallas_call(
        _sub_fc1_kernel,
        grid=(B,),
        in_specs=[pl.BlockSpec((1, 9, To, Fo), lambda i: (i, 0, 0, 0)),
                  pl.BlockSpec(memory_space=pltpu.MemorySpace.SMEM),
                  pl.BlockSpec(memory_space=pltpu.MemorySpace.SMEM),
                  _w_spec((Fo, DP)), _w_spec((1, DP))],
        out_specs=pl.BlockSpec((1, To, DP), lambda i: (i, 0, 0)),
        out_shape=jax.ShapeDtypeStruct((B, To, DP), jnp.float32),
        compiler_params=_cparams(),
    )(patches, w9, b9, w1, b1)


def fc2_proj(x, w_pad, b_pad):
    M, DP = x.shape
    NP = w_pad.shape[1]                  # lane-padded to a multiple of 128
    TM = _row_tile(M)
    return pl.pallas_call(
        _fc2_kernel,
        grid=(pl.cdiv(M, TM),),
        in_specs=[pl.BlockSpec((TM, DP), lambda i: (i, 0)),
                  _w_spec((DP, NP)), _w_spec((1, NP))],
        out_specs=pl.BlockSpec((TM, NP), lambda i: (i, 0)),
        out_shape=jax.ShapeDtypeStruct((M, NP), jnp.float32),
        compiler_params=_cparams(),
    )(x, w_pad, b_pad)


# ----------------------------------------------------------------------------
# Model glue
# ----------------------------------------------------------------------------

def conformer_block(x, p, B, T, num_heads, kernel_size, d_real):
    x = ff_module(x, p["ff1_ln"], p["ff1_w1"], p["ff1_w2"], d_real)
    x = mhsa_conv_module(x, p, B, T, num_heads, kernel_size, d_real)
    x = ff_module(x, p["ff2_ln"], p["ff2_w1"], p["ff2_w2"], d_real,
                  final_ln=p["final_ln"])
    return x


def conformer_forward(params, spectrogram, num_heads, kernel_size, n_class,
                      encoder_dim):
    B, F, T = spectrogram.shape
    x = jnp.transpose(spectrogram, (0, 2, 1))                # (B, T, F)

    # Subsampling Conv2d(1, 1, kernel=3, stride=2, padding=1) over (T, F),
    # fused with fc1 inside the kernel.
    To = (T - 1) // 2 + 1
    Fo = (F - 1) // 2 + 1
    xpad = jnp.pad(x, ((0, 0), (1, 1), (1, 1)))
    # TODO(synk): the 9 stride-2 taps are gathered with XLA slices here (one-
    # time 2.25x blow-up of the input); a strided in-kernel DMA gather of the
    # padded (T+2, F+2) slab per batch would avoid it for large shapes.
    taps = [xpad[:, dt:dt + 2 * To:2, df:df + 2 * Fo:2]
            for dt in range(3) for df in range(3)]
    patches = jnp.stack(taps, axis=1)                        # (B, 9, To, Fo)
    h = subsample_fc1(patches, params["sub_w"], params["sub_b"],
                      params["fc1"][0], params["fc1"][1])    # (B, To, DP)
    DP = h.shape[-1]
    h = h.reshape(B * To, DP)                                # residual stream

    for blk in params["blocks"]:
        h = conformer_block(h, blk, B, To, num_heads, kernel_size, encoder_dim)

    logits = fc2_proj(h, params["fc2"][0], params["fc2"][1])  # (M, 128-padded)
    logits = logits[:, :n_class].reshape(B, To, n_class)
    return {"logits": logits}


# ----------------------------------------------------------------------------
# Deterministic parameter init (synthetic weights, lane-padded, no checkpoint)
# ----------------------------------------------------------------------------

def init_params(key, embed_dim, encoder_dim, n_layers, num_heads, kernel_size,
                n_class):
    D = encoder_dim
    DP = _ceil_to(D, 128)                # lane-padded model dim
    H = 4 * D
    HP = _ceil_to(H, 128)
    dh = D // num_heads
    scale = 1.0 / float(dh) ** 0.5
    # TODO(synk): fc1 fan-in in the PyTorch model is embed_dim // 2, which only
    # equals the conv output width (embed_dim - 1)//2 + 1 for even embed_dim.
    Fo = (embed_dim - 1) // 2 + 1

    keys = iter(jax.random.split(key, 4096))

    def _randn(shape, s=1.0):
        return s * jax.random.normal(next(keys), shape, jnp.float32)

    def _pad2(w, rows, cols):
        out = jnp.zeros((rows, cols), w.dtype)
        return out.at[:w.shape[0], :w.shape[1]].set(w)

    def dense(fan_in, fan_out, rows_p, cols_p):
        w = _randn((fan_in, fan_out)) / jnp.sqrt(float(fan_in))
        b = _randn((1, fan_out), 0.02)
        return _pad2(w, rows_p, cols_p).astype(jnp.bfloat16), _pad2(b, 1, cols_p)

    def ln_params():
        g = 1.0 + _randn((1, D), 0.1)
        b = _randn((1, D), 0.05)
        return (_pad2(g, 1, DP), _pad2(b, 1, DP))

    def qkv_params():
        # 1/sqrt(dh) attention scale folded into the q weights/bias at init
        wq = _randn((D, D)) / jnp.sqrt(float(D)) * scale
        wk = _randn((D, D)) / jnp.sqrt(float(D))
        wv = _randn((D, D)) / jnp.sqrt(float(D))
        bq = _randn((1, D), 0.02) * scale
        bk = _randn((1, D), 0.02)
        bv = _randn((1, D), 0.02)
        w = jnp.concatenate([_pad2(wq, DP, DP), _pad2(wk, DP, DP),
                             _pad2(wv, DP, DP)], axis=1).astype(jnp.bfloat16)
        b = jnp.concatenate([_pad2(bq, 1, DP), _pad2(bk, 1, DP),
                             _pad2(bv, 1, DP)], axis=1)
        return w, b

    def glu_params():
        wv_ = _randn((D, D)) / jnp.sqrt(float(D))
        wg_ = _randn((D, D)) / jnp.sqrt(float(D))
        bv_ = _randn((1, D), 0.02)
        bg_ = _randn((1, D), 0.02)
        w = jnp.concatenate([_pad2(wv_, DP, DP),
                             _pad2(wg_, DP, DP)], axis=1).astype(jnp.bfloat16)
        b = jnp.concatenate([_pad2(bv_, 1, DP), _pad2(bg_, 1, DP)], axis=1)
        return w, b

    # fc2 weights, lane-padded to a multiple of 128 for dense stores
    n_pad = _ceil_to(n_class, 128)

    params = {
        "sub_w": _randn((9,), 0.2),
        "sub_b": _randn((1,), 0.02),
        "fc1": dense(Fo, D, Fo, DP),
        "fc2": dense(D, n_class, DP, n_pad),
        "blocks": [],
    }

    for _ in range(n_layers):
        # depthwise conv + eval-mode BatchNorm fold (uses explicit running stats)
        w_dw = _pad2(_randn((kernel_size, D), 0.2), kernel_size, DP)
        b_dw = _randn((1, D), 0.02)
        gamma = 1.0 + _randn((1, D), 0.1)
        beta = _randn((1, D), 0.05)
        run_mean = _randn((1, D), 0.05)
        run_var = 1.0 + 0.1 * jnp.abs(_randn((1, D)))
        bn_scale = gamma * jax.lax.rsqrt(run_var + 1e-5)
        bn_shift = (b_dw - run_mean) * bn_scale + beta

        blk = {
            "ff1_ln": ln_params(),
            "ff1_w1": dense(D, H, DP, HP), "ff1_w2": dense(H, D, HP, DP),
            "mhsa_ln": ln_params(),
            "mhsa_in": qkv_params(),
            "mhsa_out": dense(D, D, DP, DP),        # bf16 like all other weights
            "conv_ln": ln_params(),
            "conv_glu": glu_params(),
            "conv_dw": w_dw,
            "conv_scale": _pad2(bn_scale, 1, DP),
            "conv_shift": _pad2(bn_shift, 1, DP),
            "conv_pw2": dense(D, D, DP, DP),
            "ff2_ln": ln_params(),
            "ff2_w1": dense(D, H, DP, HP), "ff2_w2": dense(H, D, HP, DP),
            "final_ln": ln_params(),
        }
        params["blocks"].append(blk)
    return params


# ----------------------------------------------------------------------------
# Main
# ----------------------------------------------------------------------------

if __name__ == "__main__":
    # TODO(synk): dropout is identity (inference); the reference repo's
    # ConformerBlock source is unavailable, so the standard Macaron block is
    # used and relative positional encoding is not reproduced.
    B, embed_dim, T = 2, 32, 16
    encoder_dim, n_layers, num_heads = 32, 2, 4
    kernel_size, n_class = 7, 10

    key = jax.random.PRNGKey(0)
    pkey, xkey = jax.random.split(key)
    params = init_params(pkey, embed_dim, encoder_dim, n_layers, num_heads,
                         kernel_size, n_class)
    spectrogram = jax.random.normal(xkey, (B, embed_dim, T), jnp.float32)

    fwd = jax.jit(functools.partial(conformer_forward, num_heads=num_heads,
                                    kernel_size=kernel_size, n_class=n_class,
                                    encoder_dim=encoder_dim))
    out = fwd(params, spectrogram)
    logits = jax.block_until_ready(out["logits"])

    To = (T - 1) // 2 + 1
    assert logits.shape == (B, To, n_class), logits.shape
    assert bool(jnp.all(jnp.isfinite(logits)))
    print("KERNEL_OK")
</pallas_src>

<mosaic_0001>
module attributes {stable_mosaic.version = 11 : i64} {
  func.func @_sub_fc1_kernel(%arg0: i32, %arg1: memref<1x9x8x16xf32, #tpu.memory_space<vmem>>, %arg2: memref<9xf32, #tpu.memory_space<smem>>, %arg3: memref<1xf32, #tpu.memory_space<smem>>, %arg4: memref<16x128xbf16, #tpu.memory_space<vmem>>, %arg5: memref<1x128xf32, #tpu.memory_space<vmem>>, %arg6: memref<1x8x128xf32, #tpu.memory_space<vmem>>) attributes {dimension_semantics = [#tpu.dimension_semantics<parallel>], iteration_bounds = array<i64: 2>, scalar_prefetch = 0 : i64, scratch_operands = 0 : i64, tpu.core_type = #tpu.core_type<tc>, window_params = [{transform_indices = @transform_0, window_bounds = array<i64: 1, 9, 8, 16>}, {transform_indices = @transform_1, window_bounds = array<i64: 9>}, {transform_indices = @transform_2, window_bounds = array<i64: 1>}, {pipeline_mode = #tpu.pipeline_mode<synchronous>, transform_indices = @transform_3, window_bounds = array<i64: 16, 128>}, {pipeline_mode = #tpu.pipeline_mode<synchronous>, transform_indices = @transform_4, window_bounds = array<i64: 1, 128>}, {transform_indices = @transform_5, window_bounds = array<i64: 1, 8, 128>}]} {
    %c0 = arith.constant 0 : index
    %c0_0 = arith.constant 0 : index
    %c0_1 = arith.constant 0 : index
    %c0_2 = arith.constant 0 : index
    %0 = vector.load %arg1[%c0, %c0_0, %c0_1, %c0_2] : memref<1x9x8x16xf32, #tpu.memory_space<vmem>>, vector<1x1x8x16xf32>
    %1 = vector.shape_cast %0 : vector<1x1x8x16xf32> to vector<8x16xf32>
    %c0_3 = arith.constant 0 : index
    %2 = memref.load %arg2[%c0_3] : memref<9xf32, #tpu.memory_space<smem>>
    %3 = vector.broadcast %2 : f32 to vector<8x16xf32>
    %4 = arith.mulf %1, %3 : vector<8x16xf32>
    %c0_4 = arith.constant 0 : index
    %c1 = arith.constant 1 : index
    %c0_5 = arith.constant 0 : index
    %c0_6 = arith.constant 0 : index
    %5 = vector.load %arg1[%c0_4, %c1, %c0_5, %c0_6] : memref<1x9x8x16xf32, #tpu.memory_space<vmem>>, vector<1x1x8x16xf32>
    %6 = vector.shape_cast %5 : vector<1x1x8x16xf32> to vector<8x16xf32>
    %c1_7 = arith.constant 1 : index
    %7 = memref.load %arg2[%c1_7] : memref<9xf32, #tpu.memory_space<smem>>
    %8 = vector.broadcast %7 : f32 to vector<8x16xf32>
    %9 = arith.mulf %6, %8 : vector<8x16xf32>
    %10 = arith.addf %4, %9 : vector<8x16xf32>
    %c0_8 = arith.constant 0 : index
    %c2 = arith.constant 2 : index
    %c0_9 = arith.constant 0 : index
    %c0_10 = arith.constant 0 : index
    %11 = vector.load %arg1[%c0_8, %c2, %c0_9, %c0_10] : memref<1x9x8x16xf32, #tpu.memory_space<vmem>>, vector<1x1x8x16xf32>
    %12 = vector.shape_cast %11 : vector<1x1x8x16xf32> to vector<8x16xf32>
    %c2_11 = arith.constant 2 : index
    %13 = memref.load %arg2[%c2_11] : memref<9xf32, #tpu.memory_space<smem>>
    %14 = vector.broadcast %13 : f32 to vector<8x16xf32>
    %15 = arith.mulf %12, %14 : vector<8x16xf32>
    %16 = arith.addf %10, %15 : vector<8x16xf32>
    %c0_12 = arith.constant 0 : index
    %c3 = arith.constant 3 : index
    %c0_13 = arith.constant 0 : index
    %c0_14 = arith.constant 0 : index
    %17 = vector.load %arg1[%c0_12, %c3, %c0_13, %c0_14] : memref<1x9x8x16xf32, #tpu.memory_space<vmem>>, vector<1x1x8x16xf32>
    %18 = vector.shape_cast %17 : vector<1x1x8x16xf32> to vector<8x16xf32>
    %c3_15 = arith.constant 3 : index
    %19 = memref.load %arg2[%c3_15] : memref<9xf32, #tpu.memory_space<smem>>
    %20 = vector.broadcast %19 : f32 to vector<8x16xf32>
    %21 = arith.mulf %18, %20 : vector<8x16xf32>
    %22 = arith.addf %16, %21 : vector<8x16xf32>
    %c0_16 = arith.constant 0 : index
    %c4 = arith.constant 4 : index
    %c0_17 = arith.constant 0 : index
    %c0_18 = arith.constant 0 : index
    %23 = vector.load %arg1[%c0_16, %c4, %c0_17, %c0_18] : memref<1x9x8x16xf32, #tpu.memory_space<vmem>>, vector<1x1x8x16xf32>
    %24 = vector.shape_cast %23 : vector<1x1x8x16xf32> to vector<8x16xf32>
    %c4_19 = arith.constant 4 : index
    %25 = memref.load %arg2[%c4_19] : memref<9xf32, #tpu.memory_space<smem>>
    %26 = vector.broadcast %25 : f32 to vector<8x16xf32>
    %27 = arith.mulf %24, %26 : vector<8x16xf32>
    %28 = arith.addf %22, %27 : vector<8x16xf32>
    %c0_20 = arith.constant 0 : index
    %c5 = arith.constant 5 : index
    %c0_21 = arith.constant 0 : index
    %c0_22 = arith.constant 0 : index
    %29 = vector.load %arg1[%c0_20, %c5, %c0_21, %c0_22] : memref<1x9x8x16xf32, #tpu.memory_space<vmem>>, vector<1x1x8x16xf32>
    %30 = vector.shape_cast %29 : vector<1x1x8x16xf32> to vector<8x16xf32>
    %c5_23 = arith.constant 5 : index
    %31 = memref.load %arg2[%c5_23] : memref<9xf32, #tpu.memory_space<smem>>
    %32 = vector.broadcast %31 : f32 to vector<8x16xf32>
    %33 = arith.mulf %30, %32 : vector<8x16xf32>
    %34 = arith.addf %28, %33 : vector<8x16xf32>
    %c0_24 = arith.constant 0 : index
    %c6 = arith.constant 6 : index
    %c0_25 = arith.constant 0 : index
    %c0_26 = arith.constant 0 : index
    %35 = vector.load %arg1[%c0_24, %c6, %c0_25, %c0_26] : memref<1x9x8x16xf32, #tpu.memory_space<vmem>>, vector<1x1x8x16xf32>
    %36 = vector.shape_cast %35 : vector<1x1x8x16xf32> to vector<8x16xf32>
    %c6_27 = arith.constant 6 : index
    %37 = memref.load %arg2[%c6_27] : memref<9xf32, #tpu.memory_space<smem>>
    %38 = vector.broadcast %37 : f32 to vector<8x16xf32>
    %39 = arith.mulf %36, %38 : vector<8x16xf32>
    %40 = arith.addf %34, %39 : vector<8x16xf32>
    %c0_28 = arith.constant 0 : index
    %c7 = arith.constant 7 : index
    %c0_29 = arith.constant 0 : index
    %c0_30 = arith.constant 0 : index
    %41 = vector.load %arg1[%c0_28, %c7, %c0_29, %c0_30] : memref<1x9x8x16xf32, #tpu.memory_space<vmem>>, vector<1x1x8x16xf32>
    %42 = vector.shape_cast %41 : vector<1x1x8x16xf32> to vector<8x16xf32>
    %c7_31 = arith.constant 7 : index
    %43 = memref.load %arg2[%c7_31] : memref<9xf32, #tpu.memory_space<smem>>
    %44 = vector.broadcast %43 : f32 to vector<8x16xf32>
    %45 = arith.mulf %42, %44 : vector<8x16xf32>
    %46 = arith.addf %40, %45 : vector<8x16xf32>
    %c0_32 = arith.constant 0 : index
    %c8 = arith.constant 8 : index
    %c0_33 = arith.constant 0 : index
    %c0_34 = arith.constant 0 : index
    %47 = vector.load %arg1[%c0_32, %c8, %c0_33, %c0_34] : memref<1x9x8x16xf32, #tpu.memory_space<vmem>>, vector<1x1x8x16xf32>
    %48 = vector.shape_cast %47 : vector<1x1x8x16xf32> to vector<8x16xf32>
    %c8_35 = arith.constant 8 : index
    %49 = memref.load %arg2[%c8_35] : memref<9xf32, #tpu.memory_space<smem>>
    %50 = vector.broadcast %49 : f32 to vector<8x16xf32>
    %51 = arith.mulf %48, %50 : vector<8x16xf32>
    %52 = arith.addf %46, %51 : vector<8x16xf32>
    %c0_36 = arith.constant 0 : index
    %53 = memref.load %arg3[%c0_36] : memref<1xf32, #tpu.memory_space<smem>>
    %54 = vector.broadcast %53 : f32 to vector<8x16xf32>
    %55 = arith.addf %52, %54 : vector<8x16xf32>
    %56 = arith.truncf %55 : vector<8x16xf32> to vector<8x16xbf16>
    %c0_37 = arith.constant 0 : index
    %c0_38 = arith.constant 0 : index
    %57 = vector.load %arg4[%c0_37, %c0_38] : memref<16x128xbf16, #tpu.memory_space<vmem>>, vector<16x128xbf16>
    %cst = arith.constant dense<0.000000e+00> : vector<8x128xf32>
    %58 = tpu.matmul %56, %57, %cst {dimension_numbers = #tpu.dot_dimension_numbers<[1], [0], [0], [1], [0, 0, 1, 1], [], []>} : vector<8x16xbf16>, vector<16x128xbf16>, vector<8x128xf32> -> vector<8x128xf32>
    %c0_39 = arith.constant 0 : index
    %c0_40 = arith.constant 0 : index
    %59 = vector.load %arg5[%c0_39, %c0_40] : memref<1x128xf32, #tpu.memory_space<vmem>>, vector<1x128xf32>
    %60 = vector.broadcast %59 : vector<1x128xf32> to vector<8x128xf32>
    %61 = arith.addf %58, %60 : vector<8x128xf32>
    %c0_41 = arith.constant 0 : index
    %c0_42 = arith.constant 0 : index
    %c0_43 = arith.constant 0 : index
    %62 = vector.load %arg6[%c0_41, %c0_42, %c0_43] : memref<1x8x128xf32, #tpu.memory_space<vmem>>, vector<1x8x128xf32>
    %63 = vector.shape_cast %62 : vector<1x8x128xf32> to vector<8x128xf32>
    %64 = vector.shape_cast %61 : vector<8x128xf32> to vector<1x8x128xf32>
    tpu.vector_store %arg6[%c0_41, %c0_42, %c0_43], %64 {strides = array<i32>} : memref<1x8x128xf32, #tpu.memory_space<vmem>>, vector<1x8x128xf32>,
    return
  }
  func.func @transform_0(%arg0: i32) -> (i32, i32, i32, i32) {
    %c0_i32 = arith.constant 0 : i32
    %c0_i32_0 = arith.constant 0 : i32
    %c0_i32_1 = arith.constant 0 : i32
    %c0_i32_2 = arith.constant 0 : i32
    return %arg0, %c0_i32, %c0_i32_0, %c0_i32_1 : i32, i32, i32, i32
  }
  func.func @transform_1(%arg0: i32) -> i32 {
    %c0_i32 = arith.constant 0 : i32
    %c0_i32_0 = arith.constant 0 : i32
    return %c0_i32 : i32
  }
  func.func @transform_2(%arg0: i32) -> i32 {
    %c0_i32 = arith.constant 0 : i32
    %c0_i32_0 = arith.constant 0 : i32
    return %c0_i32 : i32
  }
  func.func @transform_3(%arg0: i32) -> (i32, i32) {
    %c0_i32 = arith.constant 0 : i32
    %c0_i32_0 = arith.constant 0 : i32
    %c0_i32_1 = arith.constant 0 : i32
    return %c0_i32, %c0_i32_0 : i32, i32
  }
  func.func @transform_4(%arg0: i32) -> (i32, i32) {
    %c0_i32 = arith.constant 0 : i32
    %c0_i32_0 = arith.constant 0 : i32
    %c0_i32_1 = arith.constant 0 : i32
    return %c0_i32, %c0_i32_0 : i32, i32
  }
  func.func @transform_5(%arg0: i32) -> (i32, i32, i32) {
    %c0_i32 = arith.constant 0 : i32
    %c0_i32_0 = arith.constant 0 : i32
    %c0_i32_1 = arith.constant 0 : i32
    return %arg0, %c0_i32, %c0_i32_0 : i32, i32, i32
  }
}

module attributes {stable_mosaic.version = 11 : i64} {
  func.func @_ff_kernel(%arg0: i32, %arg1: memref<8x128xf32, #tpu.memory_space<vmem>>, %arg2: memref<1x128xf32, #tpu.memory_space<vmem>>, %arg3: memref<1x128xf32, #tpu.memory_space<vmem>>, %arg4: memref<128x128xbf16, #tpu.memory_space<vmem>>, %arg5: memref<1x128xf32, #tpu.memory_space<vmem>>, %arg6: memref<128x128xbf16, #tpu.memory_space<vmem>>, %arg7: memref<1x128xf32, #tpu.memory_space<vmem>>, %arg8: memref<8x128xf32, #tpu.memory_space<vmem>>) attributes {dimension_semantics = [#tpu.dimension_semantics<parallel>], iteration_bounds = array<i64: 2>, scalar_prefetch = 0 : i64, scratch_operands = 0 : i64, tpu.core_type = #tpu.core_type<tc>, window_params = [{transform_indices = @transform_0, window_bounds = array<i64: 8, 128>}, {pipeline_mode = #tpu.pipeline_mode<synchronous>, transform_indices = @transform_1, window_bounds = array<i64: 1, 128>}, {pipeline_mode = #tpu.pipeline_mode<synchronous>, transform_indices = @transform_2, window_bounds = array<i64: 1, 128>}, {pipeline_mode = #tpu.pipeline_mode<synchronous>, transform_indices = @transform_3, window_bounds = array<i64: 128, 128>}, {pipeline_mode = #tpu.pipeline_mode<synchronous>, transform_indices = @transform_4, window_bounds = array<i64: 1, 128>}, {pipeline_mode = #tpu.pipeline_mode<synchronous>, transform_indices = @transform_5, window_bounds = array<i64: 128, 128>}, {pipeline_mode = #tpu.pipeline_mode<synchronous>, transform_indices = @transform_6, window_bounds = array<i64: 1, 128>}, {transform_indices = @transform_7, window_bounds = array<i64: 8, 128>}]} {
    %c0 = arith.constant 0 : index
    %c0_0 = arith.constant 0 : index
    %0 = vector.load %arg1[%c0, %c0_0] : memref<8x128xf32, #tpu.memory_space<vmem>>, vector<8x128xf32>
    %c0_1 = arith.constant 0 : index
    %c0_2 = arith.constant 0 : index
    %1 = vector.load %arg2[%c0_1, %c0_2] : memref<1x128xf32, #tpu.memory_space<vmem>>, vector<1x128xf32>
    %c0_3 = arith.constant 0 : index
    %c0_4 = arith.constant 0 : index
    %2 = vector.load %arg3[%c0_3, %c0_4] : memref<1x128xf32, #tpu.memory_space<vmem>>, vector<1x128xf32>
    %cst = arith.constant dense<0.000000e+00> : vector<8xf32>
    %3 = vector.multi_reduction <add>, %0, %cst [1] : vector<8x128xf32> to vector<8xf32>
    %4 = vector.shape_cast %3 : vector<8xf32> to vector<8x1xf32>
    %cst_5 = arith.constant 3.125000e-02 : f32
    %5 = vector.broadcast %cst_5 : f32 to vector<8x1xf32>
    %6 = arith.mulf %4, %5 : vector<8x1xf32>
    %7 = vector.broadcast %6 : vector<8x1xf32> to vector<8x128xf32>
    %8 = arith.subf %0, %7 : vector<8x128xf32>
    %9 = arith.mulf %8, %8 : vector<8x128xf32>
    %cst_6 = arith.constant dense<0.000000e+00> : vector<8xf32>
    %10 = vector.multi_reduction <add>, %9, %cst_6 [1] : vector<8x128xf32> to vector<8xf32>
    %11 = vector.shape_cast %10 : vector<8xf32> to vector<8x1xf32>
    %cst_7 = arith.constant 9.600000e+01 : f32
    %12 = vector.broadcast %cst_7 : f32 to vector<8x1xf32>
    %13 = arith.mulf %12, %6 : vector<8x1xf32>
    %14 = arith.mulf %13, %6 : vector<8x1xf32>
    %15 = arith.subf %11, %14 : vector<8x1xf32>
    %cst_8 = arith.constant 3.125000e-02 : f32
    %16 = vector.broadcast %cst_8 : f32 to vector<8x1xf32>
    %17 = arith.mulf %15, %16 : vector<8x1xf32>
    %cst_9 = arith.constant 9.99999974E-6 : f32
    %18 = vector.broadcast %cst_9 : f32 to vector<8x1xf32>
    %19 = arith.addf %17, %18 : vector<8x1xf32>
    %20 = math.rsqrt %19 : vector<8x1xf32>
    %21 = vector.broadcast %20 : vector<8x1xf32> to vector<8x128xf32>
    %22 = arith.mulf %8, %21 : vector<8x128xf32>
    %23 = vector.broadcast %1 : vector<1x128xf32> to vector<8x128xf32>
    %24 = arith.mulf %22, %23 : vector<8x128xf32>
    %25 = vector.broadcast %2 : vector<1x128xf32> to vector<8x128xf32>
    %26 = arith.addf %24, %25 : vector<8x128xf32>
    %27 = arith.truncf %26 : vector<8x128xf32> to vector<8x128xbf16>
    %cst_10 = arith.constant 0.000000e+00 : f32
    %28 = vector.broadcast %cst_10 : f32 to vector<8x128xf32>
    %c0_11 = arith.constant 0 : index
    %c0_12 = arith.constant 0 : index
    %29 = vector.load %arg4[%c0_11, %c0_12] : memref<128x128xbf16, #tpu.memory_space<vmem>>, vector<128x128xbf16>
    %cst_13 = arith.constant dense<0.000000e+00> : vector<8x128xf32>
    %30 = tpu.matmul %27, %29, %cst_13 {dimension_numbers = #tpu.dot_dimension_numbers<[1], [0], [0], [1], [0, 0, 1, 1], [], []>} : vector<8x128xbf16>, vector<128x128xbf16>, vector<8x128xf32> -> vector<8x128xf32>
    %c0_14 = arith.constant 0 : index
    %c0_15 = arith.constant 0 : index
    %31 = vector.load %arg5[%c0_14, %c0_15] : memref<1x128xf32, #tpu.memory_space<vmem>>, vector<1x128xf32>
    %32 = vector.broadcast %31 : vector<1x128xf32> to vector<8x128xf32>
    %33 = arith.addf %30, %32 : vector<8x128xf32>
    %34 = arith.negf %33 : vector<8x128xf32>
    %35 = math.exp %34 : vector<8x128xf32>
    %cst_16 = arith.constant 1.000000e+00 : f32
    %36 = vector.broadcast %cst_16 : f32 to vector<8x128xf32>
    %37 = arith.addf %36, %35 : vector<8x128xf32>
    %38 = arith.divf %36, %37 : vector<8x128xf32>
    %39 = arith.mulf %33, %38 : vector<8x128xf32>
    %40 = arith.truncf %39 : vector<8x128xf32> to vector<8x128xbf16>
    %c0_17 = arith.constant 0 : index
    %c0_18 = arith.constant 0 : index
    %41 = vector.load %arg6[%c0_17, %c0_18] : memref<128x128xbf16, #tpu.memory_space<vmem>>, vector<128x128xbf16>
    %cst_19 = arith.constant dense<0.000000e+00> : vector<8x128xf32>
    %42 = tpu.matmul %40, %41, %cst_19 {dimension_numbers = #tpu.dot_dimension_numbers<[1], [0], [0], [1], [0, 0, 1, 1], [], []>} : vector<8x128xbf16>, vector<128x128xbf16>, vector<8x128xf32> -> vector<8x128xf32>
    %43 = arith.addf %28, %42 : vector<8x128xf32>
    %c0_20 = arith.constant 0 : index
    %c0_21 = arith.constant 0 : index
    %44 = vector.load %arg7[%c0_20, %c0_21] : memref<1x128xf32, #tpu.memory_space<vmem>>, vector<1x128xf32>
    %45 = vector.broadcast %44 : vector<1x128xf32> to vector<8x128xf32>
    %46 = arith.addf %43, %45 : vector<8x128xf32>
    %cst_22 = arith.constant 5.000000e-01 : f32
    %47 = vector.broadcast %cst_22 : f32 to vector<8x128xf32>
    %48 = arith.mulf %47, %46 : vector<8x128xf32>
    %49 = arith.addf %0, %48 : vector<8x128xf32>
    %c0_23 = arith.constant 0 : index
    %c0_24 = arith.constant 0 : index
    %50 = vector.load %arg8[%c0_23, %c0_24] : memref<8x128xf32, #tpu.memory_space<vmem>>, vector<8x128xf32>
    tpu.vector_store %arg8[%c0_23, %c0_24], %49 {strides = array<i32>} : memref<8x128xf32, #tpu.memory_space<vmem>>, vector<8x128xf32>,
    return
  }
  func.func @transform_0(%arg0: i32) -> (i32, i32) {
    %c0_i32 = arith.constant 0 : i32
    %c0_i32_0 = arith.constant 0 : i32
    return %arg0, %c0_i32 : i32, i32
  }
  func.func @transform_1(%arg0: i32) -> (i32, i32) {
    %c0_i32 = arith.constant 0 : i32
    %c0_i32_0 = arith.constant 0 : i32
    %c0_i32_1 = arith.constant 0 : i32
    return %c0_i32, %c0_i32_0 : i32, i32
  }
  func.func @transform_2(%arg0: i32) -> (i32, i32) {
    %c0_i32 = arith.constant 0 : i32
    %c0_i32_0 = arith.constant 0 : i32
    %c0_i32_1 = arith.constant 0 : i32
    return %c0_i32, %c0_i32_0 : i32, i32
  }
  func.func @transform_3(%arg0: i32) -> (i32, i32) {
    %c0_i32 = arith.constant 0 : i32
    %c0_i32_0 = arith.constant 0 : i32
    %c0_i32_1 = arith.constant 0 : i32
    return %c0_i32, %c0_i32_0 : i32, i32
  }
  func.func @transform_4(%arg0: i32) -> (i32, i32) {
    %c0_i32 = arith.constant 0 : i32
    %c0_i32_0 = arith.constant 0 : i32
    %c0_i32_1 = arith.constant 0 : i32
    return %c0_i32, %c0_i32_0 : i32, i32
  }
  func.func @transform_5(%arg0: i32) -> (i32, i32) {
    %c0_i32 = arith.constant 0 : i32
    %c0_i32_0 = arith.constant 0 : i32
    %c0_i32_1 = arith.constant 0 : i32
    return %c0_i32, %c0_i32_0 : i32, i32
  }
  func.func @transform_6(%arg0: i32) -> (i32, i32) {
    %c0_i32 = arith.constant 0 : i32
    %c0_i32_0 = arith.constant 0 : i32
    %c0_i32_1 = arith.constant 0 : i32
    return %c0_i32, %c0_i32_0 : i32, i32
  }
  func.func @transform_7(%arg0: i32) -> (i32, i32) {
    %c0_i32 = arith.constant 0 : i32
    %c0_i32_0 = arith.constant 0 : i32
    return %arg0, %c0_i32 : i32, i32
  }
}

module attributes {stable_mosaic.version = 11 : i64} {
  func.func @_mhsa_conv_kernel(%arg0: i32, %arg1: memref<8x128xf32, #tpu.memory_space<vmem>>, %arg2: memref<1x128xf32, #tpu.memory_space<vmem>>, %arg3: memref<1x128xf32, #tpu.memory_space<vmem>>, %arg4: memref<128x384xbf16, #tpu.memory_space<vmem>>, %arg5: memref<1x384xf32, #tpu.memory_space<vmem>>, %arg6: memref<128x128xbf16, #tpu.memory_space<vmem>>, %arg7: memref<1x128xf32, #tpu.memory_space<vmem>>, %arg8: memref<1x128xf32, #tpu.memory_space<vmem>>, %arg9: memref<1x128xf32, #tpu.memory_space<vmem>>, %arg10: memref<128x256xbf16, #tpu.memory_space<vmem>>, %arg11: memref<1x256xf32, #tpu.memory_space<vmem>>, %arg12: memref<7x128xf32, #tpu.memory_space<vmem>>, %arg13: memref<1x128xf32, #tpu.memory_space<vmem>>, %arg14: memref<1x128xf32, #tpu.memory_space<vmem>>, %arg15: memref<128x128xbf16, #tpu.memory_space<vmem>>, %arg16: memref<1x128xf32, #tpu.memory_space<vmem>>, %arg17: memref<8x128xf32, #tpu.memory_space<vmem>>, %arg18: memref<8x128xf32, #tpu.memory_space<vmem>>, %arg19: memref<14x128xf32, #tpu.memory_space<vmem>>) attributes {dimension_semantics = [#tpu.dimension_semantics<parallel>], iteration_bounds = array<i64: 2>, scalar_prefetch = 0 : i64, scratch_operands = 2 : i64, tpu.core_type = #tpu.core_type<tc>, window_params = [{transform_indices = @transform_0, window_bounds = array<i64: 8, 128>}, {pipeline_mode = #tpu.pipeline_mode<synchronous>, transform_indices = @transform_1, window_bounds = array<i64: 1, 128>}, {pipeline_mode = #tpu.pipeline_mode<synchronous>, transform_indices = @transform_2, window_bounds = array<i64: 1, 128>}, {pipeline_mode = #tpu.pipeline_mode<synchronous>, transform_indices = @transform_3, window_bounds = array<i64: 128, 384>}, {pipeline_mode = #tpu.pipeline_mode<synchronous>, transform_indices = @transform_4, window_bounds = array<i64: 1, 384>}, {pipeline_mode = #tpu.pipeline_mode<synchronous>, transform_indices = @transform_5, window_bounds = array<i64: 128, 128>}, {pipeline_mode = #tpu.pipeline_mode<synchronous>, transform_indices = @transform_6, window_bounds = array<i64: 1, 128>}, {pipeline_mode = #tpu.pipeline_mode<synchronous>, transform_indices = @transform_7, window_bounds = array<i64: 1, 128>}, {pipeline_mode = #tpu.pipeline_mode<synchronous>, transform_indices = @transform_8, window_bounds = array<i64: 1, 128>}, {pipeline_mode = #tpu.pipeline_mode<synchronous>, transform_indices = @transform_9, window_bounds = array<i64: 128, 256>}, {pipeline_mode = #tpu.pipeline_mode<synchronous>, transform_indices = @transform_10, window_bounds = array<i64: 1, 256>}, {pipeline_mode = #tpu.pipeline_mode<synchronous>, transform_indices = @transform_11, window_bounds = array<i64: 7, 128>}, {pipeline_mode = #tpu.pipeline_mode<synchronous>, transform_indices = @transform_12, window_bounds = array<i64: 1, 128>}, {pipeline_mode = #tpu.pipeline_mode<synchronous>, transform_indices = @transform_13, window_bounds = array<i64: 1, 128>}, {pipeline_mode = #tpu.pipeline_mode<synchronous>, transform_indices = @transform_14, window_bounds = array<i64: 128, 128>}, {pipeline_mode = #tpu.pipeline_mode<synchronous>, transform_indices = @transform_15, window_bounds = array<i64: 1, 128>}, {transform_indices = @transform_16, window_bounds = array<i64: 8, 128>}]} {
    %c0 = arith.constant 0 : index
    %c0_0 = arith.constant 0 : index
    %0 = vector.load %arg1[%c0, %c0_0] : memref<8x128xf32, #tpu.memory_space<vmem>>, vector<8x128xf32>
    %c0_1 = arith.constant 0 : index
    %c0_2 = arith.constant 0 : index
    %1 = vector.load %arg2[%c0_1, %c0_2] : memref<1x128xf32, #tpu.memory_space<vmem>>, vector<1x128xf32>
    %c0_3 = arith.constant 0 : index
    %c0_4 = arith.constant 0 : index
    %2 = vector.load %arg3[%c0_3, %c0_4] : memref<1x128xf32, #tpu.memory_space<vmem>>, vector<1x128xf32>
    %cst = arith.constant dense<0.000000e+00> : vector<8xf32>
    %3 = vector.multi_reduction <add>, %0, %cst [1] : vector<8x128xf32> to vector<8xf32>
    %4 = vector.shape_cast %3 : vector<8xf32> to vector<8x1xf32>
    %cst_5 = arith.constant 3.125000e-02 : f32
    %5 = vector.broadcast %cst_5 : f32 to vector<8x1xf32>
    %6 = arith.mulf %4, %5 : vector<8x1xf32>
    %7 = vector.broadcast %6 : vector<8x1xf32> to vector<8x128xf32>
    %8 = arith.subf %0, %7 : vector<8x128xf32>
    %9 = arith.mulf %8, %8 : vector<8x128xf32>
    %cst_6 = arith.constant dense<0.000000e+00> : vector<8xf32>
    %10 = vector.multi_reduction <add>, %9, %cst_6 [1] : vector<8x128xf32> to vector<8xf32>
    %11 = vector.shape_cast %10 : vector<8xf32> to vector<8x1xf32>
    %cst_7 = arith.constant 9.600000e+01 : f32
    %12 = vector.broadcast %cst_7 : f32 to vector<8x1xf32>
    %13 = arith.mulf %12, %6 : vector<8x1xf32>
    %14 = arith.mulf %13, %6 : vector<8x1xf32>
    %15 = arith.subf %11, %14 : vector<8x1xf32>
    %cst_8 = arith.constant 3.125000e-02 : f32
    %16 = vector.broadcast %cst_8 : f32 to vector<8x1xf32>
    %17 = arith.mulf %15, %16 : vector<8x1xf32>
    %cst_9 = arith.constant 9.99999974E-6 : f32
    %18 = vector.broadcast %cst_9 : f32 to vector<8x1xf32>
    %19 = arith.addf %17, %18 : vector<8x1xf32>
    %20 = math.rsqrt %19 : vector<8x1xf32>
    %21 = vector.broadcast %20 : vector<8x1xf32> to vector<8x128xf32>
    %22 = arith.mulf %8, %21 : vector<8x128xf32>
    %23 = vector.broadcast %1 : vector<1x128xf32> to vector<8x128xf32>
    %24 = arith.mulf %22, %23 : vector<8x128xf32>
    %25 = vector.broadcast %2 : vector<1x128xf32> to vector<8x128xf32>
    %26 = arith.addf %24, %25 : vector<8x128xf32>
    %27 = arith.truncf %26 : vector<8x128xf32> to vector<8x128xbf16>
    %c0_10 = arith.constant 0 : index
    %c0_11 = arith.constant 0 : index
    %28 = vector.load %arg4[%c0_10, %c0_11] : memref<128x384xbf16, #tpu.memory_space<vmem>>, vector<128x384xbf16>
    %cst_12 = arith.constant dense<0.000000e+00> : vector<8x384xf32>
    %29 = tpu.matmul %27, %28, %cst_12 {dimension_numbers = #tpu.dot_dimension_numbers<[1], [0], [0], [1], [0, 0, 1, 1], [], []>} : vector<8x128xbf16>, vector<128x384xbf16>, vector<8x384xf32> -> vector<8x384xf32>
    %c0_13 = arith.constant 0 : index
    %c0_14 = arith.constant 0 : index
    %30 = vector.load %arg5[%c0_13, %c0_14] : memref<1x384xf32, #tpu.memory_space<vmem>>, vector<1x384xf32>
    %31 = vector.broadcast %30 : vector<1x384xf32> to vector<8x384xf32>
    %32 = arith.addf %29, %31 : vector<8x384xf32>
    %cst_15 = arith.constant 0.000000e+00 : f32
    %33 = vector.broadcast %cst_15 : f32 to vector<8x96xf32>
    %c0_16 = arith.constant 0 : index
    %c32 = arith.constant 32 : index
    %34 = vector.load %arg18[%c0_16, %c32] : memref<8x128xf32, #tpu.memory_space<vmem>>, vector<8x96xf32>
    tpu.vector_store %arg18[%c0_16, %c32], %33 {strides = array<i32>} : memref<8x128xf32, #tpu.memory_space<vmem>>, vector<8x96xf32>,
    %35 = vector.extract_strided_slice %32 {offsets = [0, 0], sizes = [8, 8], strides = [1, 1]} : vector<8x384xf32> to vector<8x8xf32>
    %36 = arith.truncf %35 : vector<8x8xf32> to vector<8x8xbf16>
    %37 = vector.extract_strided_slice %32 {offsets = [0, 128], sizes = [8, 8], strides = [1, 1]} : vector<8x384xf32> to vector<8x8xf32>
    %38 = arith.truncf %37 : vector<8x8xf32> to vector<8x8xbf16>
    %39 = vector.extract_strided_slice %32 {offsets = [0, 256], sizes = [8, 8], strides = [1, 1]} : vector<8x384xf32> to vector<8x8xf32>
    %40 = arith.truncf %39 : vector<8x8xf32> to vector<8x8xbf16>
    %cst_17 = arith.constant dense<0.000000e+00> : vector<8x8xf32>
    %41 = tpu.matmul %36, %38, %cst_17 {dimension_numbers = #tpu.dot_dimension_numbers<[1], [1], [0], [0], [0, 0, 1, 0], [], []>} : vector<8x8xbf16>, vector<8x8xbf16>, vector<8x8xf32> -> vector<8x8xf32>
    %cst_18 = arith.constant dense<0xFF800000> : vector<8xf32>
    %42 = vector.multi_reduction <maximumf>, %41, %cst_18 [1] : vector<8x8xf32> to vector<8xf32>
    %43 = vector.shape_cast %42 : vector<8xf32> to vector<8x1xf32>
    %44 = vector.broadcast %43 : vector<8x1xf32> to vector<8x8xf32>
    %45 = arith.subf %41, %44 : vector<8x8xf32>
    %46 = math.exp %45 : vector<8x8xf32>
    %cst_19 = arith.constant dense<0.000000e+00> : vector<8xf32>
    %47 = vector.multi_reduction <add>, %46, %cst_19 [1] : vector<8x8xf32> to vector<8xf32>
    %48 = vector.shape_cast %47 : vector<8xf32> to vector<8x1xf32>
    %cst_20 = arith.constant 1.000000e+00 : f32
    %49 = vector.broadcast %cst_20 : f32 to vector<8x1xf32>
    %50 = arith.divf %49, %48 : vector<8x1xf32>
    %51 = vector.broadcast %50 : vector<8x1xf32> to vector<8x8xf32>
    %52 = arith.mulf %46, %51 : vector<8x8xf32>
    %53 = arith.truncf %52 : vector<8x8xf32> to vector<8x8xbf16>
    %cst_21 = arith.constant dense<0.000000e+00> : vector<8x8xf32>
    %54 = tpu.matmul %53, %40, %cst_21 {dimension_numbers = #tpu.dot_dimension_numbers<[1], [0], [0], [1], [0, 0, 1, 1], [], []>} : vector<8x8xbf16>, vector<8x8xbf16>, vector<8x8xf32> -> vector<8x8xf32>
    %c0_22 = arith.constant 0 : index
    %c0_23 = arith.constant 0 : index
    %55 = vector.load %arg18[%c0_22, %c0_23] : memref<8x128xf32, #tpu.memory_space<vmem>>, vector<8x8xf32>
    tpu.vector_store %arg18[%c0_22, %c0_23], %54 {strides = array<i32>} : memref<8x128xf32, #tpu.memory_space<vmem>>, vector<8x8xf32>,
    %56 = vector.extract_strided_slice %32 {offsets = [0, 8], sizes = [8, 8], strides = [1, 1]} : vector<8x384xf32> to vector<8x8xf32>
    %57 = arith.truncf %56 : vector<8x8xf32> to vector<8x8xbf16>
    %58 = vector.extract_strided_slice %32 {offsets = [0, 136], sizes = [8, 8], strides = [1, 1]} : vector<8x384xf32> to vector<8x8xf32>
    %59 = arith.truncf %58 : vector<8x8xf32> to vector<8x8xbf16>
    %60 = vector.extract_strided_slice %32 {offsets = [0, 264], sizes = [8, 8], strides = [1, 1]} : vector<8x384xf32> to vector<8x8xf32>
    %61 = arith.truncf %60 : vector<8x8xf32> to vector<8x8xbf16>
    %cst_24 = arith.constant dense<0.000000e+00> : vector<8x8xf32>
    %62 = tpu.matmul %57, %59, %cst_24 {dimension_numbers = #tpu.dot_dimension_numbers<[1], [1], [0], [0], [0, 0, 1, 0], [], []>} : vector<8x8xbf16>, vector<8x8xbf16>, vector<8x8xf32> -> vector<8x8xf32>
    %cst_25 = arith.constant dense<0xFF800000> : vector<8xf32>
    %63 = vector.multi_reduction <maximumf>, %62, %cst_25 [1] : vector<8x8xf32> to vector<8xf32>
    %64 = vector.shape_cast %63 : vector<8xf32> to vector<8x1xf32>
    %65 = vector.broadcast %64 : vector<8x1xf32> to vector<8x8xf32>
    %66 = arith.subf %62, %65 : vector<8x8xf32>
    %67 = math.exp %66 : vector<8x8xf32>
    %cst_26 = arith.constant dense<0.000000e+00> : vector<8xf32>
    %68 = vector.multi_reduction <add>, %67, %cst_26 [1] : vector<8x8xf32> to vector<8xf32>
    %69 = vector.shape_cast %68 : vector<8xf32> to vector<8x1xf32>
    %cst_27 = arith.constant 1.000000e+00 : f32
    %70 = vector.broadcast %cst_27 : f32 to vector<8x1xf32>
    %71 = arith.divf %70, %69 : vector<8x1xf32>
    %72 = vector.broadcast %71 : vector<8x1xf32> to vector<8x8xf32>
    %73 = arith.mulf %67, %72 : vector<8x8xf32>
    %74 = arith.truncf %73 : vector<8x8xf32> to vector<8x8xbf16>
    %cst_28 = arith.constant dense<0.000000e+00> : vector<8x8xf32>
    %75 = tpu.matmul %74, %61, %cst_28 {dimension_numbers = #tpu.dot_dimension_numbers<[1], [0], [0], [1], [0, 0, 1, 1], [], []>} : vector<8x8xbf16>, vector<8x8xbf16>, vector<8x8xf32> -> vector<8x8xf32>
    %c0_29 = arith.constant 0 : index
    %c8 = arith.constant 8 : index
    %76 = vector.load %arg18[%c0_29, %c8] : memref<8x128xf32, #tpu.memory_space<vmem>>, vector<8x8xf32>
    tpu.vector_store %arg18[%c0_29, %c8], %75 {strides = array<i32>} : memref<8x128xf32, #tpu.memory_space<vmem>>, vector<8x8xf32>,
    %77 = vector.extract_strided_slice %32 {offsets = [0, 16], sizes = [8, 8], strides = [1, 1]} : vector<8x384xf32> to vector<8x8xf32>
    %78 = arith.truncf %77 : vector<8x8xf32> to vector<8x8xbf16>
    %79 = vector.extract_strided_slice %32 {offsets = [0, 144], sizes = [8, 8], strides = [1, 1]} : vector<8x384xf32> to vector<8x8xf32>
    %80 = arith.truncf %79 : vector<8x8xf32> to vector<8x8xbf16>
    %81 = vector.extract_strided_slice %32 {offsets = [0, 272], sizes = [8, 8], strides = [1, 1]} : vector<8x384xf32> to vector<8x8xf32>
    %82 = arith.truncf %81 : vector<8x8xf32> to vector<8x8xbf16>
    %cst_30 = arith.constant dense<0.000000e+00> : vector<8x8xf32>
    %83 = tpu.matmul %78, %80, %cst_30 {dimension_numbers = #tpu.dot_dimension_numbers<[1], [1], [0], [0], [0, 0, 1, 0], [], []>} : vector<8x8xbf16>, vector<8x8xbf16>, vector<8x8xf32> -> vector<8x8xf32>
    %cst_31 = arith.constant dense<0xFF800000> : vector<8xf32>
    %84 = vector.multi_reduction <maximumf>, %83, %cst_31 [1] : vector<8x8xf32> to vector<8xf32>
    %85 = vector.shape_cast %84 : vector<8xf32> to vector<8x1xf32>
    %86 = vector.broadcast %85 : vector<8x1xf32> to vector<8x8xf32>
    %87 = arith.subf %83, %86 : vector<8x8xf32>
    %88 = math.exp %87 : vector<8x8xf32>
    %cst_32 = arith.constant dense<0.000000e+00> : vector<8xf32>
    %89 = vector.multi_reduction <add>, %88, %cst_32 [1] : vector<8x8xf32> to vector<8xf32>
    %90 = vector.shape_cast %89 : vector<8xf32> to vector<8x1xf32>
    %cst_33 = arith.constant 1.000000e+00 : f32
    %91 = vector.broadcast %cst_33 : f32 to vector<8x1xf32>
    %92 = arith.divf %91, %90 : vector<8x1xf32>
    %93 = vector.broadcast %92 : vector<8x1xf32> to vector<8x8xf32>
    %94 = arith.mulf %88, %93 : vector<8x8xf32>
    %95 = arith.truncf %94 : vector<8x8xf32> to vector<8x8xbf16>
    %cst_34 = arith.constant dense<0.000000e+00> : vector<8x8xf32>
    %96 = tpu.matmul %95, %82, %cst_34 {dimension_numbers = #tpu.dot_dimension_numbers<[1], [0], [0], [1], [0, 0, 1, 1], [], []>} : vector<8x8xbf16>, vector<8x8xbf16>, vector<8x8xf32> -> vector<8x8xf32>
    %c0_35 = arith.constant 0 : index
    %c16 = arith.constant 16 : index
    %97 = vector.load %arg18[%c0_35, %c16] : memref<8x128xf32, #tpu.memory_space<vmem>>, vector<8x8xf32>
    tpu.vector_store %arg18[%c0_35, %c16], %96 {strides = array<i32>} : memref<8x128xf32, #tpu.memory_space<vmem>>, vector<8x8xf32>,
    %98 = vector.extract_strided_slice %32 {offsets = [0, 24], sizes = [8, 8], strides = [1, 1]} : vector<8x384xf32> to vector<8x8xf32>
    %99 = arith.truncf %98 : vector<8x8xf32> to vector<8x8xbf16>
    %100 = vector.extract_strided_slice %32 {offsets = [0, 152], sizes = [8, 8], strides = [1, 1]} : vector<8x384xf32> to vector<8x8xf32>
    %101 = arith.truncf %100 : vector<8x8xf32> to vector<8x8xbf16>
    %102 = vector.extract_strided_slice %32 {offsets = [0, 280], sizes = [8, 8], strides = [1, 1]} : vector<8x384xf32> to vector<8x8xf32>
    %103 = arith.truncf %102 : vector<8x8xf32> to vector<8x8xbf16>
    %cst_36 = arith.constant dense<0.000000e+00> : vector<8x8xf32>
    %104 = tpu.matmul %99, %101, %cst_36 {dimension_numbers = #tpu.dot_dimension_numbers<[1], [1], [0], [0], [0, 0, 1, 0], [], []>} : vector<8x8xbf16>, vector<8x8xbf16>, vector<8x8xf32> -> vector<8x8xf32>
    %cst_37 = arith.constant dense<0xFF800000> : vector<8xf32>
    %105 = vector.multi_reduction <maximumf>, %104, %cst_37 [1] : vector<8x8xf32> to vector<8xf32>
    %106 = vector.shape_cast %105 : vector<8xf32> to vector<8x1xf32>
    %107 = vector.broadcast %106 : vector<8x1xf32> to vector<8x8xf32>
    %108 = arith.subf %104, %107 : vector<8x8xf32>
    %109 = math.exp %108 : vector<8x8xf32>
    %cst_38 = arith.constant dense<0.000000e+00> : vector<8xf32>
    %110 = vector.multi_reduction <add>, %109, %cst_38 [1] : vector<8x8xf32> to vector<8xf32>
    %111 = vector.shape_cast %110 : vector<8xf32> to vector<8x1xf32>
    %cst_39 = arith.constant 1.000000e+00 : f32
    %112 = vector.broadcast %cst_39 : f32 to vector<8x1xf32>
    %113 = arith.divf %112, %111 : vector<8x1xf32>
    %114 = vector.broadcast %113 : vector<8x1xf32> to vector<8x8xf32>
    %115 = arith.mulf %109, %114 : vector<8x8xf32>
    %116 = arith.truncf %115 : vector<8x8xf32> to vector<8x8xbf16>
    %cst_40 = arith.constant dense<0.000000e+00> : vector<8x8xf32>
    %117 = tpu.matmul %116, %103, %cst_40 {dimension_numbers = #tpu.dot_dimension_numbers<[1], [0], [0], [1], [0, 0, 1, 1], [], []>} : vector<8x8xbf16>, vector<8x8xbf16>, vector<8x8xf32> -> vector<8x8xf32>
    %c0_41 = arith.constant 0 : index
    %c24 = arith.constant 24 : index
    %118 = vector.load %arg18[%c0_41, %c24] : memref<8x128xf32, #tpu.memory_space<vmem>>, vector<8x8xf32>
    tpu.vector_store %arg18[%c0_41, %c24], %117 {strides = array<i32>} : memref<8x128xf32, #tpu.memory_space<vmem>>, vector<8x8xf32>,
    %c0_42 = arith.constant 0 : index
    %c0_43 = arith.constant 0 : index
    %119 = vector.load %arg18[%c0_42, %c0_43] : memref<8x128xf32, #tpu.memory_space<vmem>>, vector<8x128xf32>
    %120 = arith.truncf %119 : vector<8x128xf32> to vector<8x128xbf16>
    %c0_44 = arith.constant 0 : index
    %c0_45 = arith.constant 0 : index
    %121 = vector.load %arg6[%c0_44, %c0_45] : memref<128x128xbf16, #tpu.memory_space<vmem>>, vector<128x128xbf16>
    %cst_46 = arith.constant dense<0.000000e+00> : vector<8x128xf32>
    %122 = tpu.matmul %120, %121, %cst_46 {dimension_numbers = #tpu.dot_dimension_numbers<[1], [0], [0], [1], [0, 0, 1, 1], [], []>} : vector<8x128xbf16>, vector<128x128xbf16>, vector<8x128xf32> -> vector<8x128xf32>
    %c0_47 = arith.constant 0 : index
    %c0_48 = arith.constant 0 : index
    %123 = vector.load %arg7[%c0_47, %c0_48] : memref<1x128xf32, #tpu.memory_space<vmem>>, vector<1x128xf32>
    %124 = vector.broadcast %123 : vector<1x128xf32> to vector<8x128xf32>
    %125 = arith.addf %122, %124 : vector<8x128xf32>
    %126 = arith.addf %0, %125 : vector<8x128xf32>
    %c0_49 = arith.constant 0 : index
    %c0_50 = arith.constant 0 : index
    %127 = vector.load %arg8[%c0_49, %c0_50] : memref<1x128xf32, #tpu.memory_space<vmem>>, vector<1x128xf32>
    %c0_51 = arith.constant 0 : index
    %c0_52 = arith.constant 0 : index
    %128 = vector.load %arg9[%c0_51, %c0_52] : memref<1x128xf32, #tpu.memory_space<vmem>>, vector<1x128xf32>
    %cst_53 = arith.constant dense<0.000000e+00> : vector<8xf32>
    %129 = vector.multi_reduction <add>, %126, %cst_53 [1] : vector<8x128xf32> to vector<8xf32>
    %130 = vector.shape_cast %129 : vector<8xf32> to vector<8x1xf32>
    %cst_54 = arith.constant 3.125000e-02 : f32
    %131 = vector.broadcast %cst_54 : f32 to vector<8x1xf32>
    %132 = arith.mulf %130, %131 : vector<8x1xf32>
    %133 = vector.broadcast %132 : vector<8x1xf32> to vector<8x128xf32>
    %134 = arith.subf %126, %133 : vector<8x128xf32>
    %135 = arith.mulf %134, %134 : vector<8x128xf32>
    %cst_55 = arith.constant dense<0.000000e+00> : vector<8xf32>
    %136 = vector.multi_reduction <add>, %135, %cst_55 [1] : vector<8x128xf32> to vector<8xf32>
    %137 = vector.shape_cast %136 : vector<8xf32> to vector<8x1xf32>
    %cst_56 = arith.constant 9.600000e+01 : f32
    %138 = vector.broadcast %cst_56 : f32 to vector<8x1xf32>
    %139 = arith.mulf %138, %132 : vector<8x1xf32>
    %140 = arith.mulf %139, %132 : vector<8x1xf32>
    %141 = arith.subf %137, %140 : vector<8x1xf32>
    %cst_57 = arith.constant 3.125000e-02 : f32
    %142 = vector.broadcast %cst_57 : f32 to vector<8x1xf32>
    %143 = arith.mulf %141, %142 : vector<8x1xf32>
    %cst_58 = arith.constant 9.99999974E-6 : f32
    %144 = vector.broadcast %cst_58 : f32 to vector<8x1xf32>
    %145 = arith.addf %143, %144 : vector<8x1xf32>
    %146 = math.rsqrt %145 : vector<8x1xf32>
    %147 = vector.broadcast %146 : vector<8x1xf32> to vector<8x128xf32>
    %148 = arith.mulf %134, %147 : vector<8x128xf32>
    %149 = vector.broadcast %127 : vector<1x128xf32> to vector<8x128xf32>
    %150 = arith.mulf %148, %149 : vector<8x128xf32>
    %151 = vector.broadcast %128 : vector<1x128xf32> to vector<8x128xf32>
    %152 = arith.addf %150, %151 : vector<8x128xf32>
    %153 = arith.truncf %152 : vector<8x128xf32> to vector<8x128xbf16>
    %c0_59 = arith.constant 0 : index
    %c0_60 = arith.constant 0 : index
    %154 = vector.load %arg10[%c0_59, %c0_60] : memref<128x256xbf16, #tpu.memory_space<vmem>>, vector<128x256xbf16>
    %cst_61 = arith.constant dense<0.000000e+00> : vector<8x256xf32>
    %155 = tpu.matmul %153, %154, %cst_61 {dimension_numbers = #tpu.dot_dimension_numbers<[1], [0], [0], [1], [0, 0, 1, 1], [], []>} : vector<8x128xbf16>, vector<128x256xbf16>, vector<8x256xf32> -> vector<8x256xf32>
    %c0_62 = arith.constant 0 : index
    %c0_63 = arith.constant 0 : index
    %156 = vector.load %arg11[%c0_62, %c0_63] : memref<1x256xf32, #tpu.memory_space<vmem>>, vector<1x256xf32>
    %157 = vector.broadcast %156 : vector<1x256xf32> to vector<8x256xf32>
    %158 = arith.addf %155, %157 : vector<8x256xf32>
    %159 = vector.extract_strided_slice %158 {offsets = [0, 0], sizes = [8, 128], strides = [1, 1]} : vector<8x256xf32> to vector<8x128xf32>
    %160 = vector.extract_strided_slice %158 {offsets = [0, 128], sizes = [8, 128], strides = [1, 1]} : vector<8x256xf32> to vector<8x128xf32>
    %161 = arith.negf %160 : vector<8x128xf32>
    %162 = math.exp %161 : vector<8x128xf32>
    %cst_64 = arith.constant 1.000000e+00 : f32
    %163 = vector.broadcast %cst_64 : f32 to vector<8x128xf32>
    %164 = arith.addf %163, %162 : vector<8x128xf32>
    %165 = arith.divf %163, %164 : vector<8x128xf32>
    %166 = arith.mulf %159, %165 : vector<8x128xf32>
    %cst_65 = arith.constant 0.000000e+00 : f32
    %167 = vector.broadcast %cst_65 : f32 to vector<3x128xf32>
    %c0_66 = arith.constant 0 : index
    %c0_67 = arith.constant 0 : index
    %168 = vector.load %arg19[%c0_66, %c0_67] : memref<14x128xf32, #tpu.memory_space<vmem>>, vector<3x128xf32>
    tpu.vector_store %arg19[%c0_66, %c0_67], %167 {strides = array<i32>} : memref<14x128xf32, #tpu.memory_space<vmem>>, vector<3x128xf32>,
    %cst_68 = arith.constant 0.000000e+00 : f32
    %169 = vector.broadcast %cst_68 : f32 to vector<3x128xf32>
    %c11 = arith.constant 11 : index
    %c0_69 = arith.constant 0 : index
    %170 = vector.load %arg19[%c11, %c0_69] : memref<14x128xf32, #tpu.memory_space<vmem>>, vector<3x128xf32>
    tpu.vector_store %arg19[%c11, %c0_69], %169 {strides = array<i32>} : memref<14x128xf32, #tpu.memory_space<vmem>>, vector<3x128xf32>,
    %c3 = arith.constant 3 : index
    %c0_70 = arith.constant 0 : index
    %171 = vector.load %arg19[%c3, %c0_70] : memref<14x128xf32, #tpu.memory_space<vmem>>, vector<8x128xf32>
    tpu.vector_store %arg19[%c3, %c0_70], %166 {strides = array<i32>} : memref<14x128xf32, #tpu.memory_space<vmem>>, vector<8x128xf32>,
    %c0_71 = arith.constant 0 : index
    %c0_72 = arith.constant 0 : index
    %172 = vector.load %arg12[%c0_71, %c0_72] : memref<7x128xf32, #tpu.memory_space<vmem>>, vector<7x128xf32>
    %cst_73 = arith.constant 0.000000e+00 : f32
    %173 = vector.broadcast %cst_73 : f32 to vector<8x128xf32>
    %c0_74 = arith.constant 0 : index
    %c0_75 = arith.constant 0 : index
    %174 = vector.load %arg19[%c0_74, %c0_75] : memref<14x128xf32, #tpu.memory_space<vmem>>, vector<8x128xf32>
    %175 = vector.extract_strided_slice %172 {offsets = [0, 0], sizes = [1, 128], strides = [1, 1]} : vector<7x128xf32> to vector<1x128xf32>
    %176 = vector.broadcast %175 : vector<1x128xf32> to vector<8x128xf32>
    %177 = arith.mulf %174, %176 : vector<8x128xf32>
    %178 = arith.addf %173, %177 : vector<8x128xf32>
    %c1 = arith.constant 1 : index
    %c0_76 = arith.constant 0 : index
    %179 = vector.load %arg19[%c1, %c0_76] : memref<14x128xf32, #tpu.memory_space<vmem>>, vector<8x128xf32>
    %180 = vector.extract_strided_slice %172 {offsets = [1, 0], sizes = [1, 128], strides = [1, 1]} : vector<7x128xf32> to vector<1x128xf32>
    %181 = vector.broadcast %180 : vector<1x128xf32> to vector<8x128xf32>
    %182 = arith.mulf %179, %181 : vector<8x128xf32>
    %183 = arith.addf %178, %182 : vector<8x128xf32>
    %c2 = arith.constant 2 : index
    %c0_77 = arith.constant 0 : index
    %184 = vector.load %arg19[%c2, %c0_77] : memref<14x128xf32, #tpu.memory_space<vmem>>, vector<8x128xf32>
    %185 = vector.extract_strided_slice %172 {offsets = [2, 0], sizes = [1, 128], strides = [1, 1]} : vector<7x128xf32> to vector<1x128xf32>
    %186 = vector.broadcast %185 : vector<1x128xf32> to vector<8x128xf32>
    %187 = arith.mulf %184, %186 : vector<8x128xf32>
    %188 = arith.addf %183, %187 : vector<8x128xf32>
    %c3_78 = arith.constant 3 : index
    %c0_79 = arith.constant 0 : index
    %189 = vector.load %arg19[%c3_78, %c0_79] : memref<14x128xf32, #tpu.memory_space<vmem>>, vector<8x128xf32>
    %190 = vector.extract_strided_slice %172 {offsets = [3, 0], sizes = [1, 128], strides = [1, 1]} : vector<7x128xf32> to vector<1x128xf32>
    %191 = vector.broadcast %190 : vector<1x128xf32> to vector<8x128xf32>
    %192 = arith.mulf %189, %191 : vector<8x128xf32>
    %193 = arith.addf %188, %192 : vector<8x128xf32>
    %c4 = arith.constant 4 : index
    %c0_80 = arith.constant 0 : index
    %194 = vector.load %arg19[%c4, %c0_80] : memref<14x128xf32, #tpu.memory_space<vmem>>, vector<8x128xf32>
    %195 = vector.extract_strided_slice %172 {offsets = [4, 0], sizes = [1, 128], strides = [1, 1]} : vector<7x128xf32> to vector<1x128xf32>
    %196 = vector.broadcast %195 : vector<1x128xf32> to vector<8x128xf32>
    %197 = arith.mulf %194, %196 : vector<8x128xf32>
    %198 = arith.addf %193, %197 : vector<8x128xf32>
    %c5 = arith.constant 5 : index
    %c0_81 = arith.constant 0 : index
    %199 = vector.load %arg19[%c5, %c0_81] : memref<14x128xf32, #tpu.memory_space<vmem>>, vector<8x128xf32>
    %200 = vector.extract_strided_slice %172 {offsets = [5, 0], sizes = [1, 128], strides = [1, 1]} : vector<7x128xf32> to vector<1x128xf32>
    %201 = vector.broadcast %200 : vector<1x128xf32> to vector<8x128xf32>
    %202 = arith.mulf %199, %201 : vector<8x128xf32>
    %203 = arith.addf %198, %202 : vector<8x128xf32>
    %c6 = arith.constant 6 : index
    %c0_82 = arith.constant 0 : index
    %204 = vector.load %arg19[%c6, %c0_82] : memref<14x128xf32, #tpu.memory_space<vmem>>, vector<8x128xf32>
    %205 = vector.extract_strided_slice %172 {offsets = [6, 0], sizes = [1, 128], strides = [1, 1]} : vector<7x128xf32> to vector<1x128xf32>
    %206 = vector.broadcast %205 : vector<1x128xf32> to vector<8x128xf32>
    %207 = arith.mulf %204, %206 : vector<8x128xf32>
    %208 = arith.addf %203, %207 : vector<8x128xf32>
    %c0_83 = arith.constant 0 : index
    %c0_84 = arith.constant 0 : index
    %209 = vector.load %arg13[%c0_83, %c0_84] : memref<1x128xf32, #tpu.memory_space<vmem>>, vector<1x128xf32>
    %210 = vector.broadcast %209 : vector<1x128xf32> to vector<8x128xf32>
    %211 = arith.mulf %208, %210 : vector<8x128xf32>
    %c0_85 = arith.constant 0 : index
    %c0_86 = arith.constant 0 : index
    %212 = vector.load %arg14[%c0_85, %c0_86] : memref<1x128xf32, #tpu.memory_space<vmem>>, vector<1x128xf32>
    %213 = vector.broadcast %212 : vector<1x128xf32> to vector<8x128xf32>
    %214 = arith.addf %211, %213 : vector<8x128xf32>
    %215 = arith.negf %214 : vector<8x128xf32>
    %216 = math.exp %215 : vector<8x128xf32>
    %cst_87 = arith.constant 1.000000e+00 : f32
    %217 = vector.broadcast %cst_87 : f32 to vector<8x128xf32>
    %218 = arith.addf %217, %216 : vector<8x128xf32>
    %219 = arith.divf %217, %218 : vector<8x128xf32>
    %220 = arith.mulf %214, %219 : vector<8x128xf32>
    %221 = arith.truncf %220 : vector<8x128xf32> to vector<8x128xbf16>
    %c0_88 = arith.constant 0 : index
    %c0_89 = arith.constant 0 : index
    %222 = vector.load %arg15[%c0_88, %c0_89] : memref<128x128xbf16, #tpu.memory_space<vmem>>, vector<128x128xbf16>
    %cst_90 = arith.constant dense<0.000000e+00> : vector<8x128xf32>
    %223 = tpu.matmul %221, %222, %cst_90 {dimension_numbers = #tpu.dot_dimension_numbers<[1], [0], [0], [1], [0, 0, 1, 1], [], []>} : vector<8x128xbf16>, vector<128x128xbf16>, vector<8x128xf32> -> vector<8x128xf32>
    %c0_91 = arith.constant 0 : index
    %c0_92 = arith.constant 0 : index
    %224 = vector.load %arg16[%c0_91, %c0_92] : memref<1x128xf32, #tpu.memory_space<vmem>>, vector<1x128xf32>
    %225 = vector.broadcast %224 : vector<1x128xf32> to vector<8x128xf32>
    %226 = arith.addf %223, %225 : vector<8x128xf32>
    %227 = arith.addf %126, %226 : vector<8x128xf32>
    %c0_93 = arith.constant 0 : index
    %c0_94 = arith.constant 0 : index
    %228 = vector.load %arg17[%c0_93, %c0_94] : memref<8x128xf32, #tpu.memory_space<vmem>>, vector<8x128xf32>
    tpu.vector_store %arg17[%c0_93, %c0_94], %227 {strides = array<i32>} : memref<8x128xf32, #tpu.memory_space<vmem>>, vector<8x128xf32>,
    return
  }
  func.func @transform_0(%arg0: i32) -> (i32, i32) {
    %c0_i32 = arith.constant 0 : i32
    %c0_i32_0 = arith.constant 0 : i32
    return %arg0, %c0_i32 : i32, i32
  }
  func.func @transform_1(%arg0: i32) -> (i32, i32) {
    %c0_i32 = arith.constant 0 : i32
    %c0_i32_0 = arith.constant 0 : i32
    %c0_i32_1 = arith.constant 0 : i32
    return %c0_i32, %c0_i32_0 : i32, i32
  }
  func.func @transform_2(%arg0: i32) -> (i32, i32) {
    %c0_i32 = arith.constant 0 : i32
    %c0_i32_0 = arith.constant 0 : i32
    %c0_i32_1 = arith.constant 0 : i32
    return %c0_i32, %c0_i32_0 : i32, i32
  }
  func.func @transform_3(%arg0: i32) -> (i32, i32) {
    %c0_i32 = arith.constant 0 : i32
    %c0_i32_0 = arith.constant 0 : i32
    %c0_i32_1 = arith.constant 0 : i32
    return %c0_i32, %c0_i32_0 : i32, i32
  }
  func.func @transform_4(%arg0: i32) -> (i32, i32) {
    %c0_i32 = arith.constant 0 : i32
    %c0_i32_0 = arith.constant 0 : i32
    %c0_i32_1 = arith.constant 0 : i32
    return %c0_i32, %c0_i32_0 : i32, i32
  }
  func.func @transform_5(%arg0: i32) -> (i32, i32) {
    %c0_i32 = arith.constant 0 : i32
    %c0_i32_0 = arith.constant 0 : i32
    %c0_i32_1 = arith.constant 0 : i32
    return %c0_i32, %c0_i32_0 : i32, i32
  }
  func.func @transform_6(%arg0: i32) -> (i32, i32) {
    %c0_i32 = arith.constant 0 : i32
    %c0_i32_0 = arith.constant 0 : i32
    %c0_i32_1 = arith.constant 0 : i32
    return %c0_i32, %c0_i32_0 : i32, i32
  }
  func.func @transform_7(%arg0: i32) -> (i32, i32) {
    %c0_i32 = arith.constant 0 : i32
    %c0_i32_0 = arith.constant 0 : i32
    %c0_i32_1 = arith.constant 0 : i32
    return %c0_i32, %c0_i32_0 : i32, i32
  }
  func.func @transform_8(%arg0: i32) -> (i32, i32) {
    %c0_i32 = arith.constant 0 : i32
    %c0_i32_0 = arith.constant 0 : i32
    %c0_i32_1 = arith.constant 0 : i32
    return %c0_i32, %c0_i32_0 : i32, i32
  }
  func.func @transform_9(%arg0: i32) -> (i32, i32) {
    %c0_i32 = arith.constant 0 : i32
    %c0_i32_0 = arith.constant 0 : i32
    %c0_i32_1 = arith.constant 0 : i32
    return %c0_i32, %c0_i32_0 : i32, i32
  }
  func.func @transform_10(%arg0: i32) -> (i32, i32) {
    %c0_i32 = arith.constant 0 : i32
    %c0_i32_0 = arith.constant 0 : i32
    %c0_i32_1 = arith.constant 0 : i32
    return %c0_i32, %c0_i32_0 : i32, i32
  }
  func.func @transform_11(%arg0: i32) -> (i32, i32) {
    %c0_i32 = arith.constant 0 : i32
    %c0_i32_0 = arith.constant 0 : i32
    %c0_i32_1 = arith.constant 0 : i32
    return %c0_i32, %c0_i32_0 : i32, i32
  }
  func.func @transform_12(%arg0: i32) -> (i32, i32) {
    %c0_i32 = arith.constant 0 : i32
    %c0_i32_0 = arith.constant 0 : i32
    %c0_i32_1 = arith.constant 0 : i32
    return %c0_i32, %c0_i32_0 : i32, i32
  }
  func.func @transform_13(%arg0: i32) -> (i32, i32) {
    %c0_i32 = arith.constant 0 : i32
    %c0_i32_0 = arith.constant 0 : i32
    %c0_i32_1 = arith.constant 0 : i32
    return %c0_i32, %c0_i32_0 : i32, i32
  }
  func.func @transform_14(%arg0: i32) -> (i32, i32) {
    %c0_i32 = arith.constant 0 : i32
    %c0_i32_0 = arith.constant 0 : i32
    %c0_i32_1 = arith.constant 0 : i32
    return %c0_i32, %c0_i32_0 : i32, i32
  }
  func.func @transform_15(%arg0: i32) -> (i32, i32) {
    %c0_i32 = arith.constant 0 : i32
    %c0_i32_0 = arith.constant 0 : i32
    %c0_i32_1 = arith.constant 0 : i32
    return %c0_i32, %c0_i32_0 : i32, i32
  }
  func.func @transform_16(%arg0: i32) -> (i32, i32) {
    %c0_i32 = arith.constant 0 : i32
    %c0_i32_0 = arith.constant 0 : i32
    return %arg0, %c0_i32 : i32, i32
  }
}

module attributes {stable_mosaic.version = 11 : i64} {
  func.func @_ff_kernel(%arg0: i32, %arg1: memref<8x128xf32, #tpu.memory_space<vmem>>, %arg2: memref<1x128xf32, #tpu.memory_space<vmem>>, %arg3: memref<1x128xf32, #tpu.memory_space<vmem>>, %arg4: memref<128x128xbf16, #tpu.memory_space<vmem>>, %arg5: memref<1x128xf32, #tpu.memory_space<vmem>>, %arg6: memref<128x128xbf16, #tpu.memory_space<vmem>>, %arg7: memref<1x128xf32, #tpu.memory_space<vmem>>, %arg8: memref<1x128xf32, #tpu.memory_space<vmem>>, %arg9: memref<1x128xf32, #tpu.memory_space<vmem>>, %arg10: memref<8x128xf32, #tpu.memory_space<vmem>>) attributes {dimension_semantics = [#tpu.dimension_semantics<parallel>], iteration_bounds = array<i64: 2>, scalar_prefetch = 0 : i64, scratch_operands = 0 : i64, tpu.core_type = #tpu.core_type<tc>, window_params = [{transform_indices = @transform_0, window_bounds = array<i64: 8, 128>}, {pipeline_mode = #tpu.pipeline_mode<synchronous>, transform_indices = @transform_1, window_bounds = array<i64: 1, 128>}, {pipeline_mode = #tpu.pipeline_mode<synchronous>, transform_indices = @transform_2, window_bounds = array<i64: 1, 128>}, {pipeline_mode = #tpu.pipeline_mode<synchronous>, transform_indices = @transform_3, window_bounds = array<i64: 128, 128>}, {pipeline_mode = #tpu.pipeline_mode<synchronous>, transform_indices = @transform_4, window_bounds = array<i64: 1, 128>}, {pipeline_mode = #tpu.pipeline_mode<synchronous>, transform_indices = @transform_5, window_bounds = array<i64: 128, 128>}, {pipeline_mode = #tpu.pipeline_mode<synchronous>, transform_indices = @transform_6, window_bounds = array<i64: 1, 128>}, {pipeline_mode = #tpu.pipeline_mode<synchronous>, transform_indices = @transform_7, window_bounds = array<i64: 1, 128>}, {pipeline_mode = #tpu.pipeline_mode<synchronous>, transform_indices = @transform_8, window_bounds = array<i64: 1, 128>}, {transform_indices = @transform_9, window_bounds = array<i64: 8, 128>}]} {
    %c0 = arith.constant 0 : index
    %c0_0 = arith.constant 0 : index
    %0 = vector.load %arg1[%c0, %c0_0] : memref<8x128xf32, #tpu.memory_space<vmem>>, vector<8x128xf32>
    %c0_1 = arith.constant 0 : index
    %c0_2 = arith.constant 0 : index
    %1 = vector.load %arg2[%c0_1, %c0_2] : memref<1x128xf32, #tpu.memory_space<vmem>>, vector<1x128xf32>
    %c0_3 = arith.constant 0 : index
    %c0_4 = arith.constant 0 : index
    %2 = vector.load %arg3[%c0_3, %c0_4] : memref<1x128xf32, #tpu.memory_space<vmem>>, vector<1x128xf32>
    %cst = arith.constant dense<0.000000e+00> : vector<8xf32>
    %3 = vector.multi_reduction <add>, %0, %cst [1] : vector<8x128xf32> to vector<8xf32>
    %4 = vector.shape_cast %3 : vector<8xf32> to vector<8x1xf32>
    %cst_5 = arith.constant 3.125000e-02 : f32
    %5 = vector.broadcast %cst_5 : f32 to vector<8x1xf32>
    %6 = arith.mulf %4, %5 : vector<8x1xf32>
    %7 = vector.broadcast %6 : vector<8x1xf32> to vector<8x128xf32>
    %8 = arith.subf %0, %7 : vector<8x128xf32>
    %9 = arith.mulf %8, %8 : vector<8x128xf32>
    %cst_6 = arith.constant dense<0.000000e+00> : vector<8xf32>
    %10 = vector.multi_reduction <add>, %9, %cst_6 [1] : vector<8x128xf32> to vector<8xf32>
    %11 = vector.shape_cast %10 : vector<8xf32> to vector<8x1xf32>
    %cst_7 = arith.constant 9.600000e+01 : f32
    %12 = vector.broadcast %cst_7 : f32 to vector<8x1xf32>
    %13 = arith.mulf %12, %6 : vector<8x1xf32>
    %14 = arith.mulf %13, %6 : vector<8x1xf32>
    %15 = arith.subf %11, %14 : vector<8x1xf32>
    %cst_8 = arith.constant 3.125000e-02 : f32
    %16 = vector.broadcast %cst_8 : f32 to vector<8x1xf32>
    %17 = arith.mulf %15, %16 : vector<8x1xf32>
    %cst_9 = arith.constant 9.99999974E-6 : f32
    %18 = vector.broadcast %cst_9 : f32 to vector<8x1xf32>
    %19 = arith.addf %17, %18 : vector<8x1xf32>
    %20 = math.rsqrt %19 : vector<8x1xf32>
    %21 = vector.broadcast %20 : vector<8x1xf32> to vector<8x128xf32>
    %22 = arith.mulf %8, %21 : vector<8x128xf32>
    %23 = vector.broadcast %1 : vector<1x128xf32> to vector<8x128xf32>
    %24 = arith.mulf %22, %23 : vector<8x128xf32>
    %25 = vector.broadcast %2 : vector<1x128xf32> to vector<8x128xf32>
    %26 = arith.addf %24, %25 : vector<8x128xf32>
    %27 = arith.truncf %26 : vector<8x128xf32> to vector<8x128xbf16>
    %cst_10 = arith.constant 0.000000e+00 : f32
    %28 = vector.broadcast %cst_10 : f32 to vector<8x128xf32>
    %c0_11 = arith.constant 0 : index
    %c0_12 = arith.constant 0 : index
    %29 = vector.load %arg4[%c0_11, %c0_12] : memref<128x128xbf16, #tpu.memory_space<vmem>>, vector<128x128xbf16>
    %cst_13 = arith.constant dense<0.000000e+00> : vector<8x128xf32>
    %30 = tpu.matmul %27, %29, %cst_13 {dimension_numbers = #tpu.dot_dimension_numbers<[1], [0], [0], [1], [0, 0, 1, 1], [], []>} : vector<8x128xbf16>, vector<128x128xbf16>, vector<8x128xf32> -> vector<8x128xf32>
    %c0_14 = arith.constant 0 : index
    %c0_15 = arith.constant 0 : index
    %31 = vector.load %arg5[%c0_14, %c0_15] : memref<1x128xf32, #tpu.memory_space<vmem>>, vector<1x128xf32>
    %32 = vector.broadcast %31 : vector<1x128xf32> to vector<8x128xf32>
    %33 = arith.addf %30, %32 : vector<8x128xf32>
    %34 = arith.negf %33 : vector<8x128xf32>
    %35 = math.exp %34 : vector<8x128xf32>
    %cst_16 = arith.constant 1.000000e+00 : f32
    %36 = vector.broadcast %cst_16 : f32 to vector<8x128xf32>
    %37 = arith.addf %36, %35 : vector<8x128xf32>
    %38 = arith.divf %36, %37 : vector<8x128xf32>
    %39 = arith.mulf %33, %38 : vector<8x128xf32>
    %40 = arith.truncf %39 : vector<8x128xf32> to vector<8x128xbf16>
    %c0_17 = arith.constant 0 : index
    %c0_18 = arith.constant 0 : index
    %41 = vector.load %arg6[%c0_17, %c0_18] : memref<128x128xbf16, #tpu.memory_space<vmem>>, vector<128x128xbf16>
    %cst_19 = arith.constant dense<0.000000e+00> : vector<8x128xf32>
    %42 = tpu.matmul %40, %41, %cst_19 {dimension_numbers = #tpu.dot_dimension_numbers<[1], [0], [0], [1], [0, 0, 1, 1], [], []>} : vector<8x128xbf16>, vector<128x128xbf16>, vector<8x128xf32> -> vector<8x128xf32>
    %43 = arith.addf %28, %42 : vector<8x128xf32>
    %c0_20 = arith.constant 0 : index
    %c0_21 = arith.constant 0 : index
    %44 = vector.load %arg7[%c0_20, %c0_21] : memref<1x128xf32, #tpu.memory_space<vmem>>, vector<1x128xf32>
    %45 = vector.broadcast %44 : vector<1x128xf32> to vector<8x128xf32>
    %46 = arith.addf %43, %45 : vector<8x128xf32>
    %cst_22 = arith.constant 5.000000e-01 : f32
    %47 = vector.broadcast %cst_22 : f32 to vector<8x128xf32>
    %48 = arith.mulf %47, %46 : vector<8x128xf32>
    %49 = arith.addf %0, %48 : vector<8x128xf32>
    %c0_23 = arith.constant 0 : index
    %c0_24 = arith.constant 0 : index
    %50 = vector.load %arg8[%c0_23, %c0_24] : memref<1x128xf32, #tpu.memory_space<vmem>>, vector<1x128xf32>
    %c0_25 = arith.constant 0 : index
    %c0_26 = arith.constant 0 : index
    %51 = vector.load %arg9[%c0_25, %c0_26] : memref<1x128xf32, #tpu.memory_space<vmem>>, vector<1x128xf32>
    %cst_27 = arith.constant dense<0.000000e+00> : vector<8xf32>
    %52 = vector.multi_reduction <add>, %49, %cst_27 [1] : vector<8x128xf32> to vector<8xf32>
    %53 = vector.shape_cast %52 : vector<8xf32> to vector<8x1xf32>
    %cst_28 = arith.constant 3.125000e-02 : f32
    %54 = vector.broadcast %cst_28 : f32 to vector<8x1xf32>
    %55 = arith.mulf %53, %54 : vector<8x1xf32>
    %56 = vector.broadcast %55 : vector<8x1xf32> to vector<8x128xf32>
    %57 = arith.subf %49, %56 : vector<8x128xf32>
    %58 = arith.mulf %57, %57 : vector<8x128xf32>
    %cst_29 = arith.constant dense<0.000000e+00> : vector<8xf32>
    %59 = vector.multi_reduction <add>, %58, %cst_29 [1] : vector<8x128xf32> to vector<8xf32>
    %60 = vector.shape_cast %59 : vector<8xf32> to vector<8x1xf32>
    %cst_30 = arith.constant 9.600000e+01 : f32
    %61 = vector.broadcast %cst_30 : f32 to vector<8x1xf32>
    %62 = arith.mulf %61, %55 : vector<8x1xf32>
    %63 = arith.mulf %62, %55 : vector<8x1xf32>
    %64 = arith.subf %60, %63 : vector<8x1xf32>
    %cst_31 = arith.constant 3.125000e-02 : f32
    %65 = vector.broadcast %cst_31 : f32 to vector<8x1xf32>
    %66 = arith.mulf %64, %65 : vector<8x1xf32>
    %cst_32 = arith.constant 9.99999974E-6 : f32
    %67 = vector.broadcast %cst_32 : f32 to vector<8x1xf32>
    %68 = arith.addf %66, %67 : vector<8x1xf32>
    %69 = math.rsqrt %68 : vector<8x1xf32>
    %70 = vector.broadcast %69 : vector<8x1xf32> to vector<8x128xf32>
    %71 = arith.mulf %57, %70 : vector<8x128xf32>
    %72 = vector.broadcast %50 : vector<1x128xf32> to vector<8x128xf32>
    %73 = arith.mulf %71, %72 : vector<8x128xf32>
    %74 = vector.broadcast %51 : vector<1x128xf32> to vector<8x128xf32>
    %75 = arith.addf %73, %74 : vector<8x128xf32>
    %c0_33 = arith.constant 0 : index
    %c0_34 = arith.constant 0 : index
    %76 = vector.load %arg10[%c0_33, %c0_34] : memref<8x128xf32, #tpu.memory_space<vmem>>, vector<8x128xf32>
    tpu.vector_store %arg10[%c0_33, %c0_34], %75 {strides = array<i32>} : memref<8x128xf32, #tpu.memory_space<vmem>>, vector<8x128xf32>,
    return
  }
  func.func @transform_0(%arg0: i32) -> (i32, i32) {
    %c0_i32 = arith.constant 0 : i32
    %c0_i32_0 = arith.constant 0 : i32
    return %arg0, %c0_i32 : i32, i32
  }
  func.func @transform_1(%arg0: i32) -> (i32, i32) {
    %c0_i32 = arith.constant 0 : i32
    %c0_i32_0 = arith.constant 0 : i32
    %c0_i32_1 = arith.constant 0 : i32
    return %c0_i32, %c0_i32_0 : i32, i32
  }
  func.func @transform_2(%arg0: i32) -> (i32, i32) {
    %c0_i32 = arith.constant 0 : i32
    %c0_i32_0 = arith.constant 0 : i32
    %c0_i32_1 = arith.constant 0 : i32
    return %c0_i32, %c0_i32_0 : i32, i32
  }
  func.func @transform_3(%arg0: i32) -> (i32, i32) {
    %c0_i32 = arith.constant 0 : i32
    %c0_i32_0 = arith.constant 0 : i32
    %c0_i32_1 = arith.constant 0 : i32
    return %c0_i32, %c0_i32_0 : i32, i32
  }
  func.func @transform_4(%arg0: i32) -> (i32, i32) {
    %c0_i32 = arith.constant 0 : i32
    %c0_i32_0 = arith.constant 0 : i32
    %c0_i32_1 = arith.constant 0 : i32
    return %c0_i32, %c0_i32_0 : i32, i32
  }
  func.func @transform_5(%arg0: i32) -> (i32, i32) {
    %c0_i32 = arith.constant 0 : i32
    %c0_i32_0 = arith.constant 0 : i32
    %c0_i32_1 = arith.constant 0 : i32
    return %c0_i32, %c0_i32_0 : i32, i32
  }
  func.func @transform_6(%arg0: i32) -> (i32, i32) {
    %c0_i32 = arith.constant 0 : i32
    %c0_i32_0 = arith.constant 0 : i32
    %c0_i32_1 = arith.constant 0 : i32
    return %c0_i32, %c0_i32_0 : i32, i32
  }
  func.func @transform_7(%arg0: i32) -> (i32, i32) {
    %c0_i32 = arith.constant 0 : i32
    %c0_i32_0 = arith.constant 0 : i32
    %c0_i32_1 = arith.constant 0 : i32
    return %c0_i32, %c0_i32_0 : i32, i32
  }
  func.func @transform_8(%arg0: i32) -> (i32, i32) {
    %c0_i32 = arith.constant 0 : i32
    %c0_i32_0 = arith.constant 0 : i32
    %c0_i32_1 = arith.constant 0 : i32
    return %c0_i32, %c0_i32_0 : i32, i32
  }
  func.func @transform_9(%arg0: i32) -> (i32, i32) {
    %c0_i32 = arith.constant 0 : i32
    %c0_i32_0 = arith.constant 0 : i32
    return %arg0, %c0_i32 : i32, i32
  }
}

module attributes {stable_mosaic.version = 11 : i64} {
  func.func @_ff_kernel(%arg0: i32, %arg1: memref<8x128xf32, #tpu.memory_space<vmem>>, %arg2: memref<1x128xf32, #tpu.memory_space<vmem>>, %arg3: memref<1x128xf32, #tpu.memory_space<vmem>>, %arg4: memref<128x128xbf16, #tpu.memory_space<vmem>>, %arg5: memref<1x128xf32, #tpu.memory_space<vmem>>, %arg6: memref<128x128xbf16, #tpu.memory_space<vmem>>, %arg7: memref<1x128xf32, #tpu.memory_space<vmem>>, %arg8: memref<8x128xf32, #tpu.memory_space<vmem>>) attributes {dimension_semantics = [#tpu.dimension_semantics<parallel>], iteration_bounds = array<i64: 2>, scalar_prefetch = 0 : i64, scratch_operands = 0 : i64, tpu.core_type = #tpu.core_type<tc>, window_params = [{transform_indices = @transform_0, window_bounds = array<i64: 8, 128>}, {pipeline_mode = #tpu.pipeline_mode<synchronous>, transform_indices = @transform_1, window_bounds = array<i64: 1, 128>}, {pipeline_mode = #tpu.pipeline_mode<synchronous>, transform_indices = @transform_2, window_bounds = array<i64: 1, 128>}, {pipeline_mode = #tpu.pipeline_mode<synchronous>, transform_indices = @transform_3, window_bounds = array<i64: 128, 128>}, {pipeline_mode = #tpu.pipeline_mode<synchronous>, transform_indices = @transform_4, window_bounds = array<i64: 1, 128>}, {pipeline_mode = #tpu.pipeline_mode<synchronous>, transform_indices = @transform_5, window_bounds = array<i64: 128, 128>}, {pipeline_mode = #tpu.pipeline_mode<synchronous>, transform_indices = @transform_6, window_bounds = array<i64: 1, 128>}, {transform_indices = @transform_7, window_bounds = array<i64: 8, 128>}]} {
    %c0 = arith.constant 0 : index
    %c0_0 = arith.constant 0 : index
    %0 = vector.load %arg1[%c0, %c0_0] : memref<8x128xf32, #tpu.memory_space<vmem>>, vector<8x128xf32>
    %c0_1 = arith.constant 0 : index
    %c0_2 = arith.constant 0 : index
    %1 = vector.load %arg2[%c0_1, %c0_2] : memref<1x128xf32, #tpu.memory_space<vmem>>, vector<1x128xf32>
    %c0_3 = arith.constant 0 : index
    %c0_4 = arith.constant 0 : index
    %2 = vector.load %arg3[%c0_3, %c0_4] : memref<1x128xf32, #tpu.memory_space<vmem>>, vector<1x128xf32>
    %cst = arith.constant dense<0.000000e+00> : vector<8xf32>
    %3 = vector.multi_reduction <add>, %0, %cst [1] : vector<8x128xf32> to vector<8xf32>
    %4 = vector.shape_cast %3 : vector<8xf32> to vector<8x1xf32>
    %cst_5 = arith.constant 3.125000e-02 : f32
    %5 = vector.broadcast %cst_5 : f32 to vector<8x1xf32>
    %6 = arith.mulf %4, %5 : vector<8x1xf32>
    %7 = vector.broadcast %6 : vector<8x1xf32> to vector<8x128xf32>
    %8 = arith.subf %0, %7 : vector<8x128xf32>
    %9 = arith.mulf %8, %8 : vector<8x128xf32>
    %cst_6 = arith.constant dense<0.000000e+00> : vector<8xf32>
    %10 = vector.multi_reduction <add>, %9, %cst_6 [1] : vector<8x128xf32> to vector<8xf32>
    %11 = vector.shape_cast %10 : vector<8xf32> to vector<8x1xf32>
    %cst_7 = arith.constant 9.600000e+01 : f32
    %12 = vector.broadcast %cst_7 : f32 to vector<8x1xf32>
    %13 = arith.mulf %12, %6 : vector<8x1xf32>
    %14 = arith.mulf %13, %6 : vector<8x1xf32>
    %15 = arith.subf %11, %14 : vector<8x1xf32>
    %cst_8 = arith.constant 3.125000e-02 : f32
    %16 = vector.broadcast %cst_8 : f32 to vector<8x1xf32>
    %17 = arith.mulf %15, %16 : vector<8x1xf32>
    %cst_9 = arith.constant 9.99999974E-6 : f32
    %18 = vector.broadcast %cst_9 : f32 to vector<8x1xf32>
    %19 = arith.addf %17, %18 : vector<8x1xf32>
    %20 = math.rsqrt %19 : vector<8x1xf32>
    %21 = vector.broadcast %20 : vector<8x1xf32> to vector<8x128xf32>
    %22 = arith.mulf %8, %21 : vector<8x128xf32>
    %23 = vector.broadcast %1 : vector<1x128xf32> to vector<8x128xf32>
    %24 = arith.mulf %22, %23 : vector<8x128xf32>
    %25 = vector.broadcast %2 : vector<1x128xf32> to vector<8x128xf32>
    %26 = arith.addf %24, %25 : vector<8x128xf32>
    %27 = arith.truncf %26 : vector<8x128xf32> to vector<8x128xbf16>
    %cst_10 = arith.constant 0.000000e+00 : f32
    %28 = vector.broadcast %cst_10 : f32 to vector<8x128xf32>
    %c0_11 = arith.constant 0 : index
    %c0_12 = arith.constant 0 : index
    %29 = vector.load %arg4[%c0_11, %c0_12] : memref<128x128xbf16, #tpu.memory_space<vmem>>, vector<128x128xbf16>
    %cst_13 = arith.constant dense<0.000000e+00> : vector<8x128xf32>
    %30 = tpu.matmul %27, %29, %cst_13 {dimension_numbers = #tpu.dot_dimension_numbers<[1], [0], [0], [1], [0, 0, 1, 1], [], []>} : vector<8x128xbf16>, vector<128x128xbf16>, vector<8x128xf32> -> vector<8x128xf32>
    %c0_14 = arith.constant 0 : index
    %c0_15 = arith.constant 0 : index
    %31 = vector.load %arg5[%c0_14, %c0_15] : memref<1x128xf32, #tpu.memory_space<vmem>>, vector<1x128xf32>
    %32 = vector.broadcast %31 : vector<1x128xf32> to vector<8x128xf32>
    %33 = arith.addf %30, %32 : vector<8x128xf32>
    %34 = arith.negf %33 : vector<8x128xf32>
    %35 = math.exp %34 : vector<8x128xf32>
    %cst_16 = arith.constant 1.000000e+00 : f32
    %36 = vector.broadcast %cst_16 : f32 to vector<8x128xf32>
    %37 = arith.addf %36, %35 : vector<8x128xf32>
    %38 = arith.divf %36, %37 : vector<8x128xf32>
    %39 = arith.mulf %33, %38 : vector<8x128xf32>
    %40 = arith.truncf %39 : vector<8x128xf32> to vector<8x128xbf16>
    %c0_17 = arith.constant 0 : index
    %c0_18 = arith.constant 0 : index
    %41 = vector.load %arg6[%c0_17, %c0_18] : memref<128x128xbf16, #tpu.memory_space<vmem>>, vector<128x128xbf16>
    %cst_19 = arith.constant dense<0.000000e+00> : vector<8x128xf32>
    %42 = tpu.matmul %40, %41, %cst_19 {dimension_numbers = #tpu.dot_dimension_numbers<[1], [0], [0], [1], [0, 0, 1, 1], [], []>} : vector<8x128xbf16>, vector<128x128xbf16>, vector<8x128xf32> -> vector<8x128xf32>
    %43 = arith.addf %28, %42 : vector<8x128xf32>
    %c0_20 = arith.constant 0 : index
    %c0_21 = arith.constant 0 : index
    %44 = vector.load %arg7[%c0_20, %c0_21] : memref<1x128xf32, #tpu.memory_space<vmem>>, vector<1x128xf32>
    %45 = vector.broadcast %44 : vector<1x128xf32> to vector<8x128xf32>
    %46 = arith.addf %43, %45 : vector<8x128xf32>
    %cst_22 = arith.constant 5.000000e-01 : f32
    %47 = vector.broadcast %cst_22 : f32 to vector<8x128xf32>
    %48 = arith.mulf %47, %46 : vector<8x128xf32>
    %49 = arith.addf %0, %48 : vector<8x128xf32>
    %c0_23 = arith.constant 0 : index
    %c0_24 = arith.constant 0 : index
    %50 = vector.load %arg8[%c0_23, %c0_24] : memref<8x128xf32, #tpu.memory_space<vmem>>, vector<8x128xf32>
    tpu.vector_store %arg8[%c0_23, %c0_24], %49 {strides = array<i32>} : memref<8x128xf32, #tpu.memory_space<vmem>>, vector<8x128xf32>,
    return
  }
  func.func @transform_0(%arg0: i32) -> (i32, i32) {
    %c0_i32 = arith.constant 0 : i32
    %c0_i32_0 = arith.constant 0 : i32
    return %arg0, %c0_i32 : i32, i32
  }
  func.func @transform_1(%arg0: i32) -> (i32, i32) {
    %c0_i32 = arith.constant 0 : i32
    %c0_i32_0 = arith.constant 0 : i32
    %c0_i32_1 = arith.constant 0 : i32
    return %c0_i32, %c0_i32_0 : i32, i32
  }
  func.func @transform_2(%arg0: i32) -> (i32, i32) {
    %c0_i32 = arith.constant 0 : i32
    %c0_i32_0 = arith.constant 0 : i32
    %c0_i32_1 = arith.constant 0 : i32
    return %c0_i32, %c0_i32_0 : i32, i32
  }
  func.func @transform_3(%arg0: i32) -> (i32, i32) {
    %c0_i32 = arith.constant 0 : i32
    %c0_i32_0 = arith.constant 0 : i32
    %c0_i32_1 = arith.constant 0 : i32
    return %c0_i32, %c0_i32_0 : i32, i32
  }
  func.func @transform_4(%arg0: i32) -> (i32, i32) {
    %c0_i32 = arith.constant 0 : i32
    %c0_i32_0 = arith.constant 0 : i32
    %c0_i32_1 = arith.constant 0 : i32
    return %c0_i32, %c0_i32_0 : i32, i32
  }
  func.func @transform_5(%arg0: i32) -> (i32, i32) {
    %c0_i32 = arith.constant 0 : i32
    %c0_i32_0 = arith.constant 0 : i32
    %c0_i32_1 = arith.constant 0 : i32
    return %c0_i32, %c0_i32_0 : i32, i32
  }
  func.func @transform_6(%arg0: i32) -> (i32, i32) {
    %c0_i32 = arith.constant 0 : i32
    %c0_i32_0 = arith.constant 0 : i32
    %c0_i32_1 = arith.constant 0 : i32
    return %c0_i32, %c0_i32_0 : i32, i32
  }
  func.func @transform_7(%arg0: i32) -> (i32, i32) {
    %c0_i32 = arith.constant 0 : i32
    %c0_i32_0 = arith.constant 0 : i32
    return %arg0, %c0_i32 : i32, i32
  }
}

module attributes {stable_mosaic.version = 11 : i64} {
  func.func @_ff_kernel(%arg0: i32, %arg1: memref<8x128xf32, #tpu.memory_space<vmem>>, %arg2: memref<1x128xf32, #tpu.memory_space<vmem>>, %arg3: memref<1x128xf32, #tpu.memory_space<vmem>>, %arg4: memref<128x128xbf16, #tpu.memory_space<vmem>>, %arg5: memref<1x128xf32, #tpu.memory_space<vmem>>, %arg6: memref<128x128xbf16, #tpu.memory_space<vmem>>, %arg7: memref<1x128xf32, #tpu.memory_space<vmem>>, %arg8: memref<1x128xf32, #tpu.memory_space<vmem>>, %arg9: memref<1x128xf32, #tpu.memory_space<vmem>>, %arg10: memref<8x128xf32, #tpu.memory_space<vmem>>) attributes {dimension_semantics = [#tpu.dimension_semantics<parallel>], iteration_bounds = array<i64: 2>, scalar_prefetch = 0 : i64, scratch_operands = 0 : i64, tpu.core_type = #tpu.core_type<tc>, window_params = [{transform_indices = @transform_0, window_bounds = array<i64: 8, 128>}, {pipeline_mode = #tpu.pipeline_mode<synchronous>, transform_indices = @transform_1, window_bounds = array<i64: 1, 128>}, {pipeline_mode = #tpu.pipeline_mode<synchronous>, transform_indices = @transform_2, window_bounds = array<i64: 1, 128>}, {pipeline_mode = #tpu.pipeline_mode<synchronous>, transform_indices = @transform_3, window_bounds = array<i64: 128, 128>}, {pipeline_mode = #tpu.pipeline_mode<synchronous>, transform_indices = @transform_4, window_bounds = array<i64: 1, 128>}, {pipeline_mode = #tpu.pipeline_mode<synchronous>, transform_indices = @transform_5, window_bounds = array<i64: 128, 128>}, {pipeline_mode = #tpu.pipeline_mode<synchronous>, transform_indices = @transform_6, window_bounds = array<i64: 1, 128>}, {pipeline_mode = #tpu.pipeline_mode<synchronous>, transform_indices = @transform_7, window_bounds = array<i64: 1, 128>}, {pipeline_mode = #tpu.pipeline_mode<synchronous>, transform_indices = @transform_8, window_bounds = array<i64: 1, 128>}, {transform_indices = @transform_9, window_bounds = array<i64: 8, 128>}]} {
    %c0 = arith.constant 0 : index
    %c0_0 = arith.constant 0 : index
    %0 = vector.load %arg1[%c0, %c0_0] : memref<8x128xf32, #tpu.memory_space<vmem>>, vector<8x128xf32>
    %c0_1 = arith.constant 0 : index
    %c0_2 = arith.constant 0 : index
    %1 = vector.load %arg2[%c0_1, %c0_2] : memref<1x128xf32, #tpu.memory_space<vmem>>, vector<1x128xf32>
    %c0_3 = arith.constant 0 : index
    %c0_4 = arith.constant 0 : index
    %2 = vector.load %arg3[%c0_3, %c0_4] : memref<1x128xf32, #tpu.memory_space<vmem>>, vector<1x128xf32>
    %cst = arith.constant dense<0.000000e+00> : vector<8xf32>
    %3 = vector.multi_reduction <add>, %0, %cst [1] : vector<8x128xf32> to vector<8xf32>
    %4 = vector.shape_cast %3 : vector<8xf32> to vector<8x1xf32>
    %cst_5 = arith.constant 3.125000e-02 : f32
    %5 = vector.broadcast %cst_5 : f32 to vector<8x1xf32>
    %6 = arith.mulf %4, %5 : vector<8x1xf32>
    %7 = vector.broadcast %6 : vector<8x1xf32> to vector<8x128xf32>
    %8 = arith.subf %0, %7 : vector<8x128xf32>
    %9 = arith.mulf %8, %8 : vector<8x128xf32>
    %cst_6 = arith.constant dense<0.000000e+00> : vector<8xf32>
    %10 = vector.multi_reduction <add>, %9, %cst_6 [1] : vector<8x128xf32> to vector<8xf32>
    %11 = vector.shape_cast %10 : vector<8xf32> to vector<8x1xf32>
    %cst_7 = arith.constant 9.600000e+01 : f32
    %12 = vector.broadcast %cst_7 : f32 to vector<8x1xf32>
    %13 = arith.mulf %12, %6 : vector<8x1xf32>
    %14 = arith.mulf %13, %6 : vector<8x1xf32>
    %15 = arith.subf %11, %14 : vector<8x1xf32>
    %cst_8 = arith.constant 3.125000e-02 : f32
    %16 = vector.broadcast %cst_8 : f32 to vector<8x1xf32>
    %17 = arith.mulf %15, %16 : vector<8x1xf32>
    %cst_9 = arith.constant 9.99999974E-6 : f32
    %18 = vector.broadcast %cst_9 : f32 to vector<8x1xf32>
    %19 = arith.addf %17, %18 : vector<8x1xf32>
    %20 = math.rsqrt %19 : vector<8x1xf32>
    %21 = vector.broadcast %20 : vector<8x1xf32> to vector<8x128xf32>
    %22 = arith.mulf %8, %21 : vector<8x128xf32>
    %23 = vector.broadcast %1 : vector<1x128xf32> to vector<8x128xf32>
    %24 = arith.mulf %22, %23 : vector<8x128xf32>
    %25 = vector.broadcast %2 : vector<1x128xf32> to vector<8x128xf32>
    %26 = arith.addf %24, %25 : vector<8x128xf32>
    %27 = arith.truncf %26 : vector<8x128xf32> to vector<8x128xbf16>
    %cst_10 = arith.constant 0.000000e+00 : f32
    %28 = vector.broadcast %cst_10 : f32 to vector<8x128xf32>
    %c0_11 = arith.constant 0 : index
    %c0_12 = arith.constant 0 : index
    %29 = vector.load %arg4[%c0_11, %c0_12] : memref<128x128xbf16, #tpu.memory_space<vmem>>, vector<128x128xbf16>
    %cst_13 = arith.constant dense<0.000000e+00> : vector<8x128xf32>
    %30 = tpu.matmul %27, %29, %cst_13 {dimension_numbers = #tpu.dot_dimension_numbers<[1], [0], [0], [1], [0, 0, 1, 1], [], []>} : vector<8x128xbf16>, vector<128x128xbf16>, vector<8x128xf32> -> vector<8x128xf32>
    %c0_14 = arith.constant 0 : index
    %c0_15 = arith.constant 0 : index
    %31 = vector.load %arg5[%c0_14, %c0_15] : memref<1x128xf32, #tpu.memory_space<vmem>>, vector<1x128xf32>
    %32 = vector.broadcast %31 : vector<1x128xf32> to vector<8x128xf32>
    %33 = arith.addf %30, %32 : vector<8x128xf32>
    %34 = arith.negf %33 : vector<8x128xf32>
    %35 = math.exp %34 : vector<8x128xf32>
    %cst_16 = arith.constant 1.000000e+00 : f32
    %36 = vector.broadcast %cst_16 : f32 to vector<8x128xf32>
    %37 = arith.addf %36, %35 : vector<8x128xf32>
    %38 = arith.divf %36, %37 : vector<8x128xf32>
    %39 = arith.mulf %33, %38 : vector<8x128xf32>
    %40 = arith.truncf %39 : vector<8x128xf32> to vector<8x128xbf16>
    %c0_17 = arith.constant 0 : index
    %c0_18 = arith.constant 0 : index
    %41 = vector.load %arg6[%c0_17, %c0_18] : memref<128x128xbf16, #tpu.memory_space<vmem>>, vector<128x128xbf16>
    %cst_19 = arith.constant dense<0.000000e+00> : vector<8x128xf32>
    %42 = tpu.matmul %40, %41, %cst_19 {dimension_numbers = #tpu.dot_dimension_numbers<[1], [0], [0], [1], [0, 0, 1, 1], [], []>} : vector<8x128xbf16>, vector<128x128xbf16>, vector<8x128xf32> -> vector<8x128xf32>
    %43 = arith.addf %28, %42 : vector<8x128xf32>
    %c0_20 = arith.constant 0 : index
    %c0_21 = arith.constant 0 : index
    %44 = vector.load %arg7[%c0_20, %c0_21] : memref<1x128xf32, #tpu.memory_space<vmem>>, vector<1x128xf32>
    %45 = vector.broadcast %44 : vector<1x128xf32> to vector<8x128xf32>
    %46 = arith.addf %43, %45 : vector<8x128xf32>
    %cst_22 = arith.constant 5.000000e-01 : f32
    %47 = vector.broadcast %cst_22 : f32 to vector<8x128xf32>
    %48 = arith.mulf %47, %46 : vector<8x128xf32>
    %49 = arith.addf %0, %48 : vector<8x128xf32>
    %c0_23 = arith.constant 0 : index
    %c0_24 = arith.constant 0 : index
    %50 = vector.load %arg8[%c0_23, %c0_24] : memref<1x128xf32, #tpu.memory_space<vmem>>, vector<1x128xf32>
    %c0_25 = arith.constant 0 : index
    %c0_26 = arith.constant 0 : index
    %51 = vector.load %arg9[%c0_25, %c0_26] : memref<1x128xf32, #tpu.memory_space<vmem>>, vector<1x128xf32>
    %cst_27 = arith.constant dense<0.000000e+00> : vector<8xf32>
    %52 = vector.multi_reduction <add>, %49, %cst_27 [1] : vector<8x128xf32> to vector<8xf32>
    %53 = vector.shape_cast %52 : vector<8xf32> to vector<8x1xf32>
    %cst_28 = arith.constant 3.125000e-02 : f32
    %54 = vector.broadcast %cst_28 : f32 to vector<8x1xf32>
    %55 = arith.mulf %53, %54 : vector<8x1xf32>
    %56 = vector.broadcast %55 : vector<8x1xf32> to vector<8x128xf32>
    %57 = arith.subf %49, %56 : vector<8x128xf32>
    %58 = arith.mulf %57, %57 : vector<8x128xf32>
    %cst_29 = arith.constant dense<0.000000e+00> : vector<8xf32>
    %59 = vector.multi_reduction <add>, %58, %cst_29 [1] : vector<8x128xf32> to vector<8xf32>
    %60 = vector.shape_cast %59 : vector<8xf32> to vector<8x1xf32>
    %cst_30 = arith.constant 9.600000e+01 : f32
    %61 = vector.broadcast %cst_30 : f32 to vector<8x1xf32>
    %62 = arith.mulf %61, %55 : vector<8x1xf32>
    %63 = arith.mulf %62, %55 : vector<8x1xf32>
    %64 = arith.subf %60, %63 : vector<8x1xf32>
    %cst_31 = arith.constant 3.125000e-02 : f32
    %65 = vector.broadcast %cst_31 : f32 to vector<8x1xf32>
    %66 = arith.mulf %64, %65 : vector<8x1xf32>
    %cst_32 = arith.constant 9.99999974E-6 : f32
    %67 = vector.broadcast %cst_32 : f32 to vector<8x1xf32>
    %68 = arith.addf %66, %67 : vector<8x1xf32>
    %69 = math.rsqrt %68 : vector<8x1xf32>
    %70 = vector.broadcast %69 : vector<8x1xf32> to vector<8x128xf32>
    %71 = arith.mulf %57, %70 : vector<8x128xf32>
    %72 = vector.broadcast %50 : vector<1x128xf32> to vector<8x128xf32>
    %73 = arith.mulf %71, %72 : vector<8x128xf32>
    %74 = vector.broadcast %51 : vector<1x128xf32> to vector<8x128xf32>
    %75 = arith.addf %73, %74 : vector<8x128xf32>
    %c0_33 = arith.constant 0 : index
    %c0_34 = arith.constant 0 : index
    %76 = vector.load %arg10[%c0_33, %c0_34] : memref<8x128xf32, #tpu.memory_space<vmem>>, vector<8x128xf32>
    tpu.vector_store %arg10[%c0_33, %c0_34], %75 {strides = array<i32>} : memref<8x128xf32, #tpu.memory_space<vmem>>, vector<8x128xf32>,
    return
  }
  func.func @transform_0(%arg0: i32) -> (i32, i32) {
    %c0_i32 = arith.constant 0 : i32
    %c0_i32_0 = arith.constant 0 : i32
    return %arg0, %c0_i32 : i32, i32
  }
  func.func @transform_1(%arg0: i32) -> (i32, i32) {
    %c0_i32 = arith.constant 0 : i32
    %c0_i32_0 = arith.constant 0 : i32
    %c0_i32_1 = arith.constant 0 : i32
    return %c0_i32, %c0_i32_0 : i32, i32
  }
  func.func @transform_2(%arg0: i32) -> (i32, i32) {
    %c0_i32 = arith.constant 0 : i32
    %c0_i32_0 = arith.constant 0 : i32
    %c0_i32_1 = arith.constant 0 : i32
    return %c0_i32, %c0_i32_0 : i32, i32
  }
  func.func @transform_3(%arg0: i32) -> (i32, i32) {
    %c0_i32 = arith.constant 0 : i32
    %c0_i32_0 = arith.constant 0 : i32
    %c0_i32_1 = arith.constant 0 : i32
    return %c0_i32, %c0_i32_0 : i32, i32
  }
  func.func @transform_4(%arg0: i32) -> (i32, i32) {
    %c0_i32 = arith.constant 0 : i32
    %c0_i32_0 = arith.constant 0 : i32
    %c0_i32_1 = arith.constant 0 : i32
    return %c0_i32, %c0_i32_0 : i32, i32
  }
  func.func @transform_5(%arg0: i32) -> (i32, i32) {
    %c0_i32 = arith.constant 0 : i32
    %c0_i32_0 = arith.constant 0 : i32
    %c0_i32_1 = arith.constant 0 : i32
    return %c0_i32, %c0_i32_0 : i32, i32
  }
  func.func @transform_6(%arg0: i32) -> (i32, i32) {
    %c0_i32 = arith.constant 0 : i32
    %c0_i32_0 = arith.constant 0 : i32
    %c0_i32_1 = arith.constant 0 : i32
    return %c0_i32, %c0_i32_0 : i32, i32
  }
  func.func @transform_7(%arg0: i32) -> (i32, i32) {
    %c0_i32 = arith.constant 0 : i32
    %c0_i32_0 = arith.constant 0 : i32
    %c0_i32_1 = arith.constant 0 : i32
    return %c0_i32, %c0_i32_0 : i32, i32
  }
  func.func @transform_8(%arg0: i32) -> (i32, i32) {
    %c0_i32 = arith.constant 0 : i32
    %c0_i32_0 = arith.constant 0 : i32
    %c0_i32_1 = arith.constant 0 : i32
    return %c0_i32, %c0_i32_0 : i32, i32
  }
  func.func @transform_9(%arg0: i32) -> (i32, i32) {
    %c0_i32 = arith.constant 0 : i32
    %c0_i32_0 = arith.constant 0 : i32
    return %arg0, %c0_i32 : i32, i32
  }
}

module attributes {stable_mosaic.version = 11 : i64} {
  func.func @_mhsa_conv_kernel(%arg0: i32, %arg1: memref<8x128xf32, #tpu.memory_space<vmem>>, %arg2: memref<1x128xf32, #tpu.memory_space<vmem>>, %arg3: memref<1x128xf32, #tpu.memory_space<vmem>>, %arg4: memref<128x384xbf16, #tpu.memory_space<vmem>>, %arg5: memref<1x384xf32, #tpu.memory_space<vmem>>, %arg6: memref<128x128xbf16, #tpu.memory_space<vmem>>, %arg7: memref<1x128xf32, #tpu.memory_space<vmem>>, %arg8: memref<1x128xf32, #tpu.memory_space<vmem>>, %arg9: memref<1x128xf32, #tpu.memory_space<vmem>>, %arg10: memref<128x256xbf16, #tpu.memory_space<vmem>>, %arg11: memref<1x256xf32, #tpu.memory_space<vmem>>, %arg12: memref<7x128xf32, #tpu.memory_space<vmem>>, %arg13: memref<1x128xf32, #tpu.memory_space<vmem>>, %arg14: memref<1x128xf32, #tpu.memory_space<vmem>>, %arg15: memref<128x128xbf16, #tpu.memory_space<vmem>>, %arg16: memref<1x128xf32, #tpu.memory_space<vmem>>, %arg17: memref<8x128xf32, #tpu.memory_space<vmem>>, %arg18: memref<8x128xf32, #tpu.memory_space<vmem>>, %arg19: memref<14x128xf32, #tpu.memory_space<vmem>>) attributes {dimension_semantics = [#tpu.dimension_semantics<parallel>], iteration_bounds = array<i64: 2>, scalar_prefetch = 0 : i64, scratch_operands = 2 : i64, tpu.core_type = #tpu.core_type<tc>, window_params = [{transform_indices = @transform_0, window_bounds = array<i64: 8, 128>}, {pipeline_mode = #tpu.pipeline_mode<synchronous>, transform_indices = @transform_1, window_bounds = array<i64: 1, 128>}, {pipeline_mode = #tpu.pipeline_mode<synchronous>, transform_indices = @transform_2, window_bounds = array<i64: 1, 128>}, {pipeline_mode = #tpu.pipeline_mode<synchronous>, transform_indices = @transform_3, window_bounds = array<i64: 128, 384>}, {pipeline_mode = #tpu.pipeline_mode<synchronous>, transform_indices = @transform_4, window_bounds = array<i64: 1, 384>}, {pipeline_mode = #tpu.pipeline_mode<synchronous>, transform_indices = @transform_5, window_bounds = array<i64: 128, 128>}, {pipeline_mode = #tpu.pipeline_mode<synchronous>, transform_indices = @transform_6, window_bounds = array<i64: 1, 128>}, {pipeline_mode = #tpu.pipeline_mode<synchronous>, transform_indices = @transform_7, window_bounds = array<i64: 1, 128>}, {pipeline_mode = #tpu.pipeline_mode<synchronous>, transform_indices = @transform_8, window_bounds = array<i64: 1, 128>}, {pipeline_mode = #tpu.pipeline_mode<synchronous>, transform_indices = @transform_9, window_bounds = array<i64: 128, 256>}, {pipeline_mode = #tpu.pipeline_mode<synchronous>, transform_indices = @transform_10, window_bounds = array<i64: 1, 256>}, {pipeline_mode = #tpu.pipeline_mode<synchronous>, transform_indices = @transform_11, window_bounds = array<i64: 7, 128>}, {pipeline_mode = #tpu.pipeline_mode<synchronous>, transform_indices = @transform_12, window_bounds = array<i64: 1, 128>}, {pipeline_mode = #tpu.pipeline_mode<synchronous>, transform_indices = @transform_13, window_bounds = array<i64: 1, 128>}, {pipeline_mode = #tpu.pipeline_mode<synchronous>, transform_indices = @transform_14, window_bounds = array<i64: 128, 128>}, {pipeline_mode = #tpu.pipeline_mode<synchronous>, transform_indices = @transform_15, window_bounds = array<i64: 1, 128>}, {transform_indices = @transform_16, window_bounds = array<i64: 8, 128>}]} {
    %c0 = arith.constant 0 : index
    %c0_0 = arith.constant 0 : index
    %0 = vector.load %arg1[%c0, %c0_0] : memref<8x128xf32, #tpu.memory_space<vmem>>, vector<8x128xf32>
    %c0_1 = arith.constant 0 : index
    %c0_2 = arith.constant 0 : index
    %1 = vector.load %arg2[%c0_1, %c0_2] : memref<1x128xf32, #tpu.memory_space<vmem>>, vector<1x128xf32>
    %c0_3 = arith.constant 0 : index
    %c0_4 = arith.constant 0 : index
    %2 = vector.load %arg3[%c0_3, %c0_4] : memref<1x128xf32, #tpu.memory_space<vmem>>, vector<1x128xf32>
    %cst = arith.constant dense<0.000000e+00> : vector<8xf32>
    %3 = vector.multi_reduction <add>, %0, %cst [1] : vector<8x128xf32> to vector<8xf32>
    %4 = vector.shape_cast %3 : vector<8xf32> to vector<8x1xf32>
    %cst_5 = arith.constant 3.125000e-02 : f32
    %5 = vector.broadcast %cst_5 : f32 to vector<8x1xf32>
    %6 = arith.mulf %4, %5 : vector<8x1xf32>
    %7 = vector.broadcast %6 : vector<8x1xf32> to vector<8x128xf32>
    %8 = arith.subf %0, %7 : vector<8x128xf32>
    %9 = arith.mulf %8, %8 : vector<8x128xf32>
    %cst_6 = arith.constant dense<0.000000e+00> : vector<8xf32>
    %10 = vector.multi_reduction <add>, %9, %cst_6 [1] : vector<8x128xf32> to vector<8xf32>
    %11 = vector.shape_cast %10 : vector<8xf32> to vector<8x1xf32>
    %cst_7 = arith.constant 9.600000e+01 : f32
    %12 = vector.broadcast %cst_7 : f32 to vector<8x1xf32>
    %13 = arith.mulf %12, %6 : vector<8x1xf32>
    %14 = arith.mulf %13, %6 : vector<8x1xf32>
    %15 = arith.subf %11, %14 : vector<8x1xf32>
    %cst_8 = arith.constant 3.125000e-02 : f32
    %16 = vector.broadcast %cst_8 : f32 to vector<8x1xf32>
    %17 = arith.mulf %15, %16 : vector<8x1xf32>
    %cst_9 = arith.constant 9.99999974E-6 : f32
    %18 = vector.broadcast %cst_9 : f32 to vector<8x1xf32>
    %19 = arith.addf %17, %18 : vector<8x1xf32>
    %20 = math.rsqrt %19 : vector<8x1xf32>
    %21 = vector.broadcast %20 : vector<8x1xf32> to vector<8x128xf32>
    %22 = arith.mulf %8, %21 : vector<8x128xf32>
    %23 = vector.broadcast %1 : vector<1x128xf32> to vector<8x128xf32>
    %24 = arith.mulf %22, %23 : vector<8x128xf32>
    %25 = vector.broadcast %2 : vector<1x128xf32> to vector<8x128xf32>
    %26 = arith.addf %24, %25 : vector<8x128xf32>
    %27 = arith.truncf %26 : vector<8x128xf32> to vector<8x128xbf16>
    %c0_10 = arith.constant 0 : index
    %c0_11 = arith.constant 0 : index
    %28 = vector.load %arg4[%c0_10, %c0_11] : memref<128x384xbf16, #tpu.memory_space<vmem>>, vector<128x384xbf16>
    %cst_12 = arith.constant dense<0.000000e+00> : vector<8x384xf32>
    %29 = tpu.matmul %27, %28, %cst_12 {dimension_numbers = #tpu.dot_dimension_numbers<[1], [0], [0], [1], [0, 0, 1, 1], [], []>} : vector<8x128xbf16>, vector<128x384xbf16>, vector<8x384xf32> -> vector<8x384xf32>
    %c0_13 = arith.constant 0 : index
    %c0_14 = arith.constant 0 : index
    %30 = vector.load %arg5[%c0_13, %c0_14] : memref<1x384xf32, #tpu.memory_space<vmem>>, vector<1x384xf32>
    %31 = vector.broadcast %30 : vector<1x384xf32> to vector<8x384xf32>
    %32 = arith.addf %29, %31 : vector<8x384xf32>
    %cst_15 = arith.constant 0.000000e+00 : f32
    %33 = vector.broadcast %cst_15 : f32 to vector<8x96xf32>
    %c0_16 = arith.constant 0 : index
    %c32 = arith.constant 32 : index
    %34 = vector.load %arg18[%c0_16, %c32] : memref<8x128xf32, #tpu.memory_space<vmem>>, vector<8x96xf32>
    tpu.vector_store %arg18[%c0_16, %c32], %33 {strides = array<i32>} : memref<8x128xf32, #tpu.memory_space<vmem>>, vector<8x96xf32>,
    %35 = vector.extract_strided_slice %32 {offsets = [0, 0], sizes = [8, 8], strides = [1, 1]} : vector<8x384xf32> to vector<8x8xf32>
    %36 = arith.truncf %35 : vector<8x8xf32> to vector<8x8xbf16>
    %37 = vector.extract_strided_slice %32 {offsets = [0, 128], sizes = [8, 8], strides = [1, 1]} : vector<8x384xf32> to vector<8x8xf32>
    %38 = arith.truncf %37 : vector<8x8xf32> to vector<8x8xbf16>
    %39 = vector.extract_strided_slice %32 {offsets = [0, 256], sizes = [8, 8], strides = [1, 1]} : vector<8x384xf32> to vector<8x8xf32>
    %40 = arith.truncf %39 : vector<8x8xf32> to vector<8x8xbf16>
    %cst_17 = arith.constant dense<0.000000e+00> : vector<8x8xf32>
    %41 = tpu.matmul %36, %38, %cst_17 {dimension_numbers = #tpu.dot_dimension_numbers<[1], [1], [0], [0], [0, 0, 1, 0], [], []>} : vector<8x8xbf16>, vector<8x8xbf16>, vector<8x8xf32> -> vector<8x8xf32>
    %cst_18 = arith.constant dense<0xFF800000> : vector<8xf32>
    %42 = vector.multi_reduction <maximumf>, %41, %cst_18 [1] : vector<8x8xf32> to vector<8xf32>
    %43 = vector.shape_cast %42 : vector<8xf32> to vector<8x1xf32>
    %44 = vector.broadcast %43 : vector<8x1xf32> to vector<8x8xf32>
    %45 = arith.subf %41, %44 : vector<8x8xf32>
    %46 = math.exp %45 : vector<8x8xf32>
    %cst_19 = arith.constant dense<0.000000e+00> : vector<8xf32>
    %47 = vector.multi_reduction <add>, %46, %cst_19 [1] : vector<8x8xf32> to vector<8xf32>
    %48 = vector.shape_cast %47 : vector<8xf32> to vector<8x1xf32>
    %cst_20 = arith.constant 1.000000e+00 : f32
    %49 = vector.broadcast %cst_20 : f32 to vector<8x1xf32>
    %50 = arith.divf %49, %48 : vector<8x1xf32>
    %51 = vector.broadcast %50 : vector<8x1xf32> to vector<8x8xf32>
    %52 = arith.mulf %46, %51 : vector<8x8xf32>
    %53 = arith.truncf %52 : vector<8x8xf32> to vector<8x8xbf16>
    %cst_21 = arith.constant dense<0.000000e+00> : vector<8x8xf32>
    %54 = tpu.matmul %53, %40, %cst_21 {dimension_numbers = #tpu.dot_dimension_numbers<[1], [0], [0], [1], [0, 0, 1, 1], [], []>} : vector<8x8xbf16>, vector<8x8xbf16>, vector<8x8xf32> -> vector<8x8xf32>
    %c0_22 = arith.constant 0 : index
    %c0_23 = arith.constant 0 : index
    %55 = vector.load %arg18[%c0_22, %c0_23] : memref<8x128xf32, #tpu.memory_space<vmem>>, vector<8x8xf32>
    tpu.vector_store %arg18[%c0_22, %c0_23], %54 {strides = array<i32>} : memref<8x128xf32, #tpu.memory_space<vmem>>, vector<8x8xf32>,
    %56 = vector.extract_strided_slice %32 {offsets = [0, 8], sizes = [8, 8], strides = [1, 1]} : vector<8x384xf32> to vector<8x8xf32>
    %57 = arith.truncf %56 : vector<8x8xf32> to vector<8x8xbf16>
    %58 = vector.extract_strided_slice %32 {offsets = [0, 136], sizes = [8, 8], strides = [1, 1]} : vector<8x384xf32> to vector<8x8xf32>
    %59 = arith.truncf %58 : vector<8x8xf32> to vector<8x8xbf16>
    %60 = vector.extract_strided_slice %32 {offsets = [0, 264], sizes = [8, 8], strides = [1, 1]} : vector<8x384xf32> to vector<8x8xf32>
    %61 = arith.truncf %60 : vector<8x8xf32> to vector<8x8xbf16>
    %cst_24 = arith.constant dense<0.000000e+00> : vector<8x8xf32>
    %62 = tpu.matmul %57, %59, %cst_24 {dimension_numbers = #tpu.dot_dimension_numbers<[1], [1], [0], [0], [0, 0, 1, 0], [], []>} : vector<8x8xbf16>, vector<8x8xbf16>, vector<8x8xf32> -> vector<8x8xf32>
    %cst_25 = arith.constant dense<0xFF800000> : vector<8xf32>
    %63 = vector.multi_reduction <maximumf>, %62, %cst_25 [1] : vector<8x8xf32> to vector<8xf32>
    %64 = vector.shape_cast %63 : vector<8xf32> to vector<8x1xf32>
    %65 = vector.broadcast %64 : vector<8x1xf32> to vector<8x8xf32>
    %66 = arith.subf %62, %65 : vector<8x8xf32>
    %67 = math.exp %66 : vector<8x8xf32>
    %cst_26 = arith.constant dense<0.000000e+00> : vector<8xf32>
    %68 = vector.multi_reduction <add>, %67, %cst_26 [1] : vector<8x8xf32> to vector<8xf32>
    %69 = vector.shape_cast %68 : vector<8xf32> to vector<8x1xf32>
    %cst_27 = arith.constant 1.000000e+00 : f32
    %70 = vector.broadcast %cst_27 : f32 to vector<8x1xf32>
    %71 = arith.divf %70, %69 : vector<8x1xf32>
    %72 = vector.broadcast %71 : vector<8x1xf32> to vector<8x8xf32>
    %73 = arith.mulf %67, %72 : vector<8x8xf32>
    %74 = arith.truncf %73 : vector<8x8xf32> to vector<8x8xbf16>
    %cst_28 = arith.constant dense<0.000000e+00> : vector<8x8xf32>
    %75 = tpu.matmul %74, %61, %cst_28 {dimension_numbers = #tpu.dot_dimension_numbers<[1], [0], [0], [1], [0, 0, 1, 1], [], []>} : vector<8x8xbf16>, vector<8x8xbf16>, vector<8x8xf32> -> vector<8x8xf32>
    %c0_29 = arith.constant 0 : index
    %c8 = arith.constant 8 : index
    %76 = vector.load %arg18[%c0_29, %c8] : memref<8x128xf32, #tpu.memory_space<vmem>>, vector<8x8xf32>
    tpu.vector_store %arg18[%c0_29, %c8], %75 {strides = array<i32>} : memref<8x128xf32, #tpu.memory_space<vmem>>, vector<8x8xf32>,
    %77 = vector.extract_strided_slice %32 {offsets = [0, 16], sizes = [8, 8], strides = [1, 1]} : vector<8x384xf32> to vector<8x8xf32>
    %78 = arith.truncf %77 : vector<8x8xf32> to vector<8x8xbf16>
    %79 = vector.extract_strided_slice %32 {offsets = [0, 144], sizes = [8, 8], strides = [1, 1]} : vector<8x384xf32> to vector<8x8xf32>
    %80 = arith.truncf %79 : vector<8x8xf32> to vector<8x8xbf16>
    %81 = vector.extract_strided_slice %32 {offsets = [0, 272], sizes = [8, 8], strides = [1, 1]} : vector<8x384xf32> to vector<8x8xf32>
    %82 = arith.truncf %81 : vector<8x8xf32> to vector<8x8xbf16>
    %cst_30 = arith.constant dense<0.000000e+00> : vector<8x8xf32>
    %83 = tpu.matmul %78, %80, %cst_30 {dimension_numbers = #tpu.dot_dimension_numbers<[1], [1], [0], [0], [0, 0, 1, 0], [], []>} : vector<8x8xbf16>, vector<8x8xbf16>, vector<8x8xf32> -> vector<8x8xf32>
    %cst_31 = arith.constant dense<0xFF800000> : vector<8xf32>
    %84 = vector.multi_reduction <maximumf>, %83, %cst_31 [1] : vector<8x8xf32> to vector<8xf32>
    %85 = vector.shape_cast %84 : vector<8xf32> to vector<8x1xf32>
    %86 = vector.broadcast %85 : vector<8x1xf32> to vector<8x8xf32>
    %87 = arith.subf %83, %86 : vector<8x8xf32>
    %88 = math.exp %87 : vector<8x8xf32>
    %cst_32 = arith.constant dense<0.000000e+00> : vector<8xf32>
    %89 = vector.multi_reduction <add>, %88, %cst_32 [1] : vector<8x8xf32> to vector<8xf32>
    %90 = vector.shape_cast %89 : vector<8xf32> to vector<8x1xf32>
    %cst_33 = arith.constant 1.000000e+00 : f32
    %91 = vector.broadcast %cst_33 : f32 to vector<8x1xf32>
    %92 = arith.divf %91, %90 : vector<8x1xf32>
    %93 = vector.broadcast %92 : vector<8x1xf32> to vector<8x8xf32>
    %94 = arith.mulf %88, %93 : vector<8x8xf32>
    %95 = arith.truncf %94 : vector<8x8xf32> to vector<8x8xbf16>
    %cst_34 = arith.constant dense<0.000000e+00> : vector<8x8xf32>
    %96 = tpu.matmul %95, %82, %cst_34 {dimension_numbers = #tpu.dot_dimension_numbers<[1], [0], [0], [1], [0, 0, 1, 1], [], []>} : vector<8x8xbf16>, vector<8x8xbf16>, vector<8x8xf32> -> vector<8x8xf32>
    %c0_35 = arith.constant 0 : index
    %c16 = arith.constant 16 : index
    %97 = vector.load %arg18[%c0_35, %c16] : memref<8x128xf32, #tpu.memory_space<vmem>>, vector<8x8xf32>
    tpu.vector_store %arg18[%c0_35, %c16], %96 {strides = array<i32>} : memref<8x128xf32, #tpu.memory_space<vmem>>, vector<8x8xf32>,
    %98 = vector.extract_strided_slice %32 {offsets = [0, 24], sizes = [8, 8], strides = [1, 1]} : vector<8x384xf32> to vector<8x8xf32>
    %99 = arith.truncf %98 : vector<8x8xf32> to vector<8x8xbf16>
    %100 = vector.extract_strided_slice %32 {offsets = [0, 152], sizes = [8, 8], strides = [1, 1]} : vector<8x384xf32> to vector<8x8xf32>
    %101 = arith.truncf %100 : vector<8x8xf32> to vector<8x8xbf16>
    %102 = vector.extract_strided_slice %32 {offsets = [0, 280], sizes = [8, 8], strides = [1, 1]} : vector<8x384xf32> to vector<8x8xf32>
    %103 = arith.truncf %102 : vector<8x8xf32> to vector<8x8xbf16>
    %cst_36 = arith.constant dense<0.000000e+00> : vector<8x8xf32>
    %104 = tpu.matmul %99, %101, %cst_36 {dimension_numbers = #tpu.dot_dimension_numbers<[1], [1], [0], [0], [0, 0, 1, 0], [], []>} : vector<8x8xbf16>, vector<8x8xbf16>, vector<8x8xf32> -> vector<8x8xf32>
    %cst_37 = arith.constant dense<0xFF800000> : vector<8xf32>
    %105 = vector.multi_reduction <maximumf>, %104, %cst_37 [1] : vector<8x8xf32> to vector<8xf32>
    %106 = vector.shape_cast %105 : vector<8xf32> to vector<8x1xf32>
    %107 = vector.broadcast %106 : vector<8x1xf32> to vector<8x8xf32>
    %108 = arith.subf %104, %107 : vector<8x8xf32>
    %109 = math.exp %108 : vector<8x8xf32>
    %cst_38 = arith.constant dense<0.000000e+00> : vector<8xf32>
    %110 = vector.multi_reduction <add>, %109, %cst_38 [1] : vector<8x8xf32> to vector<8xf32>
    %111 = vector.shape_cast %110 : vector<8xf32> to vector<8x1xf32>
    %cst_39 = arith.constant 1.000000e+00 : f32
    %112 = vector.broadcast %cst_39 : f32 to vector<8x1xf32>
    %113 = arith.divf %112, %111 : vector<8x1xf32>
    %114 = vector.broadcast %113 : vector<8x1xf32> to vector<8x8xf32>
    %115 = arith.mulf %109, %114 : vector<8x8xf32>
    %116 = arith.truncf %115 : vector<8x8xf32> to vector<8x8xbf16>
    %cst_40 = arith.constant dense<0.000000e+00> : vector<8x8xf32>
    %117 = tpu.matmul %116, %103, %cst_40 {dimension_numbers = #tpu.dot_dimension_numbers<[1], [0], [0], [1], [0, 0, 1, 1], [], []>} : vector<8x8xbf16>, vector<8x8xbf16>, vector<8x8xf32> -> vector<8x8xf32>
    %c0_41 = arith.constant 0 : index
    %c24 = arith.constant 24 : index
    %118 = vector.load %arg18[%c0_41, %c24] : memref<8x128xf32, #tpu.memory_space<vmem>>, vector<8x8xf32>
    tpu.vector_store %arg18[%c0_41, %c24], %117 {strides = array<i32>} : memref<8x128xf32, #tpu.memory_space<vmem>>, vector<8x8xf32>,
    %c0_42 = arith.constant 0 : index
    %c0_43 = arith.constant 0 : index
    %119 = vector.load %arg18[%c0_42, %c0_43] : memref<8x128xf32, #tpu.memory_space<vmem>>, vector<8x128xf32>
    %120 = arith.truncf %119 : vector<8x128xf32> to vector<8x128xbf16>
    %c0_44 = arith.constant 0 : index
    %c0_45 = arith.constant 0 : index
    %121 = vector.load %arg6[%c0_44, %c0_45] : memref<128x128xbf16, #tpu.memory_space<vmem>>, vector<128x128xbf16>
    %cst_46 = arith.constant dense<0.000000e+00> : vector<8x128xf32>
    %122 = tpu.matmul %120, %121, %cst_46 {dimension_numbers = #tpu.dot_dimension_numbers<[1], [0], [0], [1], [0, 0, 1, 1], [], []>} : vector<8x128xbf16>, vector<128x128xbf16>, vector<8x128xf32> -> vector<8x128xf32>
    %c0_47 = arith.constant 0 : index
    %c0_48 = arith.constant 0 : index
    %123 = vector.load %arg7[%c0_47, %c0_48] : memref<1x128xf32, #tpu.memory_space<vmem>>, vector<1x128xf32>
    %124 = vector.broadcast %123 : vector<1x128xf32> to vector<8x128xf32>
    %125 = arith.addf %122, %124 : vector<8x128xf32>
    %126 = arith.addf %0, %125 : vector<8x128xf32>
    %c0_49 = arith.constant 0 : index
    %c0_50 = arith.constant 0 : index
    %127 = vector.load %arg8[%c0_49, %c0_50] : memref<1x128xf32, #tpu.memory_space<vmem>>, vector<1x128xf32>
    %c0_51 = arith.constant 0 : index
    %c0_52 = arith.constant 0 : index
    %128 = vector.load %arg9[%c0_51, %c0_52] : memref<1x128xf32, #tpu.memory_space<vmem>>, vector<1x128xf32>
    %cst_53 = arith.constant dense<0.000000e+00> : vector<8xf32>
    %129 = vector.multi_reduction <add>, %126, %cst_53 [1] : vector<8x128xf32> to vector<8xf32>
    %130 = vector.shape_cast %129 : vector<8xf32> to vector<8x1xf32>
    %cst_54 = arith.constant 3.125000e-02 : f32
    %131 = vector.broadcast %cst_54 : f32 to vector<8x1xf32>
    %132 = arith.mulf %130, %131 : vector<8x1xf32>
    %133 = vector.broadcast %132 : vector<8x1xf32> to vector<8x128xf32>
    %134 = arith.subf %126, %133 : vector<8x128xf32>
    %135 = arith.mulf %134, %134 : vector<8x128xf32>
    %cst_55 = arith.constant dense<0.000000e+00> : vector<8xf32>
    %136 = vector.multi_reduction <add>, %135, %cst_55 [1] : vector<8x128xf32> to vector<8xf32>
    %137 = vector.shape_cast %136 : vector<8xf32> to vector<8x1xf32>
    %cst_56 = arith.constant 9.600000e+01 : f32
    %138 = vector.broadcast %cst_56 : f32 to vector<8x1xf32>
    %139 = arith.mulf %138, %132 : vector<8x1xf32>
    %140 = arith.mulf %139, %132 : vector<8x1xf32>
    %141 = arith.subf %137, %140 : vector<8x1xf32>
    %cst_57 = arith.constant 3.125000e-02 : f32
    %142 = vector.broadcast %cst_57 : f32 to vector<8x1xf32>
    %143 = arith.mulf %141, %142 : vector<8x1xf32>
    %cst_58 = arith.constant 9.99999974E-6 : f32
    %144 = vector.broadcast %cst_58 : f32 to vector<8x1xf32>
    %145 = arith.addf %143, %144 : vector<8x1xf32>
    %146 = math.rsqrt %145 : vector<8x1xf32>
    %147 = vector.broadcast %146 : vector<8x1xf32> to vector<8x128xf32>
    %148 = arith.mulf %134, %147 : vector<8x128xf32>
    %149 = vector.broadcast %127 : vector<1x128xf32> to vector<8x128xf32>
    %150 = arith.mulf %148, %149 : vector<8x128xf32>
    %151 = vector.broadcast %128 : vector<1x128xf32> to vector<8x128xf32>
    %152 = arith.addf %150, %151 : vector<8x128xf32>
    %153 = arith.truncf %152 : vector<8x128xf32> to vector<8x128xbf16>
    %c0_59 = arith.constant 0 : index
    %c0_60 = arith.constant 0 : index
    %154 = vector.load %arg10[%c0_59, %c0_60] : memref<128x256xbf16, #tpu.memory_space<vmem>>, vector<128x256xbf16>
    %cst_61 = arith.constant dense<0.000000e+00> : vector<8x256xf32>
    %155 = tpu.matmul %153, %154, %cst_61 {dimension_numbers = #tpu.dot_dimension_numbers<[1], [0], [0], [1], [0, 0, 1, 1], [], []>} : vector<8x128xbf16>, vector<128x256xbf16>, vector<8x256xf32> -> vector<8x256xf32>
    %c0_62 = arith.constant 0 : index
    %c0_63 = arith.constant 0 : index
    %156 = vector.load %arg11[%c0_62, %c0_63] : memref<1x256xf32, #tpu.memory_space<vmem>>, vector<1x256xf32>
    %157 = vector.broadcast %156 : vector<1x256xf32> to vector<8x256xf32>
    %158 = arith.addf %155, %157 : vector<8x256xf32>
    %159 = vector.extract_strided_slice %158 {offsets = [0, 0], sizes = [8, 128], strides = [1, 1]} : vector<8x256xf32> to vector<8x128xf32>
    %160 = vector.extract_strided_slice %158 {offsets = [0, 128], sizes = [8, 128], strides = [1, 1]} : vector<8x256xf32> to vector<8x128xf32>
    %161 = arith.negf %160 : vector<8x128xf32>
    %162 = math.exp %161 : vector<8x128xf32>
    %cst_64 = arith.constant 1.000000e+00 : f32
    %163 = vector.broadcast %cst_64 : f32 to vector<8x128xf32>
    %164 = arith.addf %163, %162 : vector<8x128xf32>
    %165 = arith.divf %163, %164 : vector<8x128xf32>
    %166 = arith.mulf %159, %165 : vector<8x128xf32>
    %cst_65 = arith.constant 0.000000e+00 : f32
    %167 = vector.broadcast %cst_65 : f32 to vector<3x128xf32>
    %c0_66 = arith.constant 0 : index
    %c0_67 = arith.constant 0 : index
    %168 = vector.load %arg19[%c0_66, %c0_67] : memref<14x128xf32, #tpu.memory_space<vmem>>, vector<3x128xf32>
    tpu.vector_store %arg19[%c0_66, %c0_67], %167 {strides = array<i32>} : memref<14x128xf32, #tpu.memory_space<vmem>>, vector<3x128xf32>,
    %cst_68 = arith.constant 0.000000e+00 : f32
    %169 = vector.broadcast %cst_68 : f32 to vector<3x128xf32>
    %c11 = arith.constant 11 : index
    %c0_69 = arith.constant 0 : index
    %170 = vector.load %arg19[%c11, %c0_69] : memref<14x128xf32, #tpu.memory_space<vmem>>, vector<3x128xf32>
    tpu.vector_store %arg19[%c11, %c0_69], %169 {strides = array<i32>} : memref<14x128xf32, #tpu.memory_space<vmem>>, vector<3x128xf32>,
    %c3 = arith.constant 3 : index
    %c0_70 = arith.constant 0 : index
    %171 = vector.load %arg19[%c3, %c0_70] : memref<14x128xf32, #tpu.memory_space<vmem>>, vector<8x128xf32>
    tpu.vector_store %arg19[%c3, %c0_70], %166 {strides = array<i32>} : memref<14x128xf32, #tpu.memory_space<vmem>>, vector<8x128xf32>,
    %c0_71 = arith.constant 0 : index
    %c0_72 = arith.constant 0 : index
    %172 = vector.load %arg12[%c0_71, %c0_72] : memref<7x128xf32, #tpu.memory_space<vmem>>, vector<7x128xf32>
    %cst_73 = arith.constant 0.000000e+00 : f32
    %173 = vector.broadcast %cst_73 : f32 to vector<8x128xf32>
    %c0_74 = arith.constant 0 : index
    %c0_75 = arith.constant 0 : index
    %174 = vector.load %arg19[%c0_74, %c0_75] : memref<14x128xf32, #tpu.memory_space<vmem>>, vector<8x128xf32>
    %175 = vector.extract_strided_slice %172 {offsets = [0, 0], sizes = [1, 128], strides = [1, 1]} : vector<7x128xf32> to vector<1x128xf32>
    %176 = vector.broadcast %175 : vector<1x128xf32> to vector<8x128xf32>
    %177 = arith.mulf %174, %176 : vector<8x128xf32>
    %178 = arith.addf %173, %177 : vector<8x128xf32>
    %c1 = arith.constant 1 : index
    %c0_76 = arith.constant 0 : index
    %179 = vector.load %arg19[%c1, %c0_76] : memref<14x128xf32, #tpu.memory_space<vmem>>, vector<8x128xf32>
    %180 = vector.extract_strided_slice %172 {offsets = [1, 0], sizes = [1, 128], strides = [1, 1]} : vector<7x128xf32> to vector<1x128xf32>
    %181 = vector.broadcast %180 : vector<1x128xf32> to vector<8x128xf32>
    %182 = arith.mulf %179, %181 : vector<8x128xf32>
    %183 = arith.addf %178, %182 : vector<8x128xf32>
    %c2 = arith.constant 2 : index
    %c0_77 = arith.constant 0 : index
    %184 = vector.load %arg19[%c2, %c0_77] : memref<14x128xf32, #tpu.memory_space<vmem>>, vector<8x128xf32>
    %185 = vector.extract_strided_slice %172 {offsets = [2, 0], sizes = [1, 128], strides = [1, 1]} : vector<7x128xf32> to vector<1x128xf32>
    %186 = vector.broadcast %185 : vector<1x128xf32> to vector<8x128xf32>
    %187 = arith.mulf %184, %186 : vector<8x128xf32>
    %188 = arith.addf %183, %187 : vector<8x128xf32>
    %c3_78 = arith.constant 3 : index
    %c0_79 = arith.constant 0 : index
    %189 = vector.load %arg19[%c3_78, %c0_79] : memref<14x128xf32, #tpu.memory_space<vmem>>, vector<8x128xf32>
    %190 = vector.extract_strided_slice %172 {offsets = [3, 0], sizes = [1, 128], strides = [1, 1]} : vector<7x128xf32> to vector<1x128xf32>
    %191 = vector.broadcast %190 : vector<1x128xf32> to vector<8x128xf32>
    %192 = arith.mulf %189, %191 : vector<8x128xf32>
    %193 = arith.addf %188, %192 : vector<8x128xf32>
    %c4 = arith.constant 4 : index
    %c0_80 = arith.constant 0 : index
    %194 = vector.load %arg19[%c4, %c0_80] : memref<14x128xf32, #tpu.memory_space<vmem>>, vector<8x128xf32>
    %195 = vector.extract_strided_slice %172 {offsets = [4, 0], sizes = [1, 128], strides = [1, 1]} : vector<7x128xf32> to vector<1x128xf32>
    %196 = vector.broadcast %195 : vector<1x128xf32> to vector<8x128xf32>
    %197 = arith.mulf %194, %196 : vector<8x128xf32>
    %198 = arith.addf %193, %197 : vector<8x128xf32>
    %c5 = arith.constant 5 : index
    %c0_81 = arith.constant 0 : index
    %199 = vector.load %arg19[%c5, %c0_81] : memref<14x128xf32, #tpu.memory_space<vmem>>, vector<8x128xf32>
    %200 = vector.extract_strided_slice %172 {offsets = [5, 0], sizes = [1, 128], strides = [1, 1]} : vector<7x128xf32> to vector<1x128xf32>
    %201 = vector.broadcast %200 : vector<1x128xf32> to vector<8x128xf32>
    %202 = arith.mulf %199, %201 : vector<8x128xf32>
    %203 = arith.addf %198, %202 : vector<8x128xf32>
    %c6 = arith.constant 6 : index
    %c0_82 = arith.constant 0 : index
    %204 = vector.load %arg19[%c6, %c0_82] : memref<14x128xf32, #tpu.memory_space<vmem>>, vector<8x128xf32>
    %205 = vector.extract_strided_slice %172 {offsets = [6, 0], sizes = [1, 128], strides = [1, 1]} : vector<7x128xf32> to vector<1x128xf32>
    %206 = vector.broadcast %205 : vector<1x128xf32> to vector<8x128xf32>
    %207 = arith.mulf %204, %206 : vector<8x128xf32>
    %208 = arith.addf %203, %207 : vector<8x128xf32>
    %c0_83 = arith.constant 0 : index
    %c0_84 = arith.constant 0 : index
    %209 = vector.load %arg13[%c0_83, %c0_84] : memref<1x128xf32, #tpu.memory_space<vmem>>, vector<1x128xf32>
    %210 = vector.broadcast %209 : vector<1x128xf32> to vector<8x128xf32>
    %211 = arith.mulf %208, %210 : vector<8x128xf32>
    %c0_85 = arith.constant 0 : index
    %c0_86 = arith.constant 0 : index
    %212 = vector.load %arg14[%c0_85, %c0_86] : memref<1x128xf32, #tpu.memory_space<vmem>>, vector<1x128xf32>
    %213 = vector.broadcast %212 : vector<1x128xf32> to vector<8x128xf32>
    %214 = arith.addf %211, %213 : vector<8x128xf32>
    %215 = arith.negf %214 : vector<8x128xf32>
    %216 = math.exp %215 : vector<8x128xf32>
    %cst_87 = arith.constant 1.000000e+00 : f32
    %217 = vector.broadcast %cst_87 : f32 to vector<8x128xf32>
    %218 = arith.addf %217, %216 : vector<8x128xf32>
    %219 = arith.divf %217, %218 : vector<8x128xf32>
    %220 = arith.mulf %214, %219 : vector<8x128xf32>
    %221 = arith.truncf %220 : vector<8x128xf32> to vector<8x128xbf16>
    %c0_88 = arith.constant 0 : index
    %c0_89 = arith.constant 0 : index
    %222 = vector.load %arg15[%c0_88, %c0_89] : memref<128x128xbf16, #tpu.memory_space<vmem>>, vector<128x128xbf16>
    %cst_90 = arith.constant dense<0.000000e+00> : vector<8x128xf32>
    %223 = tpu.matmul %221, %222, %cst_90 {dimension_numbers = #tpu.dot_dimension_numbers<[1], [0], [0], [1], [0, 0, 1, 1], [], []>} : vector<8x128xbf16>, vector<128x128xbf16>, vector<8x128xf32> -> vector<8x128xf32>
    %c0_91 = arith.constant 0 : index
    %c0_92 = arith.constant 0 : index
    %224 = vector.load %arg16[%c0_91, %c0_92] : memref<1x128xf32, #tpu.memory_space<vmem>>, vector<1x128xf32>
    %225 = vector.broadcast %224 : vector<1x128xf32> to vector<8x128xf32>
    %226 = arith.addf %223, %225 : vector<8x128xf32>
    %227 = arith.addf %126, %226 : vector<8x128xf32>
    %c0_93 = arith.constant 0 : index
    %c0_94 = arith.constant 0 : index
    %228 = vector.load %arg17[%c0_93, %c0_94] : memref<8x128xf32, #tpu.memory_space<vmem>>, vector<8x128xf32>
    tpu.vector_store %arg17[%c0_93, %c0_94], %227 {strides = array<i32>} : memref<8x128xf32, #tpu.memory_space<vmem>>, vector<8x128xf32>,
    return
  }
  func.func @transform_0(%arg0: i32) -> (i32, i32) {
    %c0_i32 = arith.constant 0 : i32
    %c0_i32_0 = arith.constant 0 : i32
    return %arg0, %c0_i32 : i32, i32
  }
  func.func @transform_1(%arg0: i32) -> (i32, i32) {
    %c0_i32 = arith.constant 0 : i32
    %c0_i32_0 = arith.constant 0 : i32
    %c0_i32_1 = arith.constant 0 : i32
    return %c0_i32, %c0_i32_0 : i32, i32
  }
  func.func @transform_2(%arg0: i32) -> (i32, i32) {
    %c0_i32 = arith.constant 0 : i32
    %c0_i32_0 = arith.constant 0 : i32
    %c0_i32_1 = arith.constant 0 : i32
    return %c0_i32, %c0_i32_0 : i32, i32
  }
  func.func @transform_3(%arg0: i32) -> (i32, i32) {
    %c0_i32 = arith.constant 0 : i32
    %c0_i32_0 = arith.constant 0 : i32
    %c0_i32_1 = arith.constant 0 : i32
    return %c0_i32, %c0_i32_0 : i32, i32
  }
  func.func @transform_4(%arg0: i32) -> (i32, i32) {
    %c0_i32 = arith.constant 0 : i32
    %c0_i32_0 = arith.constant 0 : i32
    %c0_i32_1 = arith.constant 0 : i32
    return %c0_i32, %c0_i32_0 : i32, i32
  }
  func.func @transform_5(%arg0: i32) -> (i32, i32) {
    %c0_i32 = arith.constant 0 : i32
    %c0_i32_0 = arith.constant 0 : i32
    %c0_i32_1 = arith.constant 0 : i32
    return %c0_i32, %c0_i32_0 : i32, i32
  }
  func.func @transform_6(%arg0: i32) -> (i32, i32) {
    %c0_i32 = arith.constant 0 : i32
    %c0_i32_0 = arith.constant 0 : i32
    %c0_i32_1 = arith.constant 0 : i32
    return %c0_i32, %c0_i32_0 : i32, i32
  }
  func.func @transform_7(%arg0: i32) -> (i32, i32) {
    %c0_i32 = arith.constant 0 : i32
    %c0_i32_0 = arith.constant 0 : i32
    %c0_i32_1 = arith.constant 0 : i32
    return %c0_i32, %c0_i32_0 : i32, i32
  }
  func.func @transform_8(%arg0: i32) -> (i32, i32) {
    %c0_i32 = arith.constant 0 : i32
    %c0_i32_0 = arith.constant 0 : i32
    %c0_i32_1 = arith.constant 0 : i32
    return %c0_i32, %c0_i32_0 : i32, i32
  }
  func.func @transform_9(%arg0: i32) -> (i32, i32) {
    %c0_i32 = arith.constant 0 : i32
    %c0_i32_0 = arith.constant 0 : i32
    %c0_i32_1 = arith.constant 0 : i32
    return %c0_i32, %c0_i32_0 : i32, i32
  }
  func.func @transform_10(%arg0: i32) -> (i32, i32) {
    %c0_i32 = arith.constant 0 : i32
    %c0_i32_0 = arith.constant 0 : i32
    %c0_i32_1 = arith.constant 0 : i32
    return %c0_i32, %c0_i32_0 : i32, i32
  }
  func.func @transform_11(%arg0: i32) -> (i32, i32) {
    %c0_i32 = arith.constant 0 : i32
    %c0_i32_0 = arith.constant 0 : i32
    %c0_i32_1 = arith.constant 0 : i32
    return %c0_i32, %c0_i32_0 : i32, i32
  }
  func.func @transform_12(%arg0: i32) -> (i32, i32) {
    %c0_i32 = arith.constant 0 : i32
    %c0_i32_0 = arith.constant 0 : i32
    %c0_i32_1 = arith.constant 0 : i32
    return %c0_i32, %c0_i32_0 : i32, i32
  }
  func.func @transform_13(%arg0: i32) -> (i32, i32) {
    %c0_i32 = arith.constant 0 : i32
    %c0_i32_0 = arith.constant 0 : i32
    %c0_i32_1 = arith.constant 0 : i32
    return %c0_i32, %c0_i32_0 : i32, i32
  }
  func.func @transform_14(%arg0: i32) -> (i32, i32) {
    %c0_i32 = arith.constant 0 : i32
    %c0_i32_0 = arith.constant 0 : i32
    %c0_i32_1 = arith.constant 0 : i32
    return %c0_i32, %c0_i32_0 : i32, i32
  }
  func.func @transform_15(%arg0: i32) -> (i32, i32) {
    %c0_i32 = arith.constant 0 : i32
    %c0_i32_0 = arith.constant 0 : i32
    %c0_i32_1 = arith.constant 0 : i32
    return %c0_i32, %c0_i32_0 : i32, i32
  }
  func.func @transform_16(%arg0: i32) -> (i32, i32) {
    %c0_i32 = arith.constant 0 : i32
    %c0_i32_0 = arith.constant 0 : i32
    return %arg0, %c0_i32 : i32, i32
  }
}

module attributes {stable_mosaic.version = 11 : i64} {
  func.func @_fc2_kernel(%arg0: i32, %arg1: memref<8x128xf32, #tpu.memory_space<vmem>>, %arg2: memref<128x128xbf16, #tpu.memory_space<vmem>>, %arg3: memref<1x128xf32, #tpu.memory_space<vmem>>, %arg4: memref<8x128xf32, #tpu.memory_space<vmem>>) attributes {dimension_semantics = [#tpu.dimension_semantics<parallel>], iteration_bounds = array<i64: 2>, scalar_prefetch = 0 : i64, scratch_operands = 0 : i64, tpu.core_type = #tpu.core_type<tc>, window_params = [{transform_indices = @transform_0, window_bounds = array<i64: 8, 128>}, {pipeline_mode = #tpu.pipeline_mode<synchronous>, transform_indices = @transform_1, window_bounds = array<i64: 128, 128>}, {pipeline_mode = #tpu.pipeline_mode<synchronous>, transform_indices = @transform_2, window_bounds = array<i64: 1, 128>}, {transform_indices = @transform_3, window_bounds = array<i64: 8, 128>}]} {
    %c0 = arith.constant 0 : index
    %c0_0 = arith.constant 0 : index
    %0 = vector.load %arg1[%c0, %c0_0] : memref<8x128xf32, #tpu.memory_space<vmem>>, vector<8x128xf32>
    %1 = arith.truncf %0 : vector<8x128xf32> to vector<8x128xbf16>
    %c0_1 = arith.constant 0 : index
    %c0_2 = arith.constant 0 : index
    %2 = vector.load %arg2[%c0_1, %c0_2] : memref<128x128xbf16, #tpu.memory_space<vmem>>, vector<128x128xbf16>
    %cst = arith.constant dense<0.000000e+00> : vector<8x128xf32>
    %3 = tpu.matmul %1, %2, %cst {dimension_numbers = #tpu.dot_dimension_numbers<[1], [0], [0], [1], [0, 0, 1, 1], [], []>} : vector<8x128xbf16>, vector<128x128xbf16>, vector<8x128xf32> -> vector<8x128xf32>
    %c0_3 = arith.constant 0 : index
    %c0_4 = arith.constant 0 : index
    %4 = vector.load %arg3[%c0_3, %c0_4] : memref<1x128xf32, #tpu.memory_space<vmem>>, vector<1x128xf32>
    %5 = vector.broadcast %4 : vector<1x128xf32> to vector<8x128xf32>
    %6 = arith.addf %3, %5 : vector<8x128xf32>
    %c0_5 = arith.constant 0 : index
    %c0_6 = arith.constant 0 : index
    %7 = vector.load %arg4[%c0_5, %c0_6] : memref<8x128xf32, #tpu.memory_space<vmem>>, vector<8x128xf32>
    tpu.vector_store %arg4[%c0_5, %c0_6], %6 {strides = array<i32>} : memref<8x128xf32, #tpu.memory_space<vmem>>, vector<8x128xf32>,
    return
  }
  func.func @transform_0(%arg0: i32) -> (i32, i32) {
    %c0_i32 = arith.constant 0 : i32
    %c0_i32_0 = arith.constant 0 : i32
    return %arg0, %c0_i32 : i32, i32
  }
  func.func @transform_1(%arg0: i32) -> (i32, i32) {
    %c0_i32 = arith.constant 0 : i32
    %c0_i32_0 = arith.constant 0 : i32
    %c0_i32_1 = arith.constant 0 : i32
    return %c0_i32, %c0_i32_0 : i32, i32
  }
  func.func @transform_2(%arg0: i32) -> (i32, i32) {
    %c0_i32 = arith.constant 0 : i32
    %c0_i32_0 = arith.constant 0 : i32
    %c0_i32_1 = arith.constant 0 : i32
    return %c0_i32, %c0_i32_0 : i32, i32
  }
  func.func @transform_3(%arg0: i32) -> (i32, i32) {
    %c0_i32 = arith.constant 0 : i32
    %c0_i32_0 = arith.constant 0 : i32
    return %arg0, %c0_i32 : i32, i32
  }
}

</mosaic_0001>

<bundles_post_ra>
// kernel: conformer_forward.8
= control target key start
LH: loop header
LB: loop body
LE: loop exit
PB: predicated region body
PF: predicated region fallthrough
CT: control target
= control target key end

     0   :  { %s546_s0 = inlined_call_operand.vmem [shape: f32[2,9,8,16], index: 0, kind: input, shape index: {}]   ;;  %s547_s1 = inlined_call_operand.vmem [shape: f32[9], index: 1, kind: input, shape index: {}]   ;;  %s548_s2 = inlined_call_operand.<no memory space> [shape: f32[1], index: 2, kind: input, shape index: {}]   ;;  %s549_s3 = inlined_call_operand.vmem [shape: bf16[16,128], index: 3, kind: input, shape index: {}]   ;;  %s550_s4 = inlined_call_operand.vmem [shape: f32[1,128], index: 4, kind: input, shape index: {}]   ;;  %s551_s5 = inlined_call_operand.vmem [shape: f32[2,8,128], index: 5, kind: output, shape index: {}]  }
   0x1   :  { %10 = sst [smem:[#allocation2]] %s548_s2 }
   0x2   :  { %11 = vsyncpa [#allocation4], 0  ;;  %s505_s20 = smov 0  }
   0x3 LB: > { %s390_s21 = sadd.s32 4294967295, %s469_s20   ;;  %p392_p0 = scmp.ge.s32.totalorder %s469_s20, 1  ;;  %s469_s20 = sphi %s505_s20, %s17_s20  }
   0x4   : > { %p158_p1 = scmp.lt.s32.totalorder %s469_s20, 3  ;;  %s170_s24 = sshll.u32 %s547_s1, 4  ;;  %s171_s24 = int_to_ptr.vmem [resolvable:$true] %s170_s24 }
   0x5   : > { %p432_p3 = scmp.eq.s32.totalorder %s390_s21, 0  ;;  %s471_s2 = smov [#allocation3]  }
   0x6   : > { %p159_p2 = pnand %p392_p0, %p158_p1 }
   0x8   : > { %p428_p4 = pneg %p159_p2  ;;  %200 = sbr.rel (%p159_p2) target bundleno = 180 (0xb4), region = 40 }
   0xa   : > { %p429_p5 = pnand %p432_p3, %p428_p4 }
   0xc   : > { %431 = dma.vmem_to_smem (!%p429_p5), %s171_s24, 16, %s471_s2, [#allocation4]  }
   0xd   : > { %464 = dma.done.wait (%p432_p3), [#allocation4], 16  }
   0xe   : > { %466 = vsyncadd (%p432_p3), [#allocation4], 4294967280 }
   0xf   : > { %207 = sfence }
  0x10   : > { %v422_v0 = vld [vmem:[%s549_s3] sm:$0xff]  ;;  %p229_p6 = scmp.lt.s32.totalorder %s390_s21, 1  ;;  %s240_s27 = sld [smem:[#allocation3]]  ;;  %vm307_vm0 = vcmask 130048  }
  0x11   : > { %s400_s28 = sld [smem:[#allocation3 + $0x1]]  ;;  %318 = vmatpush.bf16.msra.mxu0 %v422_v0  ;;  %v443_v39 = vld [vmem:[%s550_s4] ss:$0 sm:$0xff] }
  0x12   : > { %s553_s21 = smov (!%p229_p6, %s390_s21), 1  ;;  %s402_s29 = sld [smem:[#allocation3 + $0x2]] }
  0x13   : > { %s423_s30 = smul.u32 72, %s553_s21  ;;  %s404_s6 = sld [smem:[#allocation3 + $0x3]] }
  0x14   : > { %s406_s7 = sld [smem:[#allocation3 + $0x4]]  ;;  %s398_s16 = sshll.u32 %s553_s21, 3 }
  0x15   : > { %s525_s10 = scalar_lea.vmem %s546_s0, %s423_s30  ;;  %s408_s11 = sld [smem:[#allocation3 + $0x5]] }
  0x16   : > { %v241_v1 = vstv %s240_s27  ;;  %v239_v2 = vld [vmem:[%s525_s10] sm:$0xff]  ;;  %v399_v3 = vld [vmem:[%s525_s10 + $0x8] sm:$0xff]  ;;  %v401_v5 = vld [vmem:[%s525_s10 + $0x10] sm:$0xff]  ;;  %s410_s12 = sld [smem:[#allocation3 + $0x6]]  ;;  %s237_s23 = scalar_lea.vmem %s551_s5, %s398_s16 }
  0x17   : > { %v246_v4 = vstv %s400_s28  ;;  %v242_v6 = vmul.f32 %v241_v1, %v239_v2  ;;  %v403_v8 = vld [vmem:[%s525_s10 + $0x18] sm:$0xff]  ;;  %s412_s13 = sld [smem:[#allocation3 + $0x7]]  ;;  %v405_v10 = vld [vmem:[%s525_s10 + $0x20] sm:$0xff]  ;;  %v407_v16 = vld [vmem:[%s525_s10 + $0x28] sm:$0xff] }
  0x18   : > { %v247_v7 = vmul.f32 %v399_v3, %v246_v4  ;;  %v252_v9 = vstv %s402_s29  ;;  %s414_s14 = sld [smem:[#allocation3 + $0x8]]  ;;  %v409_v20 = vld [vmem:[%s525_s10 + $0x30] sm:$0xff]  ;;  %v411_v24 = vld [vmem:[%s525_s10 + $0x38] sm:$0xff]  ;;  %v413_v28 = vld [vmem:[%s525_s10 + $0x40] sm:$0xff] }
  0x19   : > { %v253_v12 = vmul.f32 %v401_v5, %v252_v9  ;;  %v258_v13 = vstv %s404_s6  ;;  %s291_s15 = sld [smem:[#allocation2]] }
  0x1a   : > { %v248_v11 = vadd.f32 %v247_v7, %v242_v6  ;;  %v259_v14 = vmul.f32 %v403_v8, %v258_v13  ;;  %v264_v15 = vstv %s406_s7 }
  0x1b   : > { %v265_v18 = vmul.f32 %v405_v10, %v264_v15  ;;  %v270_v19 = vstv %s408_s11 }
  0x1c   : > { %v254_v17 = vadd.f32 %v253_v12, %v248_v11  ;;  %v276_v21 = vstv %s410_s12  ;;  %v271_v23 = vmul.f32 %v407_v16, %v270_v19 }
  0x1d   : > { %v282_v25 = vstv %s412_s13  ;;  %v277_v27 = vmul.f32 %v409_v20, %v276_v21 }
  0x1e   : > { %v260_v22 = vadd.f32 %v259_v14, %v254_v17  ;;  %v288_v29 = vstv %s414_s14  ;;  %v283_v31 = vmul.f32 %v411_v24, %v282_v25 }
  0x1f   : > { %v289_v33 = vmul.f32 %v413_v28, %v288_v29  ;;  %v292_v35 = vstv %s291_s15 }
  0x20   : > { %v266_v26 = vadd.f32 %v265_v18, %v260_v22 }
  0x22   : > { %v272_v30 = vadd.f32 %v271_v23, %v266_v26 }
  0x24   : > { %v278_v32 = vadd.f32 %v277_v27, %v272_v30 }
  0x26   : > { %v284_v34 = vadd.f32 %v283_v31, %v278_v32 }
  0x28   : > { %v290_v36 = vadd.f32 %v289_v33, %v284_v34 }
  0x2a   : > { %v293_v37 = vadd.f32 %v292_v35, %v290_v36 }
  0x2c   : > { %v294_v38 = vpack.c.bf16 %v293_v37, %v293_v37 }
  0x2e   : > { %419 = vmatmul.msk.bf16.vlgmr.msra.gmra.mxu0 %vm307_vm0, %v294_v38 }
  0xab   : > { %v320_v40 = vpop.f32.mrf.mxu0 }
  0xac   : > { %v321_v41 = vadd.f32 %v443_v39, %v320_v40 }
  0xae   : > { %324 = vst [vmem:[%s237_s23] sm:$0xff] %v321_v41 }
  0xb3   : > { %v322_v42 = vpop.f32.mrf.mxu0 }
  0xb4 PF: > { %s17_s20 = sadd.s32 1, %s469_s20  }
  0xb5   : > { %p14_p7 = scmp.ge.s32.totalorder %s17_s20, 4  }
  0xb7   :  { %16 = sbr.rel (!%p14_p7) target bundleno = 3 (0x3), region = 83 }
  0xbc   :  { %344 = vsyncpa [#allocation4], 1 }
  0xbd   :  { %346 = vsyncpa [#allocation4 + $0x1], 1 }

// kernel: conformer_forward.11
= control target key start
LH: loop header
LB: loop body
LE: loop exit
PB: predicated region body
PF: predicated region fallthrough
CT: control target
= control target key end

     0   :  { %14 = vsyncpa [#allocation3], 0  ;;  %s1026_s0 = inlined_call_operand.vmem [shape: f32[16,128], index: 0, kind: input, shape index: {}]   ;;  %s1027_s1 = inlined_call_operand.vmem [shape: f32[1,128], index: 1, kind: input, shape index: {}]   ;;  %s1028_s2 = inlined_call_operand.vmem [shape: f32[1,128], index: 2, kind: input, shape index: {}]   ;;  %s1029_s3 = inlined_call_operand.hbm [shape: bf16[128,128], index: 3, kind: input, shape index: {}]   ;;  %s1030_s4 = inlined_call_operand.vmem [shape: f32[1,128], index: 4, kind: input, shape index: {}]   ;;  %s1031_s5 = inlined_call_operand.hbm [shape: bf16[128,128], index: 5, kind: input, shape index: {}]   ;;  %s1032_s6 = inlined_call_operand.vmem [shape: f32[1,128], index: 6, kind: input, shape index: {}]   ;;  %s1033_s7 = inlined_call_operand.vmem [shape: f32[1,128], index: 7, kind: input, shape index: {}]   ;;  %s1034_s8 = inlined_call_operand.vmem [shape: f32[1,128], index: 8, kind: input, shape index: {}]   ;;  %s1035_s9 = inlined_call_operand.vmem [shape: f32[16,128], index: 9, kind: output, shape index: {}]  }
   0x1   :  { %15 = vsyncpa [#allocation5], 0  ;;  %s960_s30 = smov 0  }
   0x2 LB: > { %s263_s12 = sshll.u32 %s1029_s3, 4  ;;  %s691_s13 = sadd.s32 4294967295, %s904_s30   ;;  %s904_s30 = sphi %s960_s30, %s21_s30   ;;  %s264_s12 = int_to_ptr.hbm [resolvable:$true] %s263_s12 }
   0x3   : > { %p693_p0 = scmp.ge.s32.totalorder %s904_s30, 1  ;;  %p246_p1 = scmp.lt.s32.totalorder %s904_s30, 3 }
   0x4   : > { %p800_p2 = scmp.eq.s32.totalorder %s691_s13, 0  ;;  %s906_s15 = smov [#allocation2]  }
   0x5   : > { %p971_p3 = pnand %p693_p0, %p246_p1  ;;  %s265_s16 = sshll.u32 %s906_s15, 4  ;;  %s266_s16 = int_to_ptr.vmem [resolvable:$true] %s265_s16 }
   0x6   : > { %s280_s19 = sshll.u32 %s1031_s5, 4  ;;  %s907_s20 = smov [#allocation4]   ;;  %s281_s19 = int_to_ptr.hbm [resolvable:$true] %s280_s19 }
   0x7   : > { %p793_p4 = pneg %p971_p3  ;;  %s282_s21 = sshll.u32 %s907_s20, 4  ;;  %s283_s21 = int_to_ptr.vmem [resolvable:$true] %s282_s21 }
   0x8   : > { %s908_s22 = smov 64   ;;  %s909_s23 = smov 4  }
   0x9   : > { %p794_p5 = pnand %p800_p2, %p793_p4  ;;  %314 = sbr.rel (%p971_p3) target bundleno = 854 (0x356), region = 56 }
   0xb   : > { %796 = dma.hbm_to_vmem [thread:$0]  (!%p794_p5), %s264_s12, 1024, %s266_s16, [#allocation3], %s908_s22, %s908_s22, %s909_s23  }
   0xc   : > { %799 = dma.hbm_to_vmem [thread:$0]  (!%p794_p5), %s281_s19, 1024, %s283_s21, [#allocation5], %s908_s22, %s908_s22, %s909_s23  }
   0xe   : > { %895 = dma.done.wait (%p800_p2), [#allocation3], 1024  }
   0xf   : > { %897 = vsyncadd (%p800_p2), [#allocation3], 4294966272 }
  0x10   : > { %899 = dma.done.wait (%p800_p2), [#allocation5], 1024  }
  0x11   : > { %901 = vsyncadd (%p800_p2), [#allocation5], 4294966272  ;;  %p354_p6 = scmp.lt.s32.totalorder %s691_s13, 1  ;;  %v776_v5 = vld [vmem:[#allocation2 + $0x38] sm:$0xff]  ;;  %v775_v6 = vld [vmem:[#allocation2 + $0x30] sm:$0xff] }
  0x12   : > { %465 = vmatpush.bf16.msra.mxu0 %v776_v5  ;;  %v774_v7 = vld [vmem:[#allocation2 + $0x28] sm:$0xff]  ;;  %v773_v8 = vld [vmem:[#allocation2 + $0x20] sm:$0xff]  ;;  %v772_v9 = vld [vmem:[#allocation2 + $0x18] sm:$0xff] }
  0x13   : > { %s1038_s13 = smov (!%p354_p6, %s691_s13), 1  ;;  %v771_v10 = vld [vmem:[#allocation2 + $0x10] sm:$0xff]  ;;  %v770_v11 = vld [vmem:[#allocation2 + $0x8] sm:$0xff]  ;;  %v769_v12 = vld [vmem:[#allocation2] sm:$0xff] }
  0x14   : > { %s700_s24 = sshll.u32 %s1038_s13, 3  ;;  %v816_v25 = vld [vmem:[%s1027_s1] ss:$0 sm:$0xff]  ;;  %v784_v32 = vld [vmem:[#allocation4 + $0x38] sm:$0xff]  ;;  %v783_v33 = vld [vmem:[#allocation4 + $0x30] sm:$0xff] }
  0x15   : > { %s357_s27 = scalar_lea.vmem %s1026_s0, %s700_s24  ;;  %v817_v28 = vld [vmem:[%s1028_s2] ss:$0 sm:$0xff]  ;;  %567 = vmatpush.bf16.msra.mxu1 %v784_v32  ;;  %v782_v34 = vld [vmem:[#allocation4 + $0x28] sm:$0xff]  ;;  %v780_v36 = vld [vmem:[#allocation4 + $0x18] sm:$0xff]  ;;  %s361_s23 = scalar_lea.vmem %s1035_s9, %s700_s24 }
  0x16   : > { %v995_v0 = vld [vmem:[%s357_s27] sm:$0xff]  ;;  %466 = vmatpush.bf16.msra.mxu0 %v775_v6  ;;  %v779_v37 = vld [vmem:[#allocation4 + $0x10] sm:$0xff]  ;;  %v778_v38 = vld [vmem:[#allocation4 + $0x8] sm:$0xff] }
  0x17   : > { %365 = vadd.xlane.f32.xlu0 %v995_v0  ;;  %v781_v35 = vld [vmem:[#allocation4 + $0x20] sm:$0xff] }
  0x18   : > { %v777_v39 = vld [vmem:[#allocation4] sm:$0xff] }
  0x19   : > { %568 = vmatpush.bf16.msra.mxu1 %v783_v33  ;;  %v818_v40 = vld [vmem:[%s1030_s4] ss:$0 sm:$0xff] }
  0x1a   : > { %467 = vmatpush.bf16.msra.mxu0 %v774_v7  ;;  %v819_v59 = vld [vmem:[%s1032_s6] ss:$0 sm:$0xff] }
  0x1d   : > { %569 = vmatpush.bf16.msra.mxu1 %v782_v34 }
  0x1e   : > { %468 = vmatpush.bf16.msra.mxu0 %v773_v8 }
  0x21   : > { %570 = vmatpush.bf16.msra.mxu1 %v781_v35 }
  0x22   : > { %469 = vmatpush.bf16.msra.mxu0 %v772_v9 }
  0x25   : > { %571 = vmatpush.bf16.msra.mxu1 %v780_v36 }
  0x26   : > { %470 = vmatpush.bf16.msra.mxu0 %v771_v10 }
  0x29   : > { %572 = vmatpush.bf16.msra.mxu1 %v779_v37 }
  0x2a   : > { %471 = vmatpush.bf16.msra.mxu0 %v770_v11 }
  0x2d   : > { %573 = vmatpush.bf16.msra.mxu1 %v778_v38 }
  0x2e   : > { %472 = vmatpush.bf16.msra.mxu0 %v769_v12 }
  0x31   : > { %574 = vmatpush.bf16.msra.mxu1 %v777_v39 }
  0x8a   : > { %v366_v1 = vpop.xlane.xlu0 %365 }
  0x8b   : > { %v367_v2 = vmul.f32 0.03125, %v366_v1 }
  0x8d   : > { %v368_v3 = vsub.f32 %v995_v0, %v367_v2  ;;  %v372_v13 = vmul.f32 96.0, %v367_v2 }
  0x8f   : > { %v369_v4 = vmul.f32 %v368_v3, %v368_v3  ;;  %v373_v14 = vmul.f32 %v372_v13, %v367_v2 }
  0x91   : > { %370 = vadd.xlane.f32.xlu0 %v369_v4 }
 0x104   : > { %v371_v15 = vpop.xlane.xlu0 %370 }
 0x105   : > { %v374_v16 = vsub.f32 %v371_v15, %v373_v14 }
 0x107   : > { %v375_v17 = vmul.f32 0.03125, %v374_v16 }
 0x109   : > { %v376_v18 = vadd.f32 1e-05, %v375_v17  ;;  %v820_v17 = vld [vmem:[%s1033_s7] ss:$0 sm:$0xff] }
 0x10b   : > { %822 = vrsqrt.f32 %v376_v18  ;;  %vm383_vm1 = vweird.f32 %v376_v18 }
 0x111   : > { %v823_v19 = vpop.eup %822 }
 0x112   : > { %v378_v20 = vmul.f32 %v823_v19, %v376_v18  ;;  %vm384_vm0 = vweird.f32 %v823_v19 }
 0x113   : > { %vm385_vm2 = vmor %vm383_vm1, %vm384_vm0 }
 0x114   : > { %v379_v21 = vmul.f32 %v823_v19, %v378_v20 }
 0x116   : > { %v380_v22 = vmul.f32 0.5, %v379_v21 }
 0x118   : > { %v381_v23 = vsub.f32 1.5, %v380_v22 }
 0x11a   : > { %v382_v24 = vmul.f32 %v823_v19, %v381_v23 }
 0x11c   : > { %v386_v26 = vsel %vm385_vm2, %v823_v19, %v382_v24  ;;  %v821_v19 = vld [vmem:[%s1034_s8] ss:$0 sm:$0xff] }
 0x11d   : > { %v387_v27 = vmul.f32 %v386_v26, %v368_v3 }
 0x11f   : > { %v391_v29 = vmul.f32 %v816_v25, %v387_v27 }
 0x121   : > { %v395_v30 = vadd.f32 %v817_v28, %v391_v29 }
 0x123   : > { %v396_v31 = vpack.c.bf16 %v395_v30, %v395_v30 }
 0x125   : > { %473 = vmatmul.bf16.vlgmr.msra.gmra.mxu0 %v396_v31 }
 0x1a2   : > { %v474_v41 = vpop.f32.mrf.mxu0 }
 0x1a3   : > { %v475_v42 = vadd.f32 %v818_v40, %v474_v41 }
 0x1a5   : > { %v734_v43 = vmul.f32 -1.442695, %v475_v42 }
 0x1a7   : > { %824 = vpow2.f32 %v734_v43 }
 0x1aa   : > { %v476_v44 = vpop.f32.mrf.mxu0 }
 0x1ad   : > { %v825_v45 = vpop.eup %824 }
 0x1ae   : > { %v481_v46 = vadd.f32 1.0, %v825_v45 }
 0x1b0   : > { %826 = vrcp.f32 %v481_v46  ;;  %v493_v50 = vand.u32 2147483648, %v481_v46  ;;  %v491_v52 = vand.u32 2147483647, %v481_v46  ;;  %vm487_vm4 = vweird.f32 %v481_v46 }
 0x1b2   : > { %v494_v54 = vor.u32 1.1754944e-38, %v493_v50  ;;  %vm492_vm6 = vcmp.eq.f32.partialorder %v491_v52, 8.507059e+37 }
 0x1b6   : > { %v827_v47 = vpop.eup %826 }
 0x1b7   : > { %v483_v48 = vmul.f32 %v827_v47, %v481_v46  ;;  %vm488_vm3 = vweird.f32 %v827_v47 }
 0x1b8   : > { %vm489_vm5 = vmor %vm487_vm4, %vm488_vm3 }
 0x1b9   : > { %v484_v49 = vsub.f32 1.0, %v483_v48 }
 0x1bb   : > { %v485_v51 = vmul.f32 %v827_v47, %v484_v49 }
 0x1bd   : > { %v486_v53 = vadd.f32 %v827_v47, %v485_v51 }
 0x1bf   : > { %v490_v55 = vsel %vm489_vm5, %v827_v47, %v486_v53 }
 0x1c0   : > { %v495_v56 = vsel %vm492_vm6, %v494_v54, %v490_v55 }
 0x1c1   : > { %v497_v57 = vmul.f32 %v495_v56, %v475_v42 }
 0x1c3   : > { %v498_v58 = vpack.c.bf16 %v497_v57, %v497_v57 }
 0x1c5   : > { %575 = vmatmul.bf16.vlgmr.msra.gmra.mxu1 %v498_v58 }
 0x242   : > { %v576_v60 = vpop.f32.mrf.mxu1 }
 0x243   : > { %v577_v61 = vadd.f32 %v819_v59, %v576_v60 }
 0x245   : > { %v580_v62 = vmul.f32 0.5, %v577_v61 }
 0x247   : > { %v581_v63 = vadd.f32 %v580_v62, %v995_v0 }
 0x249   : > { %584 = vadd.xlane.f32.xlu1 %v581_v63 }
 0x24a   : > { %v578_v1 = vpop.f32.mrf.mxu1 }
 0x2bc   : > { %v585_v2 = vpop.xlane.xlu1 %584 }
 0x2bd   : > { %v586_v3 = vmul.f32 0.03125, %v585_v2 }
 0x2bf   : > { %v587_v4 = vsub.f32 %v581_v63, %v586_v3  ;;  %v591_v6 = vmul.f32 96.0, %v586_v3 }
 0x2c1   : > { %v588_v5 = vmul.f32 %v587_v4, %v587_v4  ;;  %v592_v7 = vmul.f32 %v591_v6, %v586_v3 }
 0x2c3   : > { %589 = vadd.xlane.f32.xlu1 %v588_v5 }
 0x336   : > { %v590_v8 = vpop.xlane.xlu1 %589 }
 0x337   : > { %v593_v9 = vsub.f32 %v590_v8, %v592_v7 }
 0x339   : > { %v594_v10 = vmul.f32 0.03125, %v593_v9 }
 0x33b   : > { %v595_v11 = vadd.f32 1e-05, %v594_v10 }
 0x33d   : > { %828 = vrsqrt.f32 %v595_v11  ;;  %vm602_vm8 = vweird.f32 %v595_v11 }
 0x343   : > { %v829_v12 = vpop.eup %828 }
 0x344   : > { %v597_v13 = vmul.f32 %v829_v12, %v595_v11  ;;  %vm603_vm7 = vweird.f32 %v829_v12 }
 0x345   : > { %vm604_vm9 = vmor %vm602_vm8, %vm603_vm7 }
 0x346   : > { %v598_v14 = vmul.f32 %v829_v12, %v597_v13 }
 0x348   : > { %v599_v15 = vmul.f32 0.5, %v598_v14 }
 0x34a   : > { %v600_v0 = vsub.f32 1.5, %v599_v15 }
 0x34c   : > { %v601_v16 = vmul.f32 %v829_v12, %v600_v0 }
 0x34e   : > { %v605_v18 = vsel %vm604_vm9, %v829_v12, %v601_v16 }
 0x34f   : > { %v606_v20 = vmul.f32 %v605_v18, %v587_v4 }
 0x351   : > { %v610_v21 = vmul.f32 %v820_v17, %v606_v20 }
 0x353   : > { %v614_v22 = vadd.f32 %v821_v19, %v610_v21 }
 0x355   : > { %615 = vst [vmem:[%s361_s23] sm:$0xff] %v614_v22 }
 0x356 PF: > { %s21_s30 = sadd.s32 1, %s904_s30  }
 0x357   : > { %p18_p7 = scmp.ge.s32.totalorder %s21_s30, 4  }
 0x359   :  { %20 = sbr.rel (!%p18_p7) target bundleno = 2 (0x2), region = 95 }
 0x35e   :  { %635 = vsyncpa [#allocation3], 1 }
 0x35f   :  { %637 = vsyncpa [#allocation3 + $0x1], 1 }
 0x360   :  { %638 = vsyncpa [#allocation5], 1 }

// kernel: conformer_forward.9
= control target key start
LH: loop header
LB: loop body
LE: loop exit
PB: predicated region body
PF: predicated region fallthrough
CT: control target
= control target key end

     0   :  { %12 = vsyncpa [#allocation3], 0  ;;  %s919_s0 = inlined_call_operand.vmem [shape: f32[16,128], index: 0, kind: input, shape index: {}]   ;;  %s920_s1 = inlined_call_operand.vmem [shape: f32[1,128], index: 1, kind: input, shape index: {}]   ;;  %s921_s2 = inlined_call_operand.vmem [shape: f32[1,128], index: 2, kind: input, shape index: {}]   ;;  %s922_s3 = inlined_call_operand.hbm [shape: bf16[128,128], index: 3, kind: input, shape index: {}]   ;;  %s923_s4 = inlined_call_operand.vmem [shape: f32[1,128], index: 4, kind: input, shape index: {}]   ;;  %s924_s5 = inlined_call_operand.hbm [shape: bf16[128,128], index: 5, kind: input, shape index: {}]   ;;  %s925_s6 = inlined_call_operand.vmem [shape: f32[1,128], index: 6, kind: input, shape index: {}]   ;;  %s926_s7 = inlined_call_operand.vmem [shape: f32[16,128], index: 7, kind: output, shape index: {}]  }
   0x1   :  { %13 = vsyncpa [#allocation5], 0  ;;  %s859_s24 = smov 0  }
   0x2 LB: > { %s219_s27 = sshll.u32 %s922_s3, 4  ;;  %s604_s28 = sadd.s32 4294967295, %s813_s24   ;;  %s813_s24 = sphi %s859_s24, %s19_s24   ;;  %s220_s27 = int_to_ptr.hbm [resolvable:$true] %s219_s27 }
   0x3   : > { %p606_p0 = scmp.ge.s32.totalorder %s813_s24, 1  ;;  %p202_p1 = scmp.lt.s32.totalorder %s813_s24, 3 }
   0x4   : > { %p713_p2 = scmp.eq.s32.totalorder %s604_s28, 0  ;;  %s815_s30 = smov [#allocation2]  }
   0x5   : > { %p870_p3 = pnand %p606_p0, %p202_p1  ;;  %s221_s8 = sshll.u32 %s815_s30, 4  ;;  %s222_s8 = int_to_ptr.vmem [resolvable:$true] %s221_s8 }
   0x6   : > { %s236_s11 = sshll.u32 %s924_s5, 4  ;;  %s816_s12 = smov [#allocation4]   ;;  %s237_s11 = int_to_ptr.hbm [resolvable:$true] %s236_s11 }
   0x7   : > { %p706_p4 = pneg %p870_p3  ;;  %s238_s13 = sshll.u32 %s816_s12, 4  ;;  %s239_s13 = int_to_ptr.vmem [resolvable:$true] %s238_s13 }
   0x8   : > { %s817_s14 = smov 64   ;;  %s818_s15 = smov 4  }
   0x9   : > { %p707_p5 = pnand %p713_p2, %p706_p4  ;;  %264 = sbr.rel (%p870_p3) target bundleno = 587 (0x24b), region = 48 }
   0xb   : > { %709 = dma.hbm_to_vmem [thread:$0]  (!%p707_p5), %s220_s27, 1024, %s222_s8, [#allocation3], %s817_s14, %s817_s14, %s818_s15  }
   0xc   : > { %712 = dma.hbm_to_vmem [thread:$0]  (!%p707_p5), %s237_s11, 1024, %s239_s13, [#allocation5], %s817_s14, %s817_s14, %s818_s15  }
   0xe   : > { %804 = dma.done.wait (%p713_p2), [#allocation3], 1024  }
   0xf   : > { %806 = vsyncadd (%p713_p2), [#allocation3], 4294966272 }
  0x10   : > { %808 = dma.done.wait (%p713_p2), [#allocation5], 1024  }
  0x11   : > { %810 = vsyncadd (%p713_p2), [#allocation5], 4294966272  ;;  %p300_p6 = scmp.lt.s32.totalorder %s604_s28, 1  ;;  %v689_v5 = vld [vmem:[#allocation2 + $0x38] sm:$0xff]  ;;  %v688_v6 = vld [vmem:[#allocation2 + $0x30] sm:$0xff] }
  0x12   : > { %411 = vmatpush.bf16.msra.mxu0 %v689_v5  ;;  %v687_v7 = vld [vmem:[#allocation2 + $0x28] sm:$0xff]  ;;  %v686_v8 = vld [vmem:[#allocation2 + $0x20] sm:$0xff]  ;;  %v685_v9 = vld [vmem:[#allocation2 + $0x18] sm:$0xff] }
  0x13   : > { %s929_s28 = smov (!%p300_p6, %s604_s28), 1  ;;  %v684_v10 = vld [vmem:[#allocation2 + $0x10] sm:$0xff]  ;;  %v683_v11 = vld [vmem:[#allocation2 + $0x8] sm:$0xff]  ;;  %v682_v12 = vld [vmem:[#allocation2] sm:$0xff] }
  0x14   : > { %s613_s16 = sshll.u32 %s929_s28, 3  ;;  %v729_v25 = vld [vmem:[%s920_s1] ss:$0 sm:$0xff]  ;;  %v697_v32 = vld [vmem:[#allocation4 + $0x38] sm:$0xff]  ;;  %v696_v33 = vld [vmem:[#allocation4 + $0x30] sm:$0xff] }
  0x15   : > { %s303_s19 = scalar_lea.vmem %s919_s0, %s613_s16  ;;  %v730_v28 = vld [vmem:[%s921_s2] ss:$0 sm:$0xff]  ;;  %513 = vmatpush.bf16.msra.mxu1 %v697_v32  ;;  %v695_v34 = vld [vmem:[#allocation4 + $0x28] sm:$0xff]  ;;  %v693_v36 = vld [vmem:[#allocation4 + $0x18] sm:$0xff]  ;;  %s307_s9 = scalar_lea.vmem %s926_s7, %s613_s16 }
  0x16   : > { %v894_v0 = vld [vmem:[%s303_s19] sm:$0xff]  ;;  %412 = vmatpush.bf16.msra.mxu0 %v688_v6  ;;  %v692_v37 = vld [vmem:[#allocation4 + $0x10] sm:$0xff]  ;;  %v691_v38 = vld [vmem:[#allocation4 + $0x8] sm:$0xff] }
  0x17   : > { %311 = vadd.xlane.f32.xlu0 %v894_v0  ;;  %v694_v35 = vld [vmem:[#allocation4 + $0x20] sm:$0xff] }
  0x18   : > { %v690_v39 = vld [vmem:[#allocation4] sm:$0xff] }
  0x19   : > { %514 = vmatpush.bf16.msra.mxu1 %v696_v33  ;;  %v731_v40 = vld [vmem:[%s923_s4] ss:$0 sm:$0xff] }
  0x1a   : > { %413 = vmatpush.bf16.msra.mxu0 %v687_v7  ;;  %v732_v59 = vld [vmem:[%s925_s6] ss:$0 sm:$0xff] }
  0x1d   : > { %515 = vmatpush.bf16.msra.mxu1 %v695_v34 }
  0x1e   : > { %414 = vmatpush.bf16.msra.mxu0 %v686_v8 }
  0x21   : > { %516 = vmatpush.bf16.msra.mxu1 %v694_v35 }
  0x22   : > { %415 = vmatpush.bf16.msra.mxu0 %v685_v9 }
  0x25   : > { %517 = vmatpush.bf16.msra.mxu1 %v693_v36 }
  0x26   : > { %416 = vmatpush.bf16.msra.mxu0 %v684_v10 }
  0x29   : > { %518 = vmatpush.bf16.msra.mxu1 %v692_v37 }
  0x2a   : > { %417 = vmatpush.bf16.msra.mxu0 %v683_v11 }
  0x2d   : > { %519 = vmatpush.bf16.msra.mxu1 %v691_v38 }
  0x2e   : > { %418 = vmatpush.bf16.msra.mxu0 %v682_v12 }
  0x31   : > { %520 = vmatpush.bf16.msra.mxu1 %v690_v39 }
  0x8a   : > { %v312_v1 = vpop.xlane.xlu0 %311 }
  0x8b   : > { %v313_v2 = vmul.f32 0.03125, %v312_v1 }
  0x8d   : > { %v314_v3 = vsub.f32 %v894_v0, %v313_v2  ;;  %v318_v13 = vmul.f32 96.0, %v313_v2 }
  0x8f   : > { %v315_v4 = vmul.f32 %v314_v3, %v314_v3  ;;  %v319_v14 = vmul.f32 %v318_v13, %v313_v2 }
  0x91   : > { %316 = vadd.xlane.f32.xlu0 %v315_v4 }
 0x104   : > { %v317_v15 = vpop.xlane.xlu0 %316 }
 0x105   : > { %v320_v16 = vsub.f32 %v317_v15, %v319_v14 }
 0x107   : > { %v321_v17 = vmul.f32 0.03125, %v320_v16 }
 0x109   : > { %v322_v18 = vadd.f32 1e-05, %v321_v17 }
 0x10b   : > { %733 = vrsqrt.f32 %v322_v18  ;;  %vm329_vm1 = vweird.f32 %v322_v18 }
 0x111   : > { %v734_v19 = vpop.eup %733 }
 0x112   : > { %v324_v20 = vmul.f32 %v734_v19, %v322_v18  ;;  %vm330_vm0 = vweird.f32 %v734_v19 }
 0x113   : > { %vm331_vm2 = vmor %vm329_vm1, %vm330_vm0 }
 0x114   : > { %v325_v21 = vmul.f32 %v734_v19, %v324_v20 }
 0x116   : > { %v326_v22 = vmul.f32 0.5, %v325_v21 }
 0x118   : > { %v327_v23 = vsub.f32 1.5, %v326_v22 }
 0x11a   : > { %v328_v24 = vmul.f32 %v734_v19, %v327_v23 }
 0x11c   : > { %v332_v26 = vsel %vm331_vm2, %v734_v19, %v328_v24 }
 0x11d   : > { %v333_v27 = vmul.f32 %v332_v26, %v314_v3 }
 0x11f   : > { %v337_v29 = vmul.f32 %v729_v25, %v333_v27 }
 0x121   : > { %v341_v30 = vadd.f32 %v730_v28, %v337_v29 }
 0x123   : > { %v342_v31 = vpack.c.bf16 %v341_v30, %v341_v30 }
 0x125   : > { %419 = vmatmul.bf16.vlgmr.msra.gmra.mxu0 %v342_v31 }
 0x1a2   : > { %v420_v41 = vpop.f32.mrf.mxu0 }
 0x1a3   : > { %v421_v42 = vadd.f32 %v731_v40, %v420_v41 }
 0x1a5   : > { %v647_v43 = vmul.f32 -1.442695, %v421_v42 }
 0x1a7   : > { %735 = vpow2.f32 %v647_v43 }
 0x1aa   : > { %v422_v44 = vpop.f32.mrf.mxu0 }
 0x1ad   : > { %v736_v45 = vpop.eup %735 }
 0x1ae   : > { %v427_v46 = vadd.f32 1.0, %v736_v45 }
 0x1b0   : > { %737 = vrcp.f32 %v427_v46  ;;  %v439_v50 = vand.u32 2147483648, %v427_v46  ;;  %v437_v52 = vand.u32 2147483647, %v427_v46  ;;  %vm433_vm4 = vweird.f32 %v427_v46 }
 0x1b2   : > { %v440_v54 = vor.u32 1.1754944e-38, %v439_v50  ;;  %vm438_vm6 = vcmp.eq.f32.partialorder %v437_v52, 8.507059e+37 }
 0x1b6   : > { %v738_v47 = vpop.eup %737 }
 0x1b7   : > { %v429_v48 = vmul.f32 %v738_v47, %v427_v46  ;;  %vm434_vm3 = vweird.f32 %v738_v47 }
 0x1b8   : > { %vm435_vm5 = vmor %vm433_vm4, %vm434_vm3 }
 0x1b9   : > { %v430_v49 = vsub.f32 1.0, %v429_v48 }
 0x1bb   : > { %v431_v51 = vmul.f32 %v738_v47, %v430_v49 }
 0x1bd   : > { %v432_v53 = vadd.f32 %v738_v47, %v431_v51 }
 0x1bf   : > { %v436_v55 = vsel %vm435_vm5, %v738_v47, %v432_v53 }
 0x1c0   : > { %v441_v56 = vsel %vm438_vm6, %v440_v54, %v436_v55 }
 0x1c1   : > { %v443_v57 = vmul.f32 %v441_v56, %v421_v42 }
 0x1c3   : > { %v444_v58 = vpack.c.bf16 %v443_v57, %v443_v57 }
 0x1c5   : > { %521 = vmatmul.bf16.vlgmr.msra.gmra.mxu1 %v444_v58 }
 0x242   : > { %v522_v60 = vpop.f32.mrf.mxu1 }
 0x243   : > { %v523_v61 = vadd.f32 %v732_v59, %v522_v60 }
 0x245   : > { %v526_v62 = vmul.f32 0.5, %v523_v61 }
 0x247   : > { %v527_v63 = vadd.f32 %v526_v62, %v894_v0 }
 0x249   : > { %528 = vst [vmem:[%s307_s9] sm:$0xff] %v527_v63 }
 0x24a   : > { %v524_v1 = vpop.f32.mrf.mxu1 }
 0x24b PF: > { %s19_s24 = sadd.s32 1, %s813_s24  }
 0x24c   : > { %p16_p7 = scmp.ge.s32.totalorder %s19_s24, 4  }
 0x24e   :  { %18 = sbr.rel (!%p16_p7) target bundleno = 2 (0x2), region = 87 }
 0x253   :  { %548 = vsyncpa [#allocation3], 1 }
 0x254   :  { %550 = vsyncpa [#allocation3 + $0x1], 1 }
 0x255   :  { %551 = vsyncpa [#allocation5], 1 }

// kernel: conformer_forward.10
= control target key start
LH: loop header
LB: loop body
LE: loop exit
PB: predicated region body
PF: predicated region fallthrough
CT: control target
= control target key end

     0   :  { %s2519_s0 = inlined_call_operand.vmem [shape: f32[16,128], index: 0, kind: input, shape index: {}]   ;;  %s2520_s1 = inlined_call_operand.vmem [shape: f32[1,128], index: 1, kind: input, shape index: {}]   ;;  %s2521_s2 = inlined_call_operand.vmem [shape: f32[1,128], index: 2, kind: input, shape index: {}]   ;;  %s2522_s3 = inlined_call_operand.vmem [shape: bf16[128,384], index: 3, kind: input, shape index: {}]   ;;  %s2523_s4 = inlined_call_operand.vmem [shape: f32[1,384], index: 4, kind: input, shape index: {}]   ;;  %s2524_s5 = inlined_call_operand.hbm [shape: bf16[128,128], index: 5, kind: input, shape index: {}]   ;;  %s2525_s6 = inlined_call_operand.vmem [shape: f32[1,128], index: 6, kind: input, shape index: {}]   ;;  %s2526_s7 = inlined_call_operand.vmem [shape: f32[1,128], index: 7, kind: input, shape index: {}]   ;;  %s2527_s8 = inlined_call_operand.vmem [shape: f32[1,128], index: 8, kind: input, shape index: {}]   ;;  %s2528_s9 = inlined_call_operand.vmem [shape: bf16[128,256], index: 9, kind: input, shape index: {}]   ;;  %s2529_s10 = inlined_call_operand.vmem [shape: f32[1,256], index: 10, kind: input, shape index: {}]   ;;  %s2530_s11 = inlined_call_operand.vmem [shape: f32[7,128], index: 11, kind: input, shape index: {}]   ;;  %s2531_s12 = inlined_call_operand.vmem [shape: f32[1,128], index: 12, kind: input, shape index: {}]   ;;  %s2532_s13 = inlined_call_operand.vmem [shape: f32[1,128], index: 13, kind: input, shape index: {}]   ;;  %s2533_s14 = inlined_call_operand.hbm [shape: bf16[128,128], index: 14, kind: input, shape index: {}]   ;;  %s2534_s15 = inlined_call_operand.vmem [shape: f32[1,128], index: 15, kind: input, shape index: {}]   ;;  %s2535_s16 = inlined_call_operand.vmem [shape: f32[16,128], index: 16, kind: output, shape index: {}]  }
   0x1   :  { %2536 = sst [smem:[#allocation10_spill]] %s2519_s0 }
   0x2   :  { %21 = vsyncpa [#allocation5], 0 }
   0x3   :  { %22 = vsyncpa [#allocation7], 0  ;;  %s2133_s21 = smov 0  }
   0x4 LB: > { %s423_s24 = sshll.u32 %s2524_s5, 4  ;;  %s1584_s25 = sadd.s32 4294967295, %s2035_s21   ;;  %s2035_s21 = sphi %s2133_s21, %s28_s21   ;;  %s424_s24 = int_to_ptr.hbm [resolvable:$true] %s423_s24 }
   0x5   : > { %p1586_p0 = scmp.ge.s32.totalorder %s2035_s21, 1  ;;  %p400_p1 = scmp.lt.s32.totalorder %s2035_s21, 3 }
   0x6   : > { %p1902_p2 = scmp.eq.s32.totalorder %s1584_s25, 0  ;;  %s2037_s27 = smov [#allocation4]  }
   0x7   : > { %p2144_p3 = pnand %p1586_p0, %p400_p1  ;;  %s425_s28 = sshll.u32 %s2037_s27, 4  ;;  %s426_s28 = int_to_ptr.vmem [resolvable:$true] %s425_s28 }
   0x8   : > { %s461_s0 = sshll.u32 %s2533_s14, 4  ;;  %s2038_s17 = smov [#allocation6]   ;;  %s462_s0 = int_to_ptr.hbm [resolvable:$true] %s461_s0 }
   0x9   : > { %p1895_p4 = pneg %p2144_p3  ;;  %s463_s18 = sshll.u32 %s2038_s17, 4  ;;  %s464_s18 = int_to_ptr.vmem [resolvable:$true] %s463_s18 }
   0xa   : > { %s2039_s19 = smov 64   ;;  %s2040_s20 = smov 4  }
   0xb   : > { %p1896_p5 = pnand %p1902_p2, %p1895_p4  ;;  %489 = sbr.rel (%p2144_p3) target bundleno = 2257 (0x8d1), region = 84 }
   0xd   : > { %1898 = dma.hbm_to_vmem [thread:$0]  (!%p1896_p5), %s424_s24, 1024, %s426_s28, [#allocation5], %s2039_s19, %s2039_s19, %s2040_s20  }
   0xe   : > { %1901 = dma.hbm_to_vmem [thread:$0]  (!%p1896_p5), %s462_s0, 1024, %s464_s18, [#allocation7], %s2039_s19, %s2039_s19, %s2040_s20  }
  0x10   : > { %2026 = dma.done.wait (%p1902_p2), [#allocation5], 1024  }
  0x11   : > { %2028 = vsyncadd (%p1902_p2), [#allocation5], 4294966272 }
  0x12   : > { %2030 = dma.done.wait (%p1902_p2), [#allocation7], 1024  }
  0x13   : > { %2032 = vsyncadd (%p1902_p2), [#allocation7], 4294966272  ;;  %p543_p6 = scmp.lt.s32.totalorder %s1584_s25, 1  ;;  %s2538_s27 = sld [smem:[#allocation10_spill]]  ;;  %v1681_v5 = vld [vmem:[%s2522_s3 + $0xa8] sm:$0xf] }
  0x14   : > { %v1853_v6 = vld [vmem:[%s2522_s3 + $0xb0] sm:$0xf0]  ;;  %v1852_v7 = vld [vmem:[%s2522_s3 + $0xac] sm:$0xf]  ;;  %v1683_v9 = vld [vmem:[%s2522_s3 + $0xb4] sm:$0xf0] }
  0x15   : > { %s2540_s25 = smov (!%p543_p6, %s1584_s25), 1  ;;  %v1682_v8 = vor.u32 %v1853_v6, %v1681_v5  ;;  %v1689_v10 = vld [vmem:[%s2522_s3 + $0xb0] sm:$0xf]  ;;  %v1854_v11 = vld [vmem:[%s2522_s3 + $0xb8] sm:$0xf0]  ;;  %v1686_v12 = vor.u32 %v1852_v7, %v1683_v9  ;;  %vm799_vm3 = vcmask 64512  }
  0x16   : > { %s1593_s22 = sshll.u32 %s2540_s25, 3  ;;  %v1690_v13 = vor.u32 %v1854_v11, %v1689_v10  ;;  %v1669_v14 = vld [vmem:[%s2522_s3 + $0x90] sm:$0xf]  ;;  %v1850_v15 = vld [vmem:[%s2522_s3 + $0x98] sm:$0xf0]  ;;  %s2041_s19 = smov 112  }
  0x17   : > { %755 = vmatpush.bf16.msra.mxu0 %v1682_v8  ;;  %768 = vmatpush.bf16.msra.mxu1 %v1686_v12  ;;  %v1849_v16 = vld [vmem:[%s2522_s3 + $0x94] sm:$0xf]  ;;  %v1670_v17 = vor.u32 %v1850_v15, %v1669_v14  ;;  %v1671_v18 = vld [vmem:[%s2522_s3 + $0x9c] sm:$0xf0]  ;;  %v1677_v19 = vld [vmem:[%s2522_s3 + $0x98] sm:$0xf] }
  0x18   : > { %781 = vmatpush.bf16.msra.mxu2 %v1690_v13  ;;  %v1851_v20 = vld [vmem:[%s2522_s3 + $0xa0] sm:$0xf0]  ;;  %v1674_v21 = vor.u32 %v1849_v16, %v1671_v18  ;;  %v1657_v23 = vld [vmem:[%s2522_s3 + $0x78] sm:$0xf]  ;;  %v1846_v25 = vld [vmem:[%s2522_s3 + $0x7c] sm:$0xf] }
  0x19   : > { %s546_s26 = scalar_lea.vmem %s2538_s27, %s1593_s22  ;;  %v1678_v22 = vor.u32 %v1851_v20, %v1677_v19  ;;  %v1847_v24 = vld [vmem:[%s2522_s3 + $0x80] sm:$0xf0]  ;;  %v1659_v27 = vld [vmem:[%s2522_s3 + $0x84] sm:$0xf0]  ;;  %v1665_v28 = vld [vmem:[%s2522_s3 + $0x80] sm:$0xf] }
  0x1a   : > { %v2168_v0 = vld [vmem:[%s546_s26] sm:$0xff]  ;;  %v1658_v26 = vor.u32 %v1847_v24, %v1657_v23  ;;  %v1848_v29 = vld [vmem:[%s2522_s3 + $0x88] sm:$0xf0]  ;;  %v1662_v30 = vor.u32 %v1846_v25, %v1659_v27  ;;  %v1647_v36 = vld [vmem:[%s2522_s3 + $0x6c] sm:$0xf0]  ;;  %s2042_s20 = smov 120  }
  0x1b   : > { %555 = vadd.xlane.f32.xlu0 %v2168_v0  ;;  %756 = vmatpush.bf16.msra.mxu0 %v1670_v17  ;;  %v1666_v31 = vor.u32 %v1848_v29, %v1665_v28  ;;  %v1645_v32 = vld [vmem:[%s2522_s3 + $0x60] sm:$0xf]  ;;  %v1844_v33 = vld [vmem:[%s2522_s3 + $0x68] sm:$0xf0]  ;;  %v1843_v34 = vld [vmem:[%s2522_s3 + $0x64] sm:$0xf] }
  0x1c   : > { %769 = vmatpush.bf16.msra.mxu1 %v1674_v21  ;;  %782 = vmatpush.bf16.msra.mxu2 %v1678_v22  ;;  %v1646_v35 = vor.u32 %v1844_v33, %v1645_v32  ;;  %v1653_v37 = vld [vmem:[%s2522_s3 + $0x68] sm:$0xf]  ;;  %v1845_v38 = vld [vmem:[%s2522_s3 + $0x70] sm:$0xf0]  ;;  %v1650_v39 = vor.u32 %v1843_v34, %v1647_v36  ;;  %v1840_v43 = vld [vmem:[%s2522_s3 + $0x4c] sm:$0xf] }
  0x1d   : > { %v1654_v40 = vor.u32 %v1845_v38, %v1653_v37  ;;  %v1633_v41 = vld [vmem:[%s2522_s3 + $0x48] sm:$0xf]  ;;  %v1841_v42 = vld [vmem:[%s2522_s3 + $0x50] sm:$0xf0]  ;;  %v1635_v45 = vld [vmem:[%s2522_s3 + $0x54] sm:$0xf0] }
  0x1e   : > { %v1634_v44 = vor.u32 %v1841_v42, %v1633_v41  ;;  %v1641_v46 = vld [vmem:[%s2522_s3 + $0x50] sm:$0xf]  ;;  %v1842_v47 = vld [vmem:[%s2522_s3 + $0x58] sm:$0xf0]  ;;  %v1638_v48 = vor.u32 %v1840_v43, %v1635_v45  ;;  %v1837_v52 = vld [vmem:[%s2522_s3 + $0x34] sm:$0xf] }
  0x1f   : > { %757 = vmatpush.bf16.msra.mxu0 %v1658_v26  ;;  %v1642_v49 = vor.u32 %v1842_v47, %v1641_v46  ;;  %v1621_v50 = vld [vmem:[%s2522_s3 + $0x30] sm:$0xf]  ;;  %v1838_v51 = vld [vmem:[%s2522_s3 + $0x38] sm:$0xf0]  ;;  %v1623_v54 = vld [vmem:[%s2522_s3 + $0x3c] sm:$0xf0] }
  0x20   : > { %770 = vmatpush.bf16.msra.mxu1 %v1662_v30  ;;  %783 = vmatpush.bf16.msra.mxu2 %v1666_v31  ;;  %v1622_v53 = vor.u32 %v1838_v51, %v1621_v50  ;;  %v1629_v55 = vld [vmem:[%s2522_s3 + $0x38] sm:$0xf]  ;;  %v1839_v56 = vld [vmem:[%s2522_s3 + $0x40] sm:$0xf0]  ;;  %v1626_v57 = vor.u32 %v1837_v52, %v1623_v54  ;;  %v1834_v61 = vld [vmem:[%s2522_s3 + $0x1c] sm:$0xf] }
  0x21   : > { %v1630_v58 = vor.u32 %v1839_v56, %v1629_v55  ;;  %v1609_v59 = vld [vmem:[%s2522_s3 + $0x18] sm:$0xf]  ;;  %v1835_v60 = vld [vmem:[%s2522_s3 + $0x20] sm:$0xf0]  ;;  %v1611_v63 = vld [vmem:[%s2522_s3 + $0x24] sm:$0xf0] }
  0x22   : > { %v1610_v62 = vor.u32 %v1835_v60, %v1609_v59  ;;  %v1614_v5 = vor.u32 %v1834_v61, %v1611_v63  ;;  %v1597_v7 = vld [vmem:[%s2522_s3] sm:$0xf]  ;;  %v1832_v8 = vld [vmem:[%s2522_s3 + $0x8] sm:$0xf0]  ;;  %v1831_v9 = vld [vmem:[%s2522_s3 + $0x4] sm:$0xf] }
  0x23   : > { %758 = vmatpush.bf16.msra.mxu0 %v1646_v35  ;;  %v1598_v10 = vor.u32 %v1832_v8, %v1597_v7  ;;  %v1599_v11 = vld [vmem:[%s2522_s3 + $0xc] sm:$0xf0]  ;;  %v1605_v12 = vld [vmem:[%s2522_s3 + $0x8] sm:$0xf]  ;;  %v1833_v13 = vld [vmem:[%s2522_s3 + $0x10] sm:$0xf0] }
  0x24   : > { %771 = vmatpush.bf16.msra.mxu1 %v1650_v39  ;;  %784 = vmatpush.bf16.msra.mxu2 %v1654_v40  ;;  %v1602_v15 = vor.u32 %v1831_v9, %v1599_v11  ;;  %v1606_v16 = vor.u32 %v1833_v13, %v1605_v12  ;;  %v1926_v30 = vld [vmem:[%s2521_s2] ss:$0 sm:$0xff]  ;;  %vm848_vm4 = vcmask 1043456   ;;  %s2043_s23 = smov 104   ;;  %vm794_vm9 = vcmask 1047808   ;;  %s2045_s24 = smov 16  }
  0x25   : > { %v619_v34 = vld [vmem:[%s2523_s4] sm:$0x7]  ;;  %s2046_s27 = smov 8   ;;  %s2047_s26 = smov 24  }
  0x26   : > { %v622_v35 = vperm.slane %v619_v34, 1  ;;  %v623_v40 = vperm.slane %v619_v34, 2 }
  0x27   : > { %759 = vmatpush.bf16.msra.mxu0 %v1634_v44 }
  0x28   : > { %772 = vmatpush.bf16.msra.mxu1 %v1638_v48  ;;  %785 = vmatpush.bf16.msra.mxu2 %v1642_v49 }
  0x2b   : > { %760 = vmatpush.bf16.msra.mxu0 %v1622_v53 }
  0x2c   : > { %773 = vmatpush.bf16.msra.mxu1 %v1626_v57  ;;  %786 = vmatpush.bf16.msra.mxu2 %v1630_v58 }
  0x2f   : > { %761 = vmatpush.bf16.msra.mxu0 %v1610_v62 }
  0x30   : > { %774 = vmatpush.bf16.msra.mxu1 %v1614_v5 }
  0x33   : > { %762 = vmatpush.bf16.msra.mxu0 %v1598_v10 }
  0x34   : > { %775 = vmatpush.bf16.msra.mxu1 %v1602_v15 }
  0x8e   : > { %v556_v1 = vpop.xlane.xlu0 %555 }
  0x8f   : > { %v2171_v2 = vmul.f32 0.03125, %v556_v1  ;;  %v1617_v1 = vld [vmem:[%s2522_s3 + $0x20] sm:$0xf] }
  0x91   : > { %v2175_v3 = vsub.f32 %v2168_v0, %v2171_v2  ;;  %v562_v14 = vmul.f32 96.0, %v2171_v2 }
  0x93   : > { %v559_v4 = vmul.f32 %v2175_v3, %v2175_v3  ;;  %v563_v17 = vmul.f32 %v562_v14, %v2171_v2  ;;  %v1925_v2 = vld [vmem:[%s2520_s1] ss:$0 sm:$0xff] }
  0x95   : > { %560 = vadd.xlane.f32.xlu0 %v559_v4  ;;  %v1836_v4 = vld [vmem:[%s2522_s3 + $0x28] sm:$0xf0] }
  0x96   : > { %v1618_v6 = vor.u32 %v1836_v4, %v1617_v1 }
  0x98   : > { %787 = vmatpush.bf16.msra.mxu2 %v1618_v6 }
  0x9c   : > { %788 = vmatpush.bf16.msra.mxu2 %v1606_v16 }
 0x108   : > { %v561_v18 = vpop.xlane.xlu0 %560 }
 0x109   : > { %v564_v19 = vsub.f32 %v561_v18, %v563_v17 }
 0x10b   : > { %v565_v20 = vmul.f32 0.03125, %v564_v19 }
 0x10d   : > { %v566_v21 = vadd.f32 1e-05, %v565_v20 }
 0x10f   : > { %1933 = vrsqrt.f32 %v566_v21  ;;  %vm573_vm1 = vweird.f32 %v566_v21 }
 0x115   : > { %v1934_v22 = vpop.eup %1933 }
 0x116   : > { %v568_v23 = vmul.f32 %v1934_v22, %v566_v21  ;;  %vm574_vm0 = vweird.f32 %v1934_v22 }
 0x117   : > { %vm575_vm2 = vmor %vm573_vm1, %vm574_vm0 }
 0x118   : > { %v569_v24 = vmul.f32 %v1934_v22, %v568_v23 }
 0x11a   : > { %v570_v25 = vmul.f32 0.5, %v569_v24 }
 0x11c   : > { %v571_v26 = vsub.f32 1.5, %v570_v25 }
 0x11e   : > { %v572_v27 = vmul.f32 %v1934_v22, %v571_v26 }
 0x120   : > { %v576_v28 = vsel %vm575_vm2, %v1934_v22, %v572_v27 }
 0x121   : > { %v577_v29 = vmul.f32 %v576_v28, %v2175_v3  ;;  %v621_v3 = vperm.slane %v619_v34, 0 }
 0x123   : > { %v581_v31 = vmul.f32 %v1925_v2, %v577_v29  ;;  %v2044_v2 = vmov 0.0  }
 0x124   : > { %795 = vst.msk [vmem:[#allocation2] sm:$0xff] %vm794_vm9, %v2044_v2 }
 0x125   : > { %v585_v32 = vadd.f32 %v1926_v30, %v581_v31  ;;  %1363 = vst [vmem:[#allocation3] sm:$0x7] %v2044_v2 }
 0x126   : > { %1364 = vst [vmem:[#allocation3 + $0xb] sm:$0x7] %v2044_v2 }
 0x127   : > { %v586_v33 = vpack.c.bf16 %v585_v32, %v585_v32 }
 0x129   : > { %763 = vmatmul.bf16.vlgmr.msra.gmra.mxu0 %v586_v33  ;;  %776 = vmatmul.bf16.vlgmr.msra.gmra.mxu1 %v586_v33 }
 0x12a   : > { %789 = vmatmul.bf16.vlgmr.msra.gmra.mxu2 %v586_v33 }
 0x1a6   : > { %v764_v36 = vpop.f32.mrf.mxu0  ;;  %v777_v37 = vpop.f32.mrf.mxu1 }
 0x1a7   : > { %v778_v38 = vadd.f32 %v777_v37, %v622_v35  ;;  %v765_v42 = vadd.f32 %v764_v36, %v621_v3 }
 0x1a9   : > { %v797_v39 = vpack.c.bf16 %v778_v38, %v778_v38  ;;  %v796_v48 = vpack.c.bf16 %v765_v42, %v765_v42 }
 0x1ab   : > { %947 = vrot.lane.b32.xlu0 %v797_v39, %s2041_s19  ;;  %870 = vrot.lane.b32.xlu2 %v797_v39, %s2042_s20  ;;  %v804_v41 = vsel %vm799_vm3, %v797_v39, 0 }
 0x1ac   : > { %813 = vmatpush.bf16.xpose.msra.mxu3 %v804_v41 }
 0x1ad   : > { %v790_v43 = vpop.f32.mrf.mxu2 }
 0x1ae   : > { %v791_v44 = vadd.f32 %v790_v43, %v623_v40  ;;  %v766_v45 = vpop.f32.mrf.mxu0  ;;  %v779_v46 = vpop.f32.mrf.mxu1 }
 0x1b0   : > { %v2338_v47 = vpack.c.bf16 %v791_v44, %v791_v44 }
 0x1b2   : > { %v850_v49 = vsel %vm848_vm4, %v2338_v47, 0 }
 0x1b3   : > { %867 = vrot.lane.b32.xlu2 %v796_v48, %s2042_s20  ;;  %1691 = vmatmul.msk.bf16.vlgmr.msra.gmra.mxu3 %vm799_vm3, %v796_v48 }
 0x1b4   : > { %859 = vmatpush.bf16.msrb.mxu3 %v850_v49 }
 0x1b5   : > { %v792_v50 = vpop.f32.mrf.mxu2 }
 0x1bb   : > { %945 = vrot.lane.b32.xlu2 %v796_v48, %s2041_s19 }
 0x1c3   : > { %1021 = vrot.lane.b32.xlu2 %v796_v48, %s2043_s23 }
 0x205   : > { %v871_v51 = vpop.permute.xlu2 %870 }
 0x206   : > { %v876_v52 = vsel %vm799_vm3, %v871_v51, 0 }
 0x207   : > { %885 = vmatpush.bf16.xpose.msra.mxu3 %v876_v52 }
 0x20d   : > { %v868_v53 = vpop.permute.xlu2 %867 }
 0x215   : > { %v946_v56 = vpop.permute.xlu2 %945 }
 0x21d   : > { %v948_v54 = vpop.permute.xlu0 %947  ;;  %v1022_v27 = vpop.permute.xlu2 %1021 }
 0x21e   : > { %v953_v55 = vsel %vm799_vm3, %v948_v54, 0 }
 0x21f   : > { %962 = vmatpush.bf16.xpose.msrb.mxu1 %v953_v55 }
 0x226   : > { %1695 = vmatmul.msk.bf16.vlgmr.msrb.gmra.mxu1 %vm799_vm3, %v946_v56 }
 0x236   : > { %v815_v57 = vpop.f32.mrf.mxu3 }
 0x237   : > { %v819_v58 = vsel %vm799_vm3, %v815_v57, -inf }
 0x238   : > { %820 = vmax.xlane.f32.xlu1 %v819_v58 }
 0x23e   : > { %v817_v59 = vpop.f32.mrf.mxu3 }
 0x2a3   : > { %v964_v60 = vpop.f32.mrf.mxu1 }
 0x2a4   : > { %v968_v61 = vsel %vm799_vm3, %v964_v60, -inf }
 0x2a5   : > { %969 = vmax.xlane.f32.xlu0 %v968_v61 }
 0x2ab   : > { %v966_v62 = vpop.f32.mrf.mxu1  ;;  %v821_v63 = vpop.xlane.xlu1 %820 }
 0x2ac   : > { %v822_v1 = vsub.f32 %v815_v57, %v821_v63 }
 0x2ae   : > { %v823_v4 = vmul.f32 1.442695, %v822_v1 }
 0x2b0   : > { %1935 = vpow2.f32 %v823_v4 }
 0x2b6   : > { %v1936_v5 = vpop.eup %1935 }
 0x2b7   : > { %v825_v6 = vsel %vm799_vm3, %v1936_v5, 0.0 }
 0x2b8   : > { %826 = vadd.xlane.f32.xlu1 %v825_v6 }
 0x2d1   : > { %1023 = vrot.lane.b32.xlu1 %v797_v39, %s2043_s23 }
 0x318   : > { %v970_v7 = vpop.xlane.xlu0 %969 }
 0x319   : > { %v971_v8 = vsub.f32 %v964_v60, %v970_v7 }
 0x31b   : > { %v972_v9 = vmul.f32 1.442695, %v971_v8 }
 0x31d   : > { %1937 = vpow2.f32 %v972_v9 }
 0x323   : > { %v1938_v10 = vpop.eup %1937 }
 0x324   : > { %v974_v11 = vsel %vm799_vm3, %v1938_v10, 0.0 }
 0x325   : > { %975 = vadd.xlane.f32.xlu0 %v974_v11 }
 0x32b   : > { %v827_v12 = vpop.xlane.xlu1 %826 }
 0x32c   : > { %1939 = vrcp.f32 %v827_v12  ;;  %v839_v16 = vand.u32 2147483648, %v827_v12  ;;  %v837_v18 = vand.u32 2147483647, %v827_v12  ;;  %vm833_vm6 = vweird.f32 %v827_v12 }
 0x32e   : > { %v840_v20 = vor.u32 1.1754944e-38, %v839_v16  ;;  %vm838_vm8 = vcmp.eq.f32.partialorder %v837_v18, 8.507059e+37 }
 0x332   : > { %v1940_v13 = vpop.eup %1939 }
 0x333   : > { %v829_v14 = vmul.f32 %v1940_v13, %v827_v12  ;;  %vm834_vm5 = vweird.f32 %v1940_v13 }
 0x334   : > { %vm835_vm7 = vmor %vm833_vm6, %vm834_vm5 }
 0x335   : > { %v830_v15 = vsub.f32 1.0, %v829_v14 }
 0x337   : > { %v831_v17 = vmul.f32 %v1940_v13, %v830_v15 }
 0x339   : > { %994 = vrot.lane.b32.xlu0 %v2338_v47, %s2041_s19  ;;  %v832_v19 = vadd.f32 %v1940_v13, %v831_v17 }
 0x33b   : > { %v836_v21 = vsel %vm835_vm7, %v1940_v13, %v832_v19 }
 0x33c   : > { %v841_v22 = vsel %vm838_vm8, %v840_v20, %v836_v21  ;;  %vm1095_vm8 = vcmask 261312  }
 0x33d   : > { %v843_v23 = vmul.f32 %v1936_v5, %v841_v22 }
 0x33f   : > { %v844_v24 = vpack.c.bf16 %v843_v23, %v843_v23 }
 0x341   : > { %1692 = vmatmul.msk.bf16.vlgmr.msrb.gmra.mxu3 %vm799_vm3, %v844_v24 }
 0x343   : > { %v1024_v25 = vpop.permute.xlu1 %1023 }
 0x344   : > { %v1029_v26 = vsel %vm799_vm3, %v1024_v25, 0 }
 0x345   : > { %1038 = vmatpush.bf16.xpose.msrb.mxu3 %v1029_v26 }
 0x351   : > { %1693 = vmatmul.msk.bf16.vlgmr.msra.gmra.mxu3 %vm799_vm3, %v868_v53 }
 0x361   : > { %1697 = vmatmul.msk.bf16.vlgmr.msrb.gmra.mxu3 %vm799_vm3, %v1022_v27 }
 0x398   : > { %v976_v28 = vpop.xlane.xlu0 %975 }
 0x399   : > { %1941 = vrcp.f32 %v976_v28  ;;  %v988_v32 = vand.u32 2147483648, %v976_v28  ;;  %v986_v34 = vand.u32 2147483647, %v976_v28  ;;  %vm982_vm11 = vweird.f32 %v976_v28 }
 0x39b   : > { %v989_v36 = vor.u32 1.1754944e-38, %v988_v32  ;;  %vm987_vm13 = vcmp.eq.f32.partialorder %v986_v34, 8.507059e+37  ;;  %v1860_v32 = vld [vmem:[#allocation4 + $0x28] sm:$0xff] }
 0x39f   : > { %v1942_v29 = vpop.eup %1941 }
 0x3a0   : > { %v978_v30 = vmul.f32 %v1942_v29, %v976_v28  ;;  %vm983_vm10 = vweird.f32 %v1942_v29 }
 0x3a1   : > { %vm984_vm12 = vmor %vm982_vm11, %vm983_vm10 }
 0x3a2   : > { %v979_v31 = vsub.f32 1.0, %v978_v30  ;;  %v1862_v30 = vld [vmem:[#allocation4 + $0x38] sm:$0xff] }
 0x3a3   : > { %1167 = vmatpush.bf16.msra.mxu1 %v1862_v30  ;;  %v1865_v30 = vld [vmem:[%s2528_s9 + $0x14] sm:$0xf] }
 0x3a4   : > { %v980_v33 = vmul.f32 %v1942_v29, %v979_v31  ;;  %v1861_v31 = vld [vmem:[#allocation4 + $0x30] sm:$0xff] }
 0x3a6   : > { %v981_v35 = vadd.f32 %v1942_v29, %v980_v33 }
 0x3a7   : > { %1168 = vmatpush.bf16.msra.mxu1 %v1861_v31 }
 0x3a8   : > { %v985_v37 = vsel %vm984_vm12, %v1942_v29, %v981_v35 }
 0x3a9   : > { %v990_v38 = vsel %vm987_vm13, %v989_v36, %v985_v37  ;;  %v1859_v37 = vld [vmem:[#allocation4 + $0x20] sm:$0xff] }
 0x3aa   : > { %v992_v3 = vmul.f32 %v1938_v10, %v990_v38  ;;  %v1858_v38 = vld [vmem:[#allocation4 + $0x18] sm:$0xff] }
 0x3ab   : > { %v995_v39 = vpop.permute.xlu0 %994  ;;  %1169 = vmatpush.bf16.msra.mxu1 %v1860_v32  ;;  %v1743_v32 = vld [vmem:[%s2528_s9 + $0x18] sm:$0xf0] }
 0x3ac   : > { %v1000_v40 = vsel %vm848_vm4, %v995_v39, 0  ;;  %v993_v41 = vpack.c.bf16 %v992_v3, %v992_v3  ;;  %v1857_v3 = vld [vmem:[#allocation4 + $0x10] sm:$0xff]  ;;  %v1856_v39 = vld [vmem:[#allocation4 + $0x8] sm:$0xff] }
 0x3ad   : > { %1009 = vmatpush.bf16.msrb.mxu2 %v1000_v40  ;;  %v1855_v40 = vld [vmem:[#allocation4] sm:$0xff] }
 0x3af   : > { %1170 = vmatpush.bf16.msra.mxu1 %v1859_v37 }
 0x3b0   : > { %1696 = vmatmul.msk.bf16.vlgmr.msrb.gmra.mxu2 %vm799_vm3, %v993_v41 }
 0x3b3   : > { %1171 = vmatpush.bf16.msra.mxu1 %v1858_v38  ;;  %v1735_v38 = vld [vmem:[%s2528_s9 + $0x8] sm:$0xf0] }
 0x3b7   : > { %1172 = vmatpush.bf16.msra.mxu1 %v1857_v3 }
 0x3bb   : > { %1173 = vmatpush.bf16.msra.mxu1 %v1856_v39 }
 0x3bf   : > { %1174 = vmatpush.bf16.msra.mxu1 %v1855_v40 }
 0x3c4   : > { %v861_v42 = vpop.f32.mrf.mxu3 }
 0x3c5   : > { %865 = vst.msk [vmem:[#allocation2] sm:$0xff] %vm799_vm3, %v861_v42 }
 0x3cc   : > { %v863_v43 = vpop.f32.mrf.mxu3 }
 0x3d4   : > { %v887_v44 = vpop.f32.mrf.mxu3 }
 0x3d5   : > { %v891_v45 = vsel %vm799_vm3, %v887_v44, -inf }
 0x3d6   : > { %892 = vmax.xlane.f32.xlu2 %v891_v45 }
 0x3dc   : > { %v889_v46 = vpop.f32.mrf.mxu3 }
 0x3dd   : > { %v1927_v46 = vld [vmem:[%s2525_s6] ss:$0 sm:$0xff] }
 0x3e4   : > { %v1040_v48 = vpop.f32.mrf.mxu3 }
 0x3e5   : > { %v1044_v49 = vsel %vm799_vm3, %v1040_v48, -inf }
 0x3e6   : > { %1045 = vmax.xlane.f32.xlu1 %v1044_v49 }
 0x3ec   : > { %v1042_v50 = vpop.f32.mrf.mxu3 }
 0x3ff   : > { %918 = vrot.lane.b32.xlu1 %v2338_v47, %s2042_s20 }
 0x433   : > { %v1011_v51 = vpop.f32.mrf.mxu2 }
 0x434   : > { %1016 = vrot.lane.b32.xlu1 %v1011_v51, %s2045_s24 }
 0x43b   : > { %v1013_v52 = vpop.f32.mrf.mxu2 }
 0x449   : > { %v893_v53 = vpop.xlane.xlu2 %892 }
 0x44a   : > { %v894_v54 = vsub.f32 %v887_v44, %v893_v53 }
 0x44c   : > { %v895_v55 = vmul.f32 1.442695, %v894_v54 }
 0x44e   : > { %1943 = vpow2.f32 %v895_v55 }
 0x454   : > { %v1944_v56 = vpop.eup %1943 }
 0x455   : > { %v897_v57 = vsel %vm799_vm3, %v1944_v56, 0.0 }
 0x456   : > { %898 = vadd.xlane.f32.xlu2 %v897_v57  ;;  %v1877_v57 = vld [vmem:[%s2528_s9 + $0x74] sm:$0xf] }
 0x459   : > { %v1046_v58 = vpop.xlane.xlu1 %1045 }
 0x45a   : > { %v1047_v59 = vsub.f32 %v1040_v48, %v1046_v58 }
 0x45c   : > { %v1048_v60 = vmul.f32 1.442695, %v1047_v59  ;;  %v1791_v59 = vld [vmem:[%s2528_s9 + $0x78] sm:$0xf0] }
 0x45e   : > { %1945 = vpow2.f32 %v1048_v60  ;;  %v1794_v60 = vor.u32 %v1877_v57, %v1791_v59 }
 0x460   : > { %1330 = vmatpush.bf16.msra.mxu3 %v1794_v60  ;;  %v1231_v60 = vld [vmem:[%s2529_s10] sm:$0x3] }
 0x464   : > { %v1946_v61 = vpop.eup %1945 }
 0x465   : > { %v1050_v62 = vsel %vm799_vm3, %v1946_v61, 0.0 }
 0x466   : > { %1051 = vadd.xlane.f32.xlu2 %v1050_v62  ;;  %v1876_v62 = vld [vmem:[%s2528_s9 + $0x64] sm:$0xf0] }
 0x471   : > { %v919_v63 = vpop.permute.xlu1 %918 }
 0x472   : > { %v924_v1 = vsel %vm848_vm4, %v919_v63, 0  ;;  %v1875_v63 = vld [vmem:[%s2528_s9 + $0x64] sm:$0xf] }
 0x473   : > { %933 = vmatpush.bf16.msrb.mxu0 %v924_v1 }
 0x47e   : > { %1070 = vrot.lane.b32.xlu2 %v2338_v47, %s2043_s23 }
 0x4a6   : > { %v1017_v42 = vpop.permute.xlu1 %1016 }
 0x4c9   : > { %v899_v4 = vpop.xlane.xlu2 %898 }
 0x4ca   : > { %1947 = vrcp.f32 %v899_v4  ;;  %v911_v9 = vand.u32 2147483648, %v899_v4  ;;  %v909_v10 = vand.u32 2147483647, %v899_v4  ;;  %vm905_vm15 = vweird.f32 %v899_v4 }
 0x4cc   : > { %v912_v12 = vor.u32 1.1754944e-38, %v911_v9  ;;  %vm910_vm1 = vcmp.eq.f32.partialorder %v909_v10, 8.507059e+37  ;;  %v1775_v10 = vld [vmem:[%s2528_s9 + $0x58] sm:$0xf0] }
 0x4d0   : > { %v1948_v5 = vpop.eup %1947 }
 0x4d1   : > { %v901_v6 = vmul.f32 %v1948_v5, %v899_v4  ;;  %vm906_vm14 = vweird.f32 %v1948_v5  ;;  %v1783_v4 = vld [vmem:[%s2528_s9 + $0x68] sm:$0xf0] }
 0x4d2   : > { %vm907_vm0 = vmor %vm905_vm15, %vm906_vm14 }
 0x4d3   : > { %v902_v7 = vsub.f32 1.0, %v901_v6  ;;  %v1773_v6 = vld [vmem:[%s2528_s9 + $0x50] sm:$0xf] }
 0x4d5   : > { %v903_v8 = vmul.f32 %v1948_v5, %v902_v7  ;;  %v1874_v7 = vld [vmem:[%s2528_s9 + $0x54] sm:$0xf0] }
 0x4d6   : > { %v1774_v9 = vor.u32 %v1874_v7, %v1773_v6  ;;  %v1884_v6 = vld [vmem:[#allocation6 + $0x28] sm:$0xff] }
 0x4d7   : > { %v904_v11 = vadd.f32 %v1948_v5, %v903_v8  ;;  %v1873_v8 = vld [vmem:[%s2528_s9 + $0x54] sm:$0xf] }
 0x4d9   : > { %v1052_v13 = vpop.xlane.xlu2 %1051  ;;  %v908_v14 = vsel %vm907_vm0, %v1948_v5, %v904_v11  ;;  %v1786_v5 = vor.u32 %v1875_v63, %v1783_v4  ;;  %v1778_v11 = vor.u32 %v1873_v8, %v1775_v10  ;;  %v1886_v4 = vld [vmem:[#allocation6 + $0x38] sm:$0xff]  ;;  %v1883_v10 = vld [vmem:[#allocation6 + $0x20] sm:$0xff] }
 0x4da   : > { %1949 = vrcp.f32 %v1052_v13  ;;  %v913_v15 = vsel %vm910_vm1, %v912_v12, %v908_v14  ;;  %v1064_v22 = vand.u32 2147483648, %v1052_v13  ;;  %v1062_v24 = vand.u32 2147483647, %v1052_v13  ;;  %v1765_v12 = vld [vmem:[%s2528_s9 + $0x40] sm:$0xf] }
 0x4db   : > { %v915_v16 = vmul.f32 %v1944_v56, %v913_v15  ;;  %vm1058_vm5 = vweird.f32 %v1052_v13  ;;  %v1789_v56 = vld [vmem:[%s2528_s9 + $0x70] sm:$0xf]  ;;  %1331 = vmatpush.bf16.msra.mxu3 %v1786_v5  ;;  %v1871_v14 = vld [vmem:[%s2528_s9 + $0x44] sm:$0xf] }
 0x4dc   : > { %v1065_v26 = vor.u32 1.1754944e-38, %v1064_v22  ;;  %vm1063_vm7 = vcmp.eq.f32.partialorder %v1062_v24, 8.507059e+37  ;;  %v1868_v24 = vld [vmem:[%s2528_s9 + $0x24] sm:$0xf0] }
 0x4dd   : > { %v916_v47 = vpack.c.bf16 %v915_v16, %v915_v16  ;;  %v1767_v16 = vld [vmem:[%s2528_s9 + $0x48] sm:$0xf0] }
 0x4df   : > { %1694 = vmatmul.msk.bf16.vlgmr.msrb.gmra.mxu0 %vm799_vm3, %v916_v47  ;;  %1332 = vmatpush.bf16.msra.mxu3 %v1778_v11  ;;  %v1770_v47 = vor.u32 %v1871_v14, %v1767_v16 }
 0x4e0   : > { %v1950_v17 = vpop.eup %1949 }
 0x4e1   : > { %v1054_v18 = vmul.f32 %v1950_v17, %v1052_v13  ;;  %v1071_v19 = vpop.permute.xlu2 %1070  ;;  %vm1059_vm2 = vweird.f32 %v1950_v17  ;;  %v1872_v13 = vld [vmem:[%s2528_s9 + $0x44] sm:$0xf0] }
 0x4e2   : > { %v1076_v20 = vsel %vm848_vm4, %v1071_v19, 0  ;;  %vm1060_vm6 = vmor %vm1058_vm5, %vm1059_vm2  ;;  %vm1019_vm4 = vcmask 195712   ;;  %v1766_v15 = vor.u32 %v1872_v13, %v1765_v12  ;;  %v1869_v19 = vld [vmem:[%s2528_s9 + $0x34] sm:$0xf]  ;;  %v1881_v13 = vld [vmem:[#allocation6 + $0x10] sm:$0xff] }
 0x4e3   : > { %v1055_v21 = vsub.f32 1.0, %v1054_v18  ;;  %1085 = vmatpush.bf16.msra.mxu0 %v1076_v20  ;;  %1333 = vmatpush.bf16.msra.mxu3 %v1770_v47  ;;  %v1870_v18 = vld [vmem:[%s2528_s9 + $0x34] sm:$0xf0]  ;;  %v1882_v12 = vld [vmem:[#allocation6 + $0x18] sm:$0xff]  ;;  %v1880_v47 = vld [vmem:[#allocation6 + $0x8] sm:$0xff] }
 0x4e5   : > { %v1056_v23 = vmul.f32 %v1950_v17, %v1055_v21  ;;  %v1759_v21 = vld [vmem:[%s2528_s9 + $0x38] sm:$0xf0] }
 0x4e6   : > { %v1762_v22 = vor.u32 %v1869_v19, %v1759_v21 }
 0x4e7   : > { %v1057_v25 = vadd.f32 %v1950_v17, %v1056_v23  ;;  %v1749_v23 = vld [vmem:[%s2528_s9 + $0x20] sm:$0xf]  ;;  %1494 = vmatpush.bf16.msrb.mxu0 %v1886_v4 }
 0x4e8   : > { %1334 = vmatpush.bf16.msra.mxu3 %v1762_v22  ;;  %v1879_v22 = vld [vmem:[#allocation6] sm:$0xff] }
 0x4e9   : > { %v1061_v27 = vsel %vm1060_vm6, %v1950_v17, %v1057_v25  ;;  %v1757_v17 = vld [vmem:[%s2528_s9 + $0x30] sm:$0xf]  ;;  %v1867_v25 = vld [vmem:[%s2528_s9 + $0x24] sm:$0xf] }
 0x4ea   : > { %v1066_v2 = vsel %vm1063_vm7, %v1065_v26, %v1061_v27  ;;  %v1758_v20 = vor.u32 %v1870_v18, %v1757_v17  ;;  %v1750_v26 = vor.u32 %v1868_v24, %v1749_v23  ;;  %v1751_v27 = vld [vmem:[%s2528_s9 + $0x28] sm:$0xf0]  ;;  %v1233_v18 = vperm.slane %v1231_v60, 0 }
 0x4eb   : > { %v1068_v28 = vmul.f32 %v1946_v61, %v1066_v2  ;;  %v1781_v61 = vld [vmem:[%s2528_s9 + $0x60] sm:$0xf]  ;;  %v1754_v2 = vor.u32 %v1867_v25, %v1751_v27 }
 0x4ec   : > { %v1782_v1 = vor.u32 %v1876_v62, %v1781_v61  ;;  %v1234_v61 = vperm.slane %v1231_v60, 1 }
 0x4ed   : > { %v1069_v29 = vpack.c.bf16 %v1068_v28, %v1068_v28  ;;  %1335 = vmatpush.bf16.msra.mxu3 %v1754_v2  ;;  %v1741_v28 = vld [vmem:[%s2528_s9 + $0x10] sm:$0xf]  ;;  %v1366_v2 = vld [vmem:[%s2530_s11] sm:$0x7f] }
 0x4ef   : > { %1698 = vmatmul.msk.bf16.vlgmr.msra.gmra.mxu0 %vm799_vm3, %v1069_v29  ;;  %vm943_vm3 = vcmask 130112   ;;  %v1866_v29 = vld [vmem:[%s2528_s9 + $0x14] sm:$0xf0] }
 0x4f0   : > { %v1742_v31 = vor.u32 %v1866_v29, %v1741_v28  ;;  %v1368_v28 = vperm.slane %v1366_v2, 0  ;;  %v1372_v29 = vperm.slane %v1366_v2, 1 }
 0x55c   : > { %v935_v33 = vpop.f32.mrf.mxu0 }
 0x55d   : > { %940 = vrot.lane.b32.xlu0 %v935_v33, %s2046_s27  ;;  %v1746_v33 = vor.u32 %v1865_v30, %v1743_v32  ;;  %v1376_v30 = vperm.slane %v1366_v2, 2  ;;  %s550_s27 = scalar_lea.vmem %s2535_s16, %s1593_s22 }
 0x55f   : > { %1336 = vmatpush.bf16.msra.mxu3 %v1746_v33 }
 0x564   : > { %v937_v34 = vpop.f32.mrf.mxu0 }
 0x565   : > { %v1733_v34 = vld [vmem:[%s2528_s9] sm:$0xf] }
 0x56c   : > { %v1087_v35 = vpop.f32.mrf.mxu0 }
 0x56d   : > { %1092 = vrot.lane.b32.xlu2 %v1087_v35, %s2047_s26  ;;  %v1864_v35 = vld [vmem:[%s2528_s9 + $0x4] sm:$0xf0] }
 0x56e   : > { %v1734_v37 = vor.u32 %v1864_v35, %v1733_v34 }
 0x574   : > { %v1089_v36 = vpop.f32.mrf.mxu0 }
 0x575   : > { %v1863_v36 = vld [vmem:[%s2528_s9 + $0x4] sm:$0xf] }
 0x576   : > { %v1738_v39 = vor.u32 %v1863_v36, %v1735_v38  ;;  %v1380_v36 = vperm.slane %v1366_v2, 3 }
 0x578   : > { %1337 = vmatpush.bf16.msra.mxu3 %v1738_v39 }
 0x5c7   : > { %v1093_v43 = vpop.permute.xlu2 %1092 }
 0x5cf   : > { %v941_v41 = vpop.permute.xlu0 %940 }
 0x5d0   : > { %944 = vst.msk [vmem:[#allocation2] sm:$0xff] %vm943_vm3, %v941_v41 }
 0x5d1   : > { %1020 = vst.msk [vmem:[#allocation2] sm:$0xff] %vm1019_vm4, %v1017_v42 }
 0x5d2   : > { %1096 = vst.msk [vmem:[#allocation2] sm:$0xff] %vm1095_vm8, %v1093_v43 }
 0x5d9   : > { %v1097_v44 = vld [vmem:[#allocation2] sm:$0xff] }
 0x5da   : > { %v1098_v45 = vpack.c.bf16 %v1097_v44, %v1097_v44 }
 0x5dc   : > { %1175 = vmatmul.bf16.vlgmr.msra.gmra.mxu1 %v1098_v45 }
 0x659   : > { %v1176_v48 = vpop.f32.mrf.mxu1 }
 0x65a   : > { %v1177_v49 = vadd.f32 %v1927_v46, %v1176_v48 }
 0x65c   : > { %v2379_v50 = vadd.f32 %v1177_v49, %v2168_v0  ;;  %v1878_v0 = vld [vmem:[%s2528_s9 + $0x74] sm:$0xf0] }
 0x65d   : > { %v1790_v58 = vor.u32 %v1878_v0, %v1789_v56  ;;  %v1929_v0 = vld [vmem:[%s2527_s8] ss:$0 sm:$0xff] }
 0x65e   : > { %1183 = vadd.xlane.f32.xlu0 %v2379_v50 }
 0x65f   : > { %1317 = vmatpush.bf16.msra.mxu2 %v1790_v58 }
 0x661   : > { %v1178_v51 = vpop.f32.mrf.mxu1 }
 0x663   : > { %1318 = vmatpush.bf16.msra.mxu2 %v1782_v1 }
 0x667   : > { %1319 = vmatpush.bf16.msra.mxu2 %v1774_v9 }
 0x66b   : > { %1320 = vmatpush.bf16.msra.mxu2 %v1766_v15 }
 0x66f   : > { %1321 = vmatpush.bf16.msra.mxu2 %v1758_v20 }
 0x673   : > { %1322 = vmatpush.bf16.msra.mxu2 %v1750_v26 }
 0x677   : > { %1323 = vmatpush.bf16.msra.mxu2 %v1742_v31 }
 0x67b   : > { %1324 = vmatpush.bf16.msra.mxu2 %v1734_v37 }
 0x6d1   : > { %v1184_v52 = vpop.xlane.xlu0 %1183 }
 0x6d2   : > { %v2382_v53 = vmul.f32 0.03125, %v1184_v52 }
 0x6d4   : > { %v2386_v54 = vsub.f32 %v2379_v50, %v2382_v53  ;;  %v1190_v3 = vmul.f32 96.0, %v2382_v53 }
 0x6d6   : > { %v1187_v55 = vmul.f32 %v2386_v54, %v2386_v54  ;;  %v1191_v40 = vmul.f32 %v1190_v3, %v2382_v53  ;;  %v1384_v3 = vperm.slane %v1366_v2, 4 }
 0x6d8   : > { %1188 = vadd.xlane.f32.xlu1 %v1187_v55  ;;  %v1928_v55 = vld [vmem:[%s2526_s7] ss:$0 sm:$0xff] }
 0x74b   : > { %v1189_v41 = vpop.xlane.xlu1 %1188 }
 0x74c   : > { %v1192_v42 = vsub.f32 %v1189_v41, %v1191_v40 }
 0x74e   : > { %v1193_v43 = vmul.f32 0.03125, %v1192_v42  ;;  %v1388_v42 = vperm.slane %v1366_v2, 5 }
 0x750   : > { %v1194_v44 = vadd.f32 1e-05, %v1193_v43 }
 0x752   : > { %1951 = vrsqrt.f32 %v1194_v44  ;;  %vm1201_vm10 = vweird.f32 %v1194_v44 }
 0x758   : > { %v1952_v45 = vpop.eup %1951 }
 0x759   : > { %v1196_v46 = vmul.f32 %v1952_v45, %v1194_v44  ;;  %vm1202_vm9 = vweird.f32 %v1952_v45 }
 0x75a   : > { %vm1203_vm11 = vmor %vm1201_vm10, %vm1202_vm9 }
 0x75b   : > { %v1197_v48 = vmul.f32 %v1952_v45, %v1196_v46  ;;  %v1392_v46 = vperm.slane %v1366_v2, 6 }
 0x75d   : > { %v1198_v49 = vmul.f32 0.5, %v1197_v48 }
 0x75f   : > { %v1199_v51 = vsub.f32 1.5, %v1198_v49 }
 0x761   : > { %v1200_v52 = vmul.f32 %v1952_v45, %v1199_v51 }
 0x763   : > { %v1204_v53 = vsel %vm1203_vm11, %v1952_v45, %v1200_v52 }
 0x764   : > { %v1205_v56 = vmul.f32 %v1204_v53, %v2386_v54  ;;  %v1885_v54 = vld [vmem:[#allocation6 + $0x30] sm:$0xff]  ;;  %v1930_v53 = vld [vmem:[%s2531_s12] ss:$0 sm:$0xff] }
 0x765   : > { %1495 = vmatpush.bf16.msrb.mxu0 %v1885_v54 }
 0x766   : > { %v1209_v57 = vmul.f32 %v1928_v55, %v1205_v56 }
 0x768   : > { %v1213_v58 = vadd.f32 %v1929_v0, %v1209_v57  ;;  %v1931_v0 = vld [vmem:[%s2532_s13] ss:$0 sm:$0xff] }
 0x769   : > { %1496 = vmatpush.bf16.msrb.mxu0 %v1884_v6 }
 0x76a   : > { %v1214_v59 = vpack.c.bf16 %v1213_v58, %v1213_v58 }
 0x76c   : > { %1325 = vmatmul.bf16.vlgmr.msra.gmra.mxu2 %v1214_v59  ;;  %1338 = vmatmul.bf16.vlgmr.msra.gmra.mxu3 %v1214_v59 }
 0x76d   : > { %1497 = vmatpush.bf16.msrb.mxu0 %v1883_v10 }
 0x771   : > { %1498 = vmatpush.bf16.msrb.mxu0 %v1882_v12  ;;  %v1932_v12 = vld [vmem:[%s2534_s15] ss:$0 sm:$0xff] }
 0x775   : > { %1499 = vmatpush.bf16.msrb.mxu0 %v1881_v13 }
 0x779   : > { %1500 = vmatpush.bf16.msrb.mxu0 %v1880_v47 }
 0x77d   : > { %1501 = vmatpush.bf16.msrb.mxu0 %v1879_v22 }
 0x7ef   : > { %v1326_v62 = vpop.f32.mrf.mxu2  ;;  %v1339_v63 = vpop.f32.mrf.mxu3 }
 0x7f0   : > { %v1340_v1 = vadd.f32 %v1339_v63, %v1234_v61  ;;  %v1327_v24 = vadd.f32 %v1326_v62, %v1233_v18 }
 0x7f2   : > { %v1795_v5 = vmul.f32 -1.442695, %v1340_v1 }
 0x7f4   : > { %1953 = vpow2.f32 %v1795_v5 }
 0x7f7   : > { %v1328_v7 = vpop.f32.mrf.mxu2  ;;  %v1341_v8 = vpop.f32.mrf.mxu3 }
 0x7fa   : > { %v1954_v9 = vpop.eup %1953 }
 0x7fb   : > { %v1346_v11 = vadd.f32 1.0, %v1954_v9 }
 0x7fd   : > { %1955 = vrcp.f32 %v1346_v11  ;;  %v1358_v17 = vand.u32 2147483648, %v1346_v11  ;;  %v1356_v20 = vand.u32 2147483647, %v1346_v11  ;;  %vm1352_vm13 = vweird.f32 %v1346_v11 }
 0x7ff   : > { %v1359_v23 = vor.u32 1.1754944e-38, %v1358_v17  ;;  %vm1357_vm15 = vcmp.eq.f32.partialorder %v1356_v20, 8.507059e+37 }
 0x803   : > { %v1956_v14 = vpop.eup %1955 }
 0x804   : > { %v1348_v15 = vmul.f32 %v1956_v14, %v1346_v11  ;;  %vm1353_vm12 = vweird.f32 %v1956_v14 }
 0x805   : > { %vm1354_vm14 = vmor %vm1352_vm13, %vm1353_vm12 }
 0x806   : > { %v1349_v16 = vsub.f32 1.0, %v1348_v15 }
 0x808   : > { %v1350_v19 = vmul.f32 %v1956_v14, %v1349_v16 }
 0x80a   : > { %v1351_v21 = vadd.f32 %v1956_v14, %v1350_v19 }
 0x80c   : > { %v1355_v25 = vsel %vm1354_vm14, %v1956_v14, %v1351_v21 }
 0x80d   : > { %v1360_v26 = vsel %vm1357_vm15, %v1359_v23, %v1355_v25 }
 0x80e   : > { %v1362_v27 = vmul.f32 %v1360_v26, %v1327_v24 }
 0x810   : > { %1365 = vst [vmem:[#allocation3 + $0x3] sm:$0xff] %v1362_v27  ;;  %v1381_v41 = vmul.f32 %v1380_v36, %v1362_v27 }
 0x817   : > { %v1367_v31 = vld [vmem:[#allocation3] sm:$0xff] }
 0x818   : > { %v1371_v32 = vld [vmem:[#allocation3 + $0x1] sm:$0xff]  ;;  %v1369_v34 = vmul.f32 %v1368_v28, %v1367_v31 }
 0x819   : > { %v1375_v33 = vld [vmem:[#allocation3 + $0x2] sm:$0xff]  ;;  %v1373_v35 = vmul.f32 %v1372_v29, %v1371_v32 }
 0x81a   : > { %v1377_v38 = vmul.f32 %v1376_v30, %v1375_v33  ;;  %v1383_v39 = vld [vmem:[#allocation3 + $0x4] sm:$0xff] }
 0x81b   : > { %v1374_v37 = vadd.f32 %v1373_v35, %v1369_v34  ;;  %v1387_v43 = vld [vmem:[#allocation3 + $0x5] sm:$0xff]  ;;  %v1385_v45 = vmul.f32 %v1384_v3, %v1383_v39 }
 0x81c   : > { %v1391_v48 = vld [vmem:[#allocation3 + $0x6] sm:$0xff]  ;;  %v1389_v51 = vmul.f32 %v1388_v42, %v1387_v43 }
 0x81d   : > { %v1378_v40 = vadd.f32 %v1377_v38, %v1374_v37  ;;  %v1393_v55 = vmul.f32 %v1392_v46, %v1391_v48 }
 0x81f   : > { %v1382_v44 = vadd.f32 %v1381_v41, %v1378_v40 }
 0x821   : > { %v1386_v49 = vadd.f32 %v1385_v45, %v1382_v44 }
 0x823   : > { %v1390_v52 = vadd.f32 %v1389_v51, %v1386_v49 }
 0x825   : > { %v1394_v56 = vadd.f32 %v1393_v55, %v1390_v52 }
 0x827   : > { %v1399_v57 = vmul.f32 %v1930_v53, %v1394_v56 }
 0x829   : > { %v1404_v58 = vadd.f32 %v1931_v0, %v1399_v57 }
 0x82b   : > { %v1796_v59 = vmul.f32 -1.442695, %v1404_v58 }
 0x82d   : > { %1957 = vpow2.f32 %v1796_v59 }
 0x833   : > { %v1958_v60 = vpop.eup %1957 }
 0x834   : > { %v1408_v61 = vadd.f32 1.0, %v1958_v60 }
 0x836   : > { %1959 = vrcp.f32 %v1408_v61  ;;  %v1420_v4 = vand.u32 2147483648, %v1408_v61  ;;  %v1418_v54 = vand.u32 2147483647, %v1408_v61  ;;  %vm1414_vm1 = vweird.f32 %v1408_v61 }
 0x838   : > { %v1421_v7 = vor.u32 1.1754944e-38, %v1420_v4  ;;  %vm1419_vm5 = vcmp.eq.f32.partialorder %v1418_v54, 8.507059e+37 }
 0x83c   : > { %v1960_v62 = vpop.eup %1959 }
 0x83d   : > { %v1410_v63 = vmul.f32 %v1960_v62, %v1408_v61  ;;  %vm1415_vm0 = vweird.f32 %v1960_v62 }
 0x83e   : > { %vm1416_vm2 = vmor %vm1414_vm1, %vm1415_vm0 }
 0x83f   : > { %v1411_v1 = vsub.f32 1.0, %v1410_v63 }
 0x841   : > { %v1412_v5 = vmul.f32 %v1960_v62, %v1411_v1 }
 0x843   : > { %v1413_v6 = vadd.f32 %v1960_v62, %v1412_v5 }
 0x845   : > { %v1417_v8 = vsel %vm1416_vm2, %v1960_v62, %v1413_v6 }
 0x846   : > { %v1422_v9 = vsel %vm1419_vm5, %v1421_v7, %v1417_v8 }
 0x847   : > { %v1424_v10 = vmul.f32 %v1422_v9, %v1404_v58 }
 0x849   : > { %v1425_v11 = vpack.c.bf16 %v1424_v10, %v1424_v10 }
 0x84b   : > { %1502 = vmatmul.bf16.vlgmr.msrb.gmra.mxu0 %v1425_v11 }
 0x8c8   : > { %v1503_v13 = vpop.f32.mrf.mxu0 }
 0x8c9   : > { %v1504_v14 = vadd.f32 %v1932_v12, %v1503_v13 }
 0x8cb   : > { %v1507_v15 = vadd.f32 %v1504_v14, %v2379_v50 }
 0x8cd   : > { %1508 = vst [vmem:[%s550_s27] sm:$0xff] %v1507_v15 }
 0x8d0   : > { %v1505_v16 = vpop.f32.mrf.mxu0 }
 0x8d1 PF: > { %s28_s21 = sadd.s32 1, %s2035_s21  }
 0x8d2   : > { %p25_p7 = scmp.ge.s32.totalorder %s28_s21, 4  }
 0x8d4   :  { %27 = sbr.rel (!%p25_p7) target bundleno = 4 (0x4), region = 123 }
 0x8d9   :  { %1528 = vsyncpa [#allocation5], 1 }
 0x8da   :  { %1530 = vsyncpa [#allocation5 + $0x1], 1 }
 0x8db   :  { %1531 = vsyncpa [#allocation7], 1 }

// kernel: conformer_forward.12
= control target key start
LH: loop header
LB: loop body
LE: loop exit
PB: predicated region body
PF: predicated region fallthrough
CT: control target
= control target key end

     0   :  { %12 = vsyncpa [#allocation3], 0  ;;  %s1229_s0 = inlined_call_operand.vmem [shape: f32[16,128], index: 0, kind: input, shape index: {}]   ;;  %s1230_s1 = inlined_call_operand.hbm [shape: f32[1,128], index: 1, kind: input, shape index: {}]   ;;  %s1231_s2 = inlined_call_operand.hbm [shape: f32[1,128], index: 2, kind: input, shape index: {}]   ;;  %s1232_s3 = inlined_call_operand.hbm [shape: bf16[128,128], index: 3, kind: input, shape index: {}]   ;;  %s1233_s4 = inlined_call_operand.hbm [shape: f32[1,128], index: 4, kind: input, shape index: {}]   ;;  %s1234_s5 = inlined_call_operand.hbm [shape: bf16[128,128], index: 5, kind: input, shape index: {}]   ;;  %s1235_s6 = inlined_call_operand.hbm [shape: f32[1,128], index: 6, kind: input, shape index: {}]   ;;  %s1236_s7 = inlined_call_operand.vmem [shape: f32[16,128], index: 7, kind: output, shape index: {}]  }
   0x1   :  { %13 = vsyncpa [#allocation5], 0 }
   0x2   :  { %14 = vsyncpa [#allocation8], 0 }
   0x3   :  { %15 = vsyncpa [#allocation11], 0  ;;  %s1135_s24 = smov 0  }
   0x4 LB: > { %s228_s27 = sshll.u32 %s1231_s2, 4  ;;  %s1144_s28 = sadd.s32 4294967295, %s1085_s24   ;;  %s1085_s24 = sphi %s1135_s24, %s21_s24   ;;  %s229_s27 = int_to_ptr.hbm [resolvable:$true] %s228_s27 }
   0x5   : > { %p702_p0 = scmp.ge.s32.totalorder %s1085_s24, 1  ;;  %p204_p1 = scmp.lt.s32.totalorder %s1085_s24, 3 }
   0x6   : > { %p845_p2 = scmp.eq.s32.totalorder %s1144_s28, 0  ;;  %s1087_s30 = smov [#allocation4]  }
   0x7   : > { %p1149_p3 = pnand %p702_p0, %p204_p1  ;;  %s230_s8 = sshll.u32 %s1087_s30, 4  ;;  %s231_s8 = int_to_ptr.vmem [resolvable:$true] %s230_s8 }
   0x8   : > { %s254_s11 = sshll.u32 %s1233_s4, 4  ;;  %s216_s14 = sshll.u32 %s1230_s1, 4  ;;  %s255_s11 = int_to_ptr.hbm [resolvable:$true] %s254_s11  ;;  %s217_s14 = int_to_ptr.hbm [resolvable:$true] %s216_s14 }
   0x9   : > { %p826_p4 = pneg %p1149_p3  ;;  %s1088_s16 = smov [#allocation7]  }
   0xa   : > { %s256_s17 = sshll.u32 %s1088_s16, 4  ;;  %s1089_s18 = smov [#allocation2]   ;;  %s257_s17 = int_to_ptr.vmem [resolvable:$true] %s256_s17 }
   0xb   : > { %p1163_p5 = pnand %p845_p2, %p826_p4  ;;  %s218_s19 = sshll.u32 %s1089_s18, 4  ;;  %s219_s19 = int_to_ptr.vmem [resolvable:$true] %s218_s19 }
   0xc   : > { %s239_s22 = sshll.u32 %s1232_s3, 4  ;;  %s1090_s23 = smov [#allocation6]   ;;  %s240_s22 = int_to_ptr.hbm [resolvable:$true] %s239_s22 }
   0xd   : > { %832 = dma.hbm_to_vmem [thread:$0]  (!%p1163_p5), %s229_s27, 16, %s231_s8, [#allocation5]  }
   0xe   : > { %838 = dma.hbm_to_vmem [thread:$0]  (!%p1163_p5), %s255_s11, 16, %s257_s17, [#allocation8]  }
   0xf   : > { %829 = dma.hbm_to_vmem [thread:$0]  (!%p1163_p5), %s217_s14, 16, %s219_s19, [#allocation3]  }
  0x10   : > { %s241_s25 = sshll.u32 %s1090_s23, 4  ;;  %s265_s27 = sshll.u32 %s1234_s5, 4  ;;  %s242_s25 = int_to_ptr.vmem [resolvable:$true] %s241_s25  ;;  %s266_s27 = int_to_ptr.hbm [resolvable:$true] %s265_s27 }
  0x11   : > { %s1091_s8 = smov 64   ;;  %s1092_s9 = smov 4  }
  0x12   : > { %835 = dma.hbm_to_vmem [thread:$0]  (!%p1163_p5), %s240_s22, 1024, %s242_s25, [#allocation5], %s1091_s8, %s1091_s8, %s1092_s9  }
  0x13   : > { %s1093_s10 = smov [#allocation9]   ;;  %s280_s16 = sshll.u32 %s1235_s6, 4  ;;  %s281_s16 = int_to_ptr.hbm [resolvable:$true] %s280_s16 }
  0x14   : > { %s267_s11 = sshll.u32 %s1093_s10, 4  ;;  %s1094_s14 = smov [#allocation10]   ;;  %s268_s11 = int_to_ptr.vmem [resolvable:$true] %s267_s11 }
  0x15   : > { %841 = dma.hbm_to_vmem [thread:$0]  (!%p1163_p5), %s266_s27, 1024, %s268_s11, [#allocation8], %s1091_s8, %s1091_s8, %s1092_s9  }
  0x16   : > { %s282_s17 = sshll.u32 %s1094_s14, 4  ;;  %302 = sbr.rel (%p1149_p3) target bundleno = 604 (0x25c), region = 48  ;;  %s283_s17 = int_to_ptr.vmem [resolvable:$true] %s282_s17 }
  0x17   : > { %844 = dma.hbm_to_vmem [thread:$0]  (!%p1163_p5), %s281_s16, 16, %s283_s17, [#allocation11]  }
  0x1b   : > { %1068 = dma.done.wait (%p845_p2), [#allocation3], 16  }
  0x1c   : > { %1070 = vsyncadd (%p845_p2), [#allocation3], 4294967280 }
  0x1d   : > { %1072 = dma.done.wait (%p845_p2), [#allocation5], 1040  }
  0x1e   : > { %1074 = vsyncadd (%p845_p2), [#allocation5], 4294966256 }
  0x1f   : > { %1076 = dma.done.wait (%p845_p2), [#allocation8], 1040  }
  0x20   : > { %1078 = vsyncadd (%p845_p2), [#allocation8], 4294966256 }
  0x21   : > { %1080 = dma.done.wait (%p845_p2), [#allocation11], 16  }
  0x22   : > { %1082 = vsyncadd (%p845_p2), [#allocation11], 4294967280  ;;  %p358_p6 = scmp.lt.s32.totalorder %s1144_s28, 1  ;;  %v793_v5 = vld [vmem:[#allocation6 + $0x38] sm:$0xff]  ;;  %v792_v6 = vld [vmem:[#allocation6 + $0x30] sm:$0xff] }
  0x23   : > { %469 = vmatpush.bf16.msra.mxu0 %v793_v5  ;;  %v791_v7 = vld [vmem:[#allocation6 + $0x28] sm:$0xff]  ;;  %v790_v8 = vld [vmem:[#allocation6 + $0x20] sm:$0xff]  ;;  %v789_v9 = vld [vmem:[#allocation6 + $0x18] sm:$0xff] }
  0x24   : > { %s1240_s28 = smov (!%p358_p6, %s1144_s28), 1  ;;  %v788_v10 = vld [vmem:[#allocation6 + $0x10] sm:$0xff]  ;;  %v787_v11 = vld [vmem:[#allocation6 + $0x8] sm:$0xff]  ;;  %v786_v12 = vld [vmem:[#allocation6] sm:$0xff] }
  0x25   : > { %s717_s29 = sshll.u32 %s1240_s28, 3  ;;  %v873_v25 = vld [vmem:[#allocation2] ss:$0 sm:$0xff]  ;;  %v874_v28 = vld [vmem:[#allocation4] ss:$0 sm:$0xff]  ;;  %v800_v33 = vld [vmem:[#allocation9 + $0x30] sm:$0xff] }
  0x26   : > { %s361_s19 = scalar_lea.vmem %s1229_s0, %s717_s29  ;;  %v801_v32 = vld [vmem:[#allocation9 + $0x38] sm:$0xff]  ;;  %v799_v34 = vld [vmem:[#allocation9 + $0x28] sm:$0xff]  ;;  %v798_v35 = vld [vmem:[#allocation9 + $0x20] sm:$0xff]  ;;  %s365_s22 = scalar_lea.vmem %s1236_s7, %s717_s29 }
  0x27   : > { %v1216_v0 = vld [vmem:[%s361_s19] sm:$0xff]  ;;  %470 = vmatpush.bf16.msra.mxu0 %v792_v6  ;;  %571 = vmatpush.bf16.msra.mxu1 %v801_v32  ;;  %v796_v37 = vld [vmem:[#allocation9 + $0x10] sm:$0xff]  ;;  %v795_v38 = vld [vmem:[#allocation9 + $0x8] sm:$0xff] }
  0x28   : > { %369 = vadd.xlane.f32.xlu0 %v1216_v0  ;;  %v797_v36 = vld [vmem:[#allocation9 + $0x18] sm:$0xff]  ;;  %v794_v39 = vld [vmem:[#allocation9] sm:$0xff] }
  0x29   : > { %v875_v40 = vld [vmem:[#allocation7] ss:$0 sm:$0xff]  ;;  %v876_v59 = vld [vmem:[#allocation10] ss:$0 sm:$0xff] }
  0x2b   : > { %471 = vmatpush.bf16.msra.mxu0 %v791_v7  ;;  %572 = vmatpush.bf16.msra.mxu1 %v800_v33 }
  0x2f   : > { %472 = vmatpush.bf16.msra.mxu0 %v790_v8  ;;  %573 = vmatpush.bf16.msra.mxu1 %v799_v34 }
  0x33   : > { %473 = vmatpush.bf16.msra.mxu0 %v789_v9  ;;  %574 = vmatpush.bf16.msra.mxu1 %v798_v35 }
  0x37   : > { %474 = vmatpush.bf16.msra.mxu0 %v788_v10  ;;  %575 = vmatpush.bf16.msra.mxu1 %v797_v36 }
  0x3b   : > { %475 = vmatpush.bf16.msra.mxu0 %v787_v11  ;;  %576 = vmatpush.bf16.msra.mxu1 %v796_v37 }
  0x3f   : > { %476 = vmatpush.bf16.msra.mxu0 %v786_v12  ;;  %577 = vmatpush.bf16.msra.mxu1 %v795_v38 }
  0x43   : > { %578 = vmatpush.bf16.msra.mxu1 %v794_v39 }
  0x9b   : > { %v370_v1 = vpop.xlane.xlu0 %369 }
  0x9c   : > { %v371_v2 = vmul.f32 0.03125, %v370_v1 }
  0x9e   : > { %v372_v3 = vsub.f32 %v1216_v0, %v371_v2  ;;  %v376_v13 = vmul.f32 96.0, %v371_v2 }
  0xa0   : > { %v373_v4 = vmul.f32 %v372_v3, %v372_v3  ;;  %v377_v14 = vmul.f32 %v376_v13, %v371_v2 }
  0xa2   : > { %374 = vadd.xlane.f32.xlu0 %v373_v4 }
 0x115   : > { %v375_v15 = vpop.xlane.xlu0 %374 }
 0x116   : > { %v378_v16 = vsub.f32 %v375_v15, %v377_v14 }
 0x118   : > { %v379_v17 = vmul.f32 0.03125, %v378_v16 }
 0x11a   : > { %v380_v18 = vadd.f32 1e-05, %v379_v17 }
 0x11c   : > { %877 = vrsqrt.f32 %v380_v18  ;;  %vm387_vm1 = vweird.f32 %v380_v18 }
 0x122   : > { %v878_v19 = vpop.eup %877 }
 0x123   : > { %v382_v20 = vmul.f32 %v878_v19, %v380_v18  ;;  %vm388_vm0 = vweird.f32 %v878_v19 }
 0x124   : > { %vm389_vm2 = vmor %vm387_vm1, %vm388_vm0 }
 0x125   : > { %v383_v21 = vmul.f32 %v878_v19, %v382_v20 }
 0x127   : > { %v384_v22 = vmul.f32 0.5, %v383_v21 }
 0x129   : > { %v385_v23 = vsub.f32 1.5, %v384_v22 }
 0x12b   : > { %v386_v24 = vmul.f32 %v878_v19, %v385_v23 }
 0x12d   : > { %v390_v26 = vsel %vm389_vm2, %v878_v19, %v386_v24 }
 0x12e   : > { %v391_v27 = vmul.f32 %v390_v26, %v372_v3 }
 0x130   : > { %v395_v29 = vmul.f32 %v873_v25, %v391_v27 }
 0x132   : > { %v399_v30 = vadd.f32 %v874_v28, %v395_v29 }
 0x134   : > { %v400_v31 = vpack.c.bf16 %v399_v30, %v399_v30 }
 0x136   : > { %477 = vmatmul.bf16.vlgmr.msra.gmra.mxu0 %v400_v31 }
 0x1b3   : > { %v478_v41 = vpop.f32.mrf.mxu0 }
 0x1b4   : > { %v479_v42 = vadd.f32 %v875_v40, %v478_v41 }
 0x1b6   : > { %v751_v43 = vmul.f32 -1.442695, %v479_v42 }
 0x1b8   : > { %879 = vpow2.f32 %v751_v43 }
 0x1bb   : > { %v480_v44 = vpop.f32.mrf.mxu0 }
 0x1be   : > { %v880_v45 = vpop.eup %879 }
 0x1bf   : > { %v485_v46 = vadd.f32 1.0, %v880_v45 }
 0x1c1   : > { %881 = vrcp.f32 %v485_v46  ;;  %v497_v50 = vand.u32 2147483648, %v485_v46  ;;  %v495_v52 = vand.u32 2147483647, %v485_v46  ;;  %vm491_vm4 = vweird.f32 %v485_v46 }
 0x1c3   : > { %v498_v54 = vor.u32 1.1754944e-38, %v497_v50  ;;  %vm496_vm6 = vcmp.eq.f32.partialorder %v495_v52, 8.507059e+37 }
 0x1c7   : > { %v882_v47 = vpop.eup %881 }
 0x1c8   : > { %v487_v48 = vmul.f32 %v882_v47, %v485_v46  ;;  %vm492_vm3 = vweird.f32 %v882_v47 }
 0x1c9   : > { %vm493_vm5 = vmor %vm491_vm4, %vm492_vm3 }
 0x1ca   : > { %v488_v49 = vsub.f32 1.0, %v487_v48 }
 0x1cc   : > { %v489_v51 = vmul.f32 %v882_v47, %v488_v49 }
 0x1ce   : > { %v490_v53 = vadd.f32 %v882_v47, %v489_v51 }
 0x1d0   : > { %v494_v55 = vsel %vm493_vm5, %v882_v47, %v490_v53 }
 0x1d1   : > { %v499_v56 = vsel %vm496_vm6, %v498_v54, %v494_v55 }
 0x1d2   : > { %v501_v57 = vmul.f32 %v499_v56, %v479_v42 }
 0x1d4   : > { %v502_v58 = vpack.c.bf16 %v501_v57, %v501_v57 }
 0x1d6   : > { %579 = vmatmul.bf16.vlgmr.msra.gmra.mxu1 %v502_v58 }
 0x253   : > { %v580_v60 = vpop.f32.mrf.mxu1 }
 0x254   : > { %v581_v61 = vadd.f32 %v876_v59, %v580_v60 }
 0x256   : > { %v584_v62 = vmul.f32 0.5, %v581_v61 }
 0x258   : > { %v585_v63 = vadd.f32 %v584_v62, %v1216_v0 }
 0x25a   : > { %586 = vst [vmem:[%s365_s22] sm:$0xff] %v585_v63 }
 0x25b   : > { %v582_v1 = vpop.f32.mrf.mxu1 }
 0x25c PF: > { %s21_s24 = sadd.s32 1, %s1085_s24  }
 0x25d   : > { %p18_p7 = scmp.ge.s32.totalorder %s21_s24, 4  }
 0x25f   :  { %20 = sbr.rel (!%p18_p7) target bundleno = 4 (0x4), region = 103 }
 0x264   :  { %606 = vsyncpa [#allocation3], 1 }
 0x265   :  { %608 = vsyncpa [#allocation3 + $0x1], 1 }
 0x266   :  { %609 = vsyncpa [#allocation5], 1 }
 0x267   :  { %610 = vsyncpa [#allocation8], 1 }
 0x268   :  { %611 = vsyncpa [#allocation11], 1 }

// kernel: conformer_forward.14
= control target key start
LH: loop header
LB: loop body
LE: loop exit
PB: predicated region body
PF: predicated region fallthrough
CT: control target
= control target key end

     0   :  { %14 = vsyncpa [#allocation3], 0  ;;  %s1404_s0 = inlined_call_operand.vmem [shape: f32[16,128], index: 0, kind: input, shape index: {}]   ;;  %s1405_s1 = inlined_call_operand.vmem [shape: f32[1,128], index: 1, kind: input, shape index: {}]   ;;  %s1406_s2 = inlined_call_operand.hbm [shape: f32[1,128], index: 2, kind: input, shape index: {}]   ;;  %s1407_s3 = inlined_call_operand.hbm [shape: bf16[128,128], index: 3, kind: input, shape index: {}]   ;;  %s1408_s4 = inlined_call_operand.hbm [shape: f32[1,128], index: 4, kind: input, shape index: {}]   ;;  %s1409_s5 = inlined_call_operand.hbm [shape: bf16[128,128], index: 5, kind: input, shape index: {}]   ;;  %s1410_s6 = inlined_call_operand.hbm [shape: f32[1,128], index: 6, kind: input, shape index: {}]   ;;  %s1411_s7 = inlined_call_operand.hbm [shape: f32[1,128], index: 7, kind: input, shape index: {}]   ;;  %s1412_s8 = inlined_call_operand.hbm [shape: f32[1,128], index: 8, kind: input, shape index: {}]   ;;  %s1413_s9 = inlined_call_operand.vmem [shape: f32[16,128], index: 9, kind: output, shape index: {}]  }
   0x1   :  { %15 = vsyncpa [#allocation5], 0 }
   0x2   :  { %16 = vsyncpa [#allocation8], 0 }
   0x3   :  { %17 = vsyncpa [#allocation11], 0  ;;  %s1302_s30 = smov 0  }
   0x4 LB: > { %s274_s12 = sshll.u32 %s1407_s3, 4  ;;  %s1311_s13 = sadd.s32 4294967295, %s1241_s30   ;;  %s1241_s30 = sphi %s1302_s30, %s23_s30   ;;  %s275_s12 = int_to_ptr.hbm [resolvable:$true] %s274_s12 }
   0x5   : > { %p812_p0 = scmp.ge.s32.totalorder %s1241_s30, 1  ;;  %p248_p1 = scmp.lt.s32.totalorder %s1241_s30, 3 }
   0x6   : > { %p964_p2 = scmp.eq.s32.totalorder %s1311_s13, 0  ;;  %s1243_s15 = smov [#allocation4]  }
   0x7   : > { %p1316_p3 = pnand %p812_p0, %p248_p1  ;;  %s276_s16 = sshll.u32 %s1243_s15, 4  ;;  %s277_s16 = int_to_ptr.vmem [resolvable:$true] %s276_s16 }
   0x8   : > { %s300_s19 = sshll.u32 %s1409_s5, 4  ;;  %s1244_s21 = smov [#allocation7]   ;;  %s301_s19 = int_to_ptr.hbm [resolvable:$true] %s300_s19 }
   0x9   : > { %p942_p4 = pneg %p1316_p3  ;;  %s302_s22 = sshll.u32 %s1244_s21, 4  ;;  %s303_s22 = int_to_ptr.vmem [resolvable:$true] %s302_s22 }
   0xa   : > { %s327_s25 = sshll.u32 %s1411_s7, 4  ;;  %s1245_s26 = smov 64   ;;  %s328_s25 = int_to_ptr.hbm [resolvable:$true] %s327_s25 }
   0xb   : > { %p1327_p5 = pnand %p964_p2, %p942_p4  ;;  %s1246_s27 = smov 4  }
   0xc   : > { %s1247_s28 = smov [#allocation10]   ;;  %s263_s15 = sshll.u32 %s1406_s2, 4  ;;  %s264_s15 = int_to_ptr.hbm [resolvable:$true] %s263_s15 }
   0xd   : > { %948 = dma.hbm_to_vmem [thread:$0]  (!%p1327_p5), %s275_s12, 1024, %s277_s16, [#allocation5], %s1245_s26, %s1245_s26, %s1246_s27  }
   0xe   : > { %954 = dma.hbm_to_vmem [thread:$0]  (!%p1327_p5), %s301_s19, 1024, %s303_s22, [#allocation8], %s1245_s26, %s1245_s26, %s1246_s27  }
   0xf   : > { %s329_s29 = sshll.u32 %s1247_s28, 4  ;;  %s289_s21 = sshll.u32 %s1408_s4, 4  ;;  %s330_s29 = int_to_ptr.vmem [resolvable:$true] %s329_s29  ;;  %s290_s21 = int_to_ptr.hbm [resolvable:$true] %s289_s21 }
  0x10   : > { %960 = dma.hbm_to_vmem [thread:$0]  (!%p1327_p5), %s328_s25, 16, %s330_s29, [#allocation11]  }
  0x11   : > { %s1248_s23 = smov [#allocation2]   ;;  %s1249_s16 = smov [#allocation6]  }
  0x12   : > { %s265_s12 = sshll.u32 %s1248_s23, 4  ;;  %s291_s19 = sshll.u32 %s1249_s16, 4  ;;  %s266_s12 = int_to_ptr.vmem [resolvable:$true] %s265_s12  ;;  %s292_s19 = int_to_ptr.vmem [resolvable:$true] %s291_s19 }
  0x13   : > { %945 = dma.hbm_to_vmem [thread:$0]  (!%p1327_p5), %s264_s15, 16, %s266_s12, [#allocation3]  }
  0x14   : > { %s315_s26 = sshll.u32 %s1410_s6, 4  ;;  %s339_s28 = sshll.u32 %s1412_s8, 4  ;;  %s316_s26 = int_to_ptr.hbm [resolvable:$true] %s315_s26  ;;  %s340_s28 = int_to_ptr.hbm [resolvable:$true] %s339_s28 }
  0x15   : > { %951 = dma.hbm_to_vmem [thread:$0]  (!%p1327_p5), %s290_s21, 16, %s292_s19, [#allocation5]  }
  0x16   : > { %s1250_s29 = smov [#allocation9]   ;;  %s1251_s11 = smov [#allocation12]  }
  0x17   : > { %s317_s10 = sshll.u32 %s1250_s29, 4  ;;  %s341_s15 = sshll.u32 %s1251_s11, 4  ;;  %s318_s10 = int_to_ptr.vmem [resolvable:$true] %s317_s10  ;;  %s342_s15 = int_to_ptr.vmem [resolvable:$true] %s341_s15 }
  0x18   : > { %957 = dma.hbm_to_vmem [thread:$0]  (!%p1327_p5), %s316_s26, 16, %s318_s10, [#allocation8]  }
  0x19   : > { %963 = dma.hbm_to_vmem [thread:$0]  (!%p1327_p5), %s340_s28, 16, %s342_s15, [#allocation11]  }
  0x1a   : > { %361 = sbr.rel (%p1316_p3) target bundleno = 875 (0x36b), region = 56 }
  0x1f   : > { %1224 = dma.done.wait (%p964_p2), [#allocation3], 16  }
  0x20   : > { %1226 = vsyncadd (%p964_p2), [#allocation3], 4294967280 }
  0x21   : > { %1228 = dma.done.wait (%p964_p2), [#allocation5], 1040  }
  0x22   : > { %1230 = vsyncadd (%p964_p2), [#allocation5], 4294966256 }
  0x23   : > { %1232 = dma.done.wait (%p964_p2), [#allocation8], 1040  }
  0x24   : > { %1234 = vsyncadd (%p964_p2), [#allocation8], 4294966256 }
  0x25   : > { %1236 = dma.done.wait (%p964_p2), [#allocation11], 32  }
  0x26   : > { %1238 = vsyncadd (%p964_p2), [#allocation11], 4294967264  ;;  %p426_p6 = scmp.lt.s32.totalorder %s1311_s13, 1  ;;  %v905_v5 = vld [vmem:[#allocation4 + $0x38] sm:$0xff]  ;;  %v904_v6 = vld [vmem:[#allocation4 + $0x30] sm:$0xff] }
  0x27   : > { %537 = vmatpush.bf16.msra.mxu0 %v905_v5  ;;  %v903_v7 = vld [vmem:[#allocation4 + $0x28] sm:$0xff]  ;;  %v902_v8 = vld [vmem:[#allocation4 + $0x20] sm:$0xff]  ;;  %v901_v9 = vld [vmem:[#allocation4 + $0x18] sm:$0xff] }
  0x28   : > { %s1417_s13 = smov (!%p426_p6, %s1311_s13), 1  ;;  %v900_v10 = vld [vmem:[#allocation4 + $0x10] sm:$0xff]  ;;  %v899_v11 = vld [vmem:[#allocation4 + $0x8] sm:$0xff]  ;;  %v898_v12 = vld [vmem:[#allocation4] sm:$0xff] }
  0x29   : > { %s829_s14 = sshll.u32 %s1417_s13, 3  ;;  %v995_v25 = vld [vmem:[%s1405_s1] ss:$0 sm:$0xff]  ;;  %v912_v33 = vld [vmem:[#allocation7 + $0x30] sm:$0xff]  ;;  %v911_v34 = vld [vmem:[#allocation7 + $0x28] sm:$0xff] }
  0x2a   : > { %s429_s18 = scalar_lea.vmem %s1404_s0, %s829_s14  ;;  %v996_v28 = vld [vmem:[#allocation2] ss:$0 sm:$0xff]  ;;  %v910_v35 = vld [vmem:[#allocation7 + $0x20] sm:$0xff]  ;;  %v908_v37 = vld [vmem:[#allocation7 + $0x10] sm:$0xff]  ;;  %s433_s19 = scalar_lea.vmem %s1413_s9, %s829_s14 }
  0x2b   : > { %v1388_v0 = vld [vmem:[%s429_s18] sm:$0xff]  ;;  %538 = vmatpush.bf16.msra.mxu0 %v904_v6  ;;  %v907_v38 = vld [vmem:[#allocation7 + $0x8] sm:$0xff] }
  0x2c   : > { %437 = vadd.xlane.f32.xlu0 %v1388_v0  ;;  %v913_v32 = vld [vmem:[#allocation7 + $0x38] sm:$0xff]  ;;  %v906_v39 = vld [vmem:[#allocation7] sm:$0xff] }
  0x2d   : > { %639 = vmatpush.bf16.msra.mxu1 %v913_v32  ;;  %v909_v36 = vld [vmem:[#allocation7 + $0x18] sm:$0xff]  ;;  %v998_v59 = vld [vmem:[#allocation9] ss:$0 sm:$0xff] }
  0x2e   : > { %v997_v40 = vld [vmem:[#allocation6] ss:$0 sm:$0xff] }
  0x2f   : > { %539 = vmatpush.bf16.msra.mxu0 %v903_v7 }
  0x31   : > { %640 = vmatpush.bf16.msra.mxu1 %v912_v33 }
  0x33   : > { %540 = vmatpush.bf16.msra.mxu0 %v902_v8 }
  0x35   : > { %641 = vmatpush.bf16.msra.mxu1 %v911_v34 }
  0x37   : > { %541 = vmatpush.bf16.msra.mxu0 %v901_v9 }
  0x39   : > { %642 = vmatpush.bf16.msra.mxu1 %v910_v35 }
  0x3b   : > { %542 = vmatpush.bf16.msra.mxu0 %v900_v10 }
  0x3d   : > { %643 = vmatpush.bf16.msra.mxu1 %v909_v36 }
  0x3f   : > { %543 = vmatpush.bf16.msra.mxu0 %v899_v11 }
  0x41   : > { %644 = vmatpush.bf16.msra.mxu1 %v908_v37 }
  0x43   : > { %544 = vmatpush.bf16.msra.mxu0 %v898_v12 }
  0x45   : > { %645 = vmatpush.bf16.msra.mxu1 %v907_v38 }
  0x49   : > { %646 = vmatpush.bf16.msra.mxu1 %v906_v39 }
  0x9f   : > { %v438_v1 = vpop.xlane.xlu0 %437 }
  0xa0   : > { %v439_v2 = vmul.f32 0.03125, %v438_v1 }
  0xa2   : > { %v440_v3 = vsub.f32 %v1388_v0, %v439_v2  ;;  %v444_v13 = vmul.f32 96.0, %v439_v2 }
  0xa4   : > { %v441_v4 = vmul.f32 %v440_v3, %v440_v3  ;;  %v445_v14 = vmul.f32 %v444_v13, %v439_v2 }
  0xa6   : > { %442 = vadd.xlane.f32.xlu0 %v441_v4 }
 0x119   : > { %v443_v15 = vpop.xlane.xlu0 %442 }
 0x11a   : > { %v446_v16 = vsub.f32 %v443_v15, %v445_v14 }
 0x11c   : > { %v447_v17 = vmul.f32 0.03125, %v446_v16 }
 0x11e   : > { %v448_v18 = vadd.f32 1e-05, %v447_v17  ;;  %v999_v17 = vld [vmem:[#allocation10] ss:$0 sm:$0xff] }
 0x120   : > { %1001 = vrsqrt.f32 %v448_v18  ;;  %vm455_vm1 = vweird.f32 %v448_v18 }
 0x126   : > { %v1002_v19 = vpop.eup %1001 }
 0x127   : > { %v450_v20 = vmul.f32 %v1002_v19, %v448_v18  ;;  %vm456_vm0 = vweird.f32 %v1002_v19 }
 0x128   : > { %vm457_vm2 = vmor %vm455_vm1, %vm456_vm0 }
 0x129   : > { %v451_v21 = vmul.f32 %v1002_v19, %v450_v20 }
 0x12b   : > { %v452_v22 = vmul.f32 0.5, %v451_v21 }
 0x12d   : > { %v453_v23 = vsub.f32 1.5, %v452_v22 }
 0x12f   : > { %v454_v24 = vmul.f32 %v1002_v19, %v453_v23 }
 0x131   : > { %v458_v26 = vsel %vm457_vm2, %v1002_v19, %v454_v24  ;;  %v1000_v19 = vld [vmem:[#allocation12] ss:$0 sm:$0xff] }
 0x132   : > { %v459_v27 = vmul.f32 %v458_v26, %v440_v3 }
 0x134   : > { %v463_v29 = vmul.f32 %v995_v25, %v459_v27 }
 0x136   : > { %v467_v30 = vadd.f32 %v996_v28, %v463_v29 }
 0x138   : > { %v468_v31 = vpack.c.bf16 %v467_v30, %v467_v30 }
 0x13a   : > { %545 = vmatmul.bf16.vlgmr.msra.gmra.mxu0 %v468_v31 }
 0x1b7   : > { %v546_v41 = vpop.f32.mrf.mxu0 }
 0x1b8   : > { %v547_v42 = vadd.f32 %v997_v40, %v546_v41 }
 0x1ba   : > { %v863_v43 = vmul.f32 -1.442695, %v547_v42 }
 0x1bc   : > { %1003 = vpow2.f32 %v863_v43 }
 0x1bf   : > { %v548_v44 = vpop.f32.mrf.mxu0 }
 0x1c2   : > { %v1004_v45 = vpop.eup %1003 }
 0x1c3   : > { %v553_v46 = vadd.f32 1.0, %v1004_v45 }
 0x1c5   : > { %1005 = vrcp.f32 %v553_v46  ;;  %v565_v50 = vand.u32 2147483648, %v553_v46  ;;  %v563_v52 = vand.u32 2147483647, %v553_v46  ;;  %vm559_vm4 = vweird.f32 %v553_v46 }
 0x1c7   : > { %v566_v54 = vor.u32 1.1754944e-38, %v565_v50  ;;  %vm564_vm6 = vcmp.eq.f32.partialorder %v563_v52, 8.507059e+37 }
 0x1cb   : > { %v1006_v47 = vpop.eup %1005 }
 0x1cc   : > { %v555_v48 = vmul.f32 %v1006_v47, %v553_v46  ;;  %vm560_vm3 = vweird.f32 %v1006_v47 }
 0x1cd   : > { %vm561_vm5 = vmor %vm559_vm4, %vm560_vm3 }
 0x1ce   : > { %v556_v49 = vsub.f32 1.0, %v555_v48 }
 0x1d0   : > { %v557_v51 = vmul.f32 %v1006_v47, %v556_v49 }
 0x1d2   : > { %v558_v53 = vadd.f32 %v1006_v47, %v557_v51 }
 0x1d4   : > { %v562_v55 = vsel %vm561_vm5, %v1006_v47, %v558_v53 }
 0x1d5   : > { %v567_v56 = vsel %vm564_vm6, %v566_v54, %v562_v55 }
 0x1d6   : > { %v569_v57 = vmul.f32 %v567_v56, %v547_v42 }
 0x1d8   : > { %v570_v58 = vpack.c.bf16 %v569_v57, %v569_v57 }
 0x1da   : > { %647 = vmatmul.bf16.vlgmr.msra.gmra.mxu1 %v570_v58 }
 0x257   : > { %v648_v60 = vpop.f32.mrf.mxu1 }
 0x258   : > { %v649_v61 = vadd.f32 %v998_v59, %v648_v60 }
 0x25a   : > { %v652_v62 = vmul.f32 0.5, %v649_v61 }
 0x25c   : > { %v653_v63 = vadd.f32 %v652_v62, %v1388_v0 }
 0x25e   : > { %656 = vadd.xlane.f32.xlu1 %v653_v63 }
 0x25f   : > { %v650_v1 = vpop.f32.mrf.mxu1 }
 0x2d1   : > { %v657_v2 = vpop.xlane.xlu1 %656 }
 0x2d2   : > { %v658_v3 = vmul.f32 0.03125, %v657_v2 }
 0x2d4   : > { %v659_v4 = vsub.f32 %v653_v63, %v658_v3  ;;  %v663_v6 = vmul.f32 96.0, %v658_v3 }
 0x2d6   : > { %v660_v5 = vmul.f32 %v659_v4, %v659_v4  ;;  %v664_v7 = vmul.f32 %v663_v6, %v658_v3 }
 0x2d8   : > { %661 = vadd.xlane.f32.xlu1 %v660_v5 }
 0x34b   : > { %v662_v8 = vpop.xlane.xlu1 %661 }
 0x34c   : > { %v665_v9 = vsub.f32 %v662_v8, %v664_v7 }
 0x34e   : > { %v666_v10 = vmul.f32 0.03125, %v665_v9 }
 0x350   : > { %v667_v11 = vadd.f32 1e-05, %v666_v10 }
 0x352   : > { %1007 = vrsqrt.f32 %v667_v11  ;;  %vm674_vm8 = vweird.f32 %v667_v11 }
 0x358   : > { %v1008_v12 = vpop.eup %1007 }
 0x359   : > { %v669_v13 = vmul.f32 %v1008_v12, %v667_v11  ;;  %vm675_vm7 = vweird.f32 %v1008_v12 }
 0x35a   : > { %vm676_vm9 = vmor %vm674_vm8, %vm675_vm7 }
 0x35b   : > { %v670_v14 = vmul.f32 %v1008_v12, %v669_v13 }
 0x35d   : > { %v671_v15 = vmul.f32 0.5, %v670_v14 }
 0x35f   : > { %v672_v0 = vsub.f32 1.5, %v671_v15 }
 0x361   : > { %v673_v16 = vmul.f32 %v1008_v12, %v672_v0 }
 0x363   : > { %v677_v18 = vsel %vm676_vm9, %v1008_v12, %v673_v16 }
 0x364   : > { %v678_v20 = vmul.f32 %v677_v18, %v659_v4 }
 0x366   : > { %v682_v21 = vmul.f32 %v999_v17, %v678_v20 }
 0x368   : > { %v686_v22 = vadd.f32 %v1000_v19, %v682_v21 }
 0x36a   : > { %687 = vst [vmem:[%s433_s19] sm:$0xff] %v686_v22 }
 0x36b PF: > { %s23_s30 = sadd.s32 1, %s1241_s30  }
 0x36c   : > { %p20_p7 = scmp.ge.s32.totalorder %s23_s30, 4  }
 0x36e   :  { %22 = sbr.rel (!%p20_p7) target bundleno = 4 (0x4), region = 115 }
 0x373   :  { %707 = vsyncpa [#allocation3], 1 }
 0x374   :  { %709 = vsyncpa [#allocation3 + $0x1], 1 }
 0x375   :  { %710 = vsyncpa [#allocation5], 1 }
 0x376   :  { %711 = vsyncpa [#allocation8], 1 }
 0x377   :  { %712 = vsyncpa [#allocation11], 1 }

// kernel: conformer_forward.15
= control target key start
LH: loop header
LB: loop body
LE: loop exit
PB: predicated region body
PF: predicated region fallthrough
CT: control target
= control target key end

     0   :  { %8 = vsyncpa [#allocation3], 0  ;;  %s470_s12 = smov 0   ;;  %s493_s0 = inlined_call_operand.vmem [shape: f32[16,128], index: 0, kind: input, shape index: {}]   ;;  %s494_s1 = inlined_call_operand.hbm [shape: bf16[128,128], index: 1, kind: input, shape index: {}]   ;;  %s495_s2 = inlined_call_operand.vmem [shape: f32[1,128], index: 2, kind: input, shape index: {}]   ;;  %s496_s3 = inlined_call_operand.vmem [shape: f32[16,128], index: 3, kind: output, shape index: {}]  }
   0x1 LB: > { %s124_s15 = sshll.u32 %s494_s1, 4  ;;  %s332_s16 = sadd.s32 4294967295, %s445_s12   ;;  %s445_s12 = sphi %s470_s12, %s14_s12   ;;  %s125_s15 = int_to_ptr.hbm [resolvable:$true] %s124_s15 }
   0x2   : > { %p334_p0 = scmp.ge.s32.totalorder %s445_s12, 1  ;;  %p113_p1 = scmp.lt.s32.totalorder %s445_s12, 3 }
   0x3   : > { %p391_p2 = scmp.eq.s32.totalorder %s332_s16, 0  ;;  %s447_s17 = smov [#allocation2]  }
   0x4   : > { %p114_p3 = pnand %p334_p0, %p113_p1  ;;  %s126_s18 = sshll.u32 %s447_s17, 4  ;;  %s127_s18 = int_to_ptr.vmem [resolvable:$true] %s126_s18 }
   0x5   : > { %s448_s19 = smov 64   ;;  %s449_s20 = smov 4  }
   0x6   : > { %p387_p4 = pneg %p114_p3  ;;  %152 = sbr.rel (%p114_p3) target bundleno = 178 (0xb2), region = 32 }
   0x8   : > { %p388_p5 = pnand %p391_p2, %p387_p4 }
   0xa   : > { %390 = dma.hbm_to_vmem [thread:$0]  (!%p388_p5), %s125_s15, 1024, %s127_s18, [#allocation3], %s448_s19, %s448_s19, %s449_s20  }
   0xb   : > { %440 = dma.done.wait (%p391_p2), [#allocation3], 1024  }
   0xc   : > { %442 = vsyncadd (%p391_p2), [#allocation3], 4294966272  ;;  %v382_v0 = vld [vmem:[#allocation2 + $0x38] sm:$0xff]  ;;  %v381_v1 = vld [vmem:[#allocation2 + $0x30] sm:$0xff]  ;;  %p175_p6 = scmp.lt.s32.totalorder %s332_s16, 1 }
   0xd   : > { %253 = vmatpush.bf16.msra.mxu0 %v382_v0  ;;  %v380_v2 = vld [vmem:[#allocation2 + $0x28] sm:$0xff]  ;;  %v379_v3 = vld [vmem:[#allocation2 + $0x20] sm:$0xff]  ;;  %v378_v4 = vld [vmem:[#allocation2 + $0x18] sm:$0xff] }
   0xe   : > { %s498_s16 = smov (!%p175_p6, %s332_s16), 1  ;;  %v377_v5 = vld [vmem:[#allocation2 + $0x10] sm:$0xff]  ;;  %v376_v6 = vld [vmem:[#allocation2 + $0x8] sm:$0xff]  ;;  %v375_v7 = vld [vmem:[#allocation2] sm:$0xff] }
   0xf   : > { %s339_s21 = sshll.u32 %s498_s16, 3  ;;  %v404_v10 = vld [vmem:[%s495_s2] ss:$0 sm:$0xff] }
  0x10   : > { %s178_s24 = scalar_lea.vmem %s493_s0, %s339_s21  ;;  %s182_s29 = scalar_lea.vmem %s496_s3, %s339_s21 }
  0x11   : > { %254 = vmatpush.bf16.msra.mxu0 %v381_v1  ;;  %v183_v8 = vld [vmem:[%s178_s24] sm:$0xff] }
  0x12   : > { %v184_v9 = vpack.c.bf16 %v183_v8, %v183_v8 }
  0x15   : > { %255 = vmatpush.bf16.msra.mxu0 %v380_v2 }
  0x19   : > { %256 = vmatpush.bf16.msra.mxu0 %v379_v3 }
  0x1d   : > { %257 = vmatpush.bf16.msra.mxu0 %v378_v4 }
  0x21   : > { %258 = vmatpush.bf16.msra.mxu0 %v377_v5 }
  0x25   : > { %259 = vmatpush.bf16.msra.mxu0 %v376_v6 }
  0x29   : > { %260 = vmatpush.bf16.msra.mxu0 %v375_v7 }
  0x2c   : > { %261 = vmatmul.bf16.vlgmr.msra.gmra.mxu0 %v184_v9 }
  0xa9   : > { %v262_v11 = vpop.f32.mrf.mxu0 }
  0xaa   : > { %v263_v12 = vadd.f32 %v404_v10, %v262_v11 }
  0xac   : > { %266 = vst [vmem:[%s182_s29] sm:$0xff] %v263_v12 }
  0xb1   : > { %v264_v13 = vpop.f32.mrf.mxu0 }
  0xb2 PF: > { %s14_s12 = sadd.s32 1, %s445_s12  }
  0xb3   : > { %p11_p7 = scmp.ge.s32.totalorder %s14_s12, 4  }
  0xb5   :  { %13 = sbr.rel (!%p11_p7) target bundleno = 1 (0x1), region = 67 }
  0xba   :  { %286 = vsyncpa [#allocation3], 1 }
  0xbb   :  { %288 = vsyncpa [#allocation3 + $0x1], 1 }

// kernel: conformer_forward.13
= control target key start
LH: loop header
LB: loop body
LE: loop exit
PB: predicated region body
PF: predicated region fallthrough
CT: control target
= control target key end

     0   :  { %s3121_s0 = inlined_call_operand.vmem [shape: f32[16,128], index: 0, kind: input, shape index: {}]   ;;  %s3122_s1 = inlined_call_operand.hbm [shape: f32[1,128], index: 1, kind: input, shape index: {}]   ;;  %s3123_s2 = inlined_call_operand.hbm [shape: f32[1,128], index: 2, kind: input, shape index: {}]   ;;  %s3124_s3 = inlined_call_operand.vmem [shape: bf16[128,384], index: 3, kind: input, shape index: {}]   ;;  %s3125_s4 = inlined_call_operand.vmem [shape: f32[1,384], index: 4, kind: input, shape index: {}]   ;;  %s3126_s5 = inlined_call_operand.hbm [shape: bf16[128,128], index: 5, kind: input, shape index: {}]   ;;  %s3127_s6 = inlined_call_operand.hbm [shape: f32[1,128], index: 6, kind: input, shape index: {}]   ;;  %s3128_s7 = inlined_call_operand.hbm [shape: f32[1,128], index: 7, kind: input, shape index: {}]   ;;  %s3129_s8 = inlined_call_operand.hbm [shape: f32[1,128], index: 8, kind: input, shape index: {}]   ;;  %s3130_s9 = inlined_call_operand.vmem [shape: bf16[128,256], index: 9, kind: input, shape index: {}]   ;;  %s3131_s10 = inlined_call_operand.vmem [shape: f32[1,256], index: 10, kind: input, shape index: {}]   ;;  %s3132_s11 = inlined_call_operand.vmem [shape: f32[7,128], index: 11, kind: input, shape index: {}]   ;;  %s3133_s12 = inlined_call_operand.hbm [shape: f32[1,128], index: 12, kind: input, shape index: {}]   ;;  %s3134_s13 = inlined_call_operand.hbm [shape: f32[1,128], index: 13, kind: input, shape index: {}]   ;;  %s3135_s14 = inlined_call_operand.hbm [shape: bf16[128,128], index: 14, kind: input, shape index: {}]   ;;  %s3136_s15 = inlined_call_operand.hbm [shape: f32[1,128], index: 15, kind: input, shape index: {}]   ;;  %s3137_s16 = inlined_call_operand.vmem [shape: f32[16,128], index: 16, kind: output, shape index: {}]  }
   0x1   :  { %3139 = sst [smem:[#allocation27_spill]] %s3121_s0 }
   0x2   :  { %3140 = sst [smem:[#allocation28_spill]] %s3123_s2 }
   0x3   :  { %3141 = sst [smem:[#allocation29_spill]] %s3127_s6 }
   0x4   :  { %3142 = sst [smem:[#allocation30_spill]] %s3129_s8 }
   0x5   :  { %21 = vsyncpa [#allocation5], 0 }
   0x6   :  { %22 = vsyncpa [#allocation7], 0 }
   0x7   :  { %23 = vsyncpa [#allocation10], 0 }
   0x8   :  { %24 = vsyncpa [#allocation13], 0 }
   0x9   :  { %25 = vsyncpa [#allocation16], 0 }
   0xa   :  { %26 = vsyncpa [#allocation19], 0  ;;  %s2685_s21 = smov 0  }
   0xb LB: > { %3143 = sst [smem:[#allocation26_spill]] %s2579_s21  ;;  %s2694_s25 = sadd.s32 4294967295, %s2579_s21   ;;  %s2579_s21 = sphi %s2685_s21, %s32_s21  }
   0xc   : > { %s3144_s2 = sld [smem:[#allocation28_spill]]  ;;  %p1778_p0 = scmp.ge.s32.totalorder %s2579_s21, 1 }
   0xd   : > { %p404_p1 = scmp.lt.s32.totalorder %s2579_s21, 3  ;;  %p2166_p2 = scmp.eq.s32.totalorder %s2694_s25, 0 }
   0xe   : > { %s2581_s27 = smov [#allocation6]   ;;  %s3146_s6 = sld [smem:[#allocation29_spill]] }
   0xf   : > { %p2699_p3 = pnand %p1778_p0, %p404_p1  ;;  %s430_s28 = sshll.u32 %s2581_s27, 4  ;;  %s431_s28 = int_to_ptr.vmem [resolvable:$true] %s430_s28 }
  0x10   : > { %s3147_s8 = sld [smem:[#allocation30_spill]]  ;;  %s2582_s22 = smov [#allocation9]  }
  0x11   : > { %p2135_p4 = pneg %p2699_p3  ;;  %s462_s23 = sshll.u32 %s2582_s22, 4  ;;  %s463_s23 = int_to_ptr.vmem [resolvable:$true] %s462_s23 }
  0x12   : > { %s428_s24 = sshll.u32 %s3144_s2, 4  ;;  %s2583_s27 = smov [#allocation12]   ;;  %s429_s24 = int_to_ptr.hbm [resolvable:$true] %s428_s24 }
  0x13   : > { %p2713_p5 = pnand %p2166_p2, %p2135_p4  ;;  %s486_s29 = sshll.u32 %s2583_s27, 4  ;;  %s487_s29 = int_to_ptr.vmem [resolvable:$true] %s486_s29 }
  0x14   : > { %s460_s0 = sshll.u32 %s3146_s6, 4  ;;  %s517_s18 = sshll.u32 %s3134_s13, 4  ;;  %s461_s0 = int_to_ptr.hbm [resolvable:$true] %s460_s0  ;;  %s518_s18 = int_to_ptr.hbm [resolvable:$true] %s517_s18 }
  0x15   : > { %2141 = dma.hbm_to_vmem [thread:$0]  (!%p2713_p5), %s429_s24, 16, %s431_s28, [#allocation7]  }
  0x16   : > { %s484_s19 = sshll.u32 %s3147_s8, 4  ;;  %s416_s6 = sshll.u32 %s3122_s1, 4  ;;  %s485_s19 = int_to_ptr.hbm [resolvable:$true] %s484_s19  ;;  %s417_s6 = int_to_ptr.hbm [resolvable:$true] %s416_s6 }
  0x17   : > { %2147 = dma.hbm_to_vmem [thread:$0]  (!%p2713_p5), %s461_s0, 16, %s463_s23, [#allocation10]  }
  0x18   : > { %2153 = dma.hbm_to_vmem [thread:$0]  (!%p2713_p5), %s485_s19, 16, %s487_s29, [#allocation13]  }
  0x19   : > { %s2584_s8 = smov [#allocation15]   ;;  %s2585_s24 = smov [#allocation4]  }
  0x1a   : > { %s519_s21 = sshll.u32 %s2584_s8, 4  ;;  %s418_s28 = sshll.u32 %s2585_s24, 4  ;;  %s520_s21 = int_to_ptr.vmem [resolvable:$true] %s519_s21  ;;  %s419_s28 = int_to_ptr.vmem [resolvable:$true] %s418_s28 }
  0x1b   : > { %2159 = dma.hbm_to_vmem [thread:$0]  (!%p2713_p5), %s518_s18, 16, %s520_s21, [#allocation16]  }
  0x1c   : > { %s445_s27 = sshll.u32 %s3126_s5, 4  ;;  %s2586_s2 = smov [#allocation8]   ;;  %s446_s27 = int_to_ptr.hbm [resolvable:$true] %s445_s27 }
  0x1d   : > { %2138 = dma.hbm_to_vmem [thread:$0]  (!%p2713_p5), %s417_s6, 16, %s419_s28, [#allocation5]  }
  0x1e   : > { %s447_s19 = sshll.u32 %s2586_s2, 4  ;;  %s472_s30 = sshll.u32 %s3128_s7, 4  ;;  %s448_s19 = int_to_ptr.vmem [resolvable:$true] %s447_s19  ;;  %s473_s30 = int_to_ptr.hbm [resolvable:$true] %s472_s30 }
  0x1f   : > { %s2587_s21 = smov 64   ;;  %s2588_s17 = smov 4  }
  0x20   : > { %2144 = dma.hbm_to_vmem [thread:$0]  (!%p2713_p5), %s446_s27, 1024, %s448_s19, [#allocation7], %s2587_s21, %s2587_s21, %s2588_s17  }
  0x21   : > { %s2589_s18 = smov [#allocation11]   ;;  %s505_s6 = sshll.u32 %s3133_s12, 4  ;;  %s506_s6 = int_to_ptr.hbm [resolvable:$true] %s505_s6 }
  0x22   : > { %s474_s22 = sshll.u32 %s2589_s18, 4  ;;  %s528_s2 = sshll.u32 %s3135_s14, 4  ;;  %s475_s22 = int_to_ptr.vmem [resolvable:$true] %s474_s22  ;;  %s529_s2 = int_to_ptr.hbm [resolvable:$true] %s528_s2 }
  0x23   : > { %2150 = dma.hbm_to_vmem [thread:$0]  (!%p2713_p5), %s473_s30, 16, %s475_s22, [#allocation10]  }
  0x24   : > { %s2590_s8 = smov [#allocation14]   ;;  %s2591_s27 = smov [#allocation17]  }
  0x25   : > { %s507_s29 = sshll.u32 %s2590_s8, 4  ;;  %s530_s19 = sshll.u32 %s2591_s27, 4  ;;  %s508_s29 = int_to_ptr.vmem [resolvable:$true] %s507_s29  ;;  %s531_s19 = int_to_ptr.vmem [resolvable:$true] %s530_s19 }
  0x26   : > { %2156 = dma.hbm_to_vmem [thread:$0]  (!%p2713_p5), %s506_s6, 16, %s508_s29, [#allocation13]  }
  0x27   : > { %s543_s0 = sshll.u32 %s3136_s15, 4  ;;  %s2592_s30 = smov [#allocation18]   ;;  %s544_s0 = int_to_ptr.hbm [resolvable:$true] %s543_s0 }
  0x28   : > { %2162 = dma.hbm_to_vmem [thread:$0]  (!%p2713_p5), %s529_s2, 1024, %s531_s19, [#allocation16], %s2587_s21, %s2587_s21, %s2588_s17  }
  0x29   : > { %s545_s22 = sshll.u32 %s2592_s30, 4  ;;  %565 = sbr.rel (%p2699_p3) target bundleno = 2295 (0x8f7), region = 84  ;;  %s546_s22 = int_to_ptr.vmem [resolvable:$true] %s545_s22 }
  0x2a   : > { %2165 = dma.hbm_to_vmem [thread:$0]  (!%p2713_p5), %s544_s0, 16, %s546_s22, [#allocation19]  }
  0x2e   : > { %2554 = dma.done.wait (%p2166_p2), [#allocation5], 16  }
  0x2f   : > { %2556 = vsyncadd (%p2166_p2), [#allocation5], 4294967280 }
  0x30   : > { %2558 = dma.done.wait (%p2166_p2), [#allocation7], 1040  }
  0x31   : > { %2560 = vsyncadd (%p2166_p2), [#allocation7], 4294966256 }
  0x32   : > { %2562 = dma.done.wait (%p2166_p2), [#allocation10], 32  }
  0x33   : > { %2564 = vsyncadd (%p2166_p2), [#allocation10], 4294967264 }
  0x34   : > { %2566 = dma.done.wait (%p2166_p2), [#allocation13], 32  }
  0x35   : > { %2568 = vsyncadd (%p2166_p2), [#allocation13], 4294967264 }
  0x36   : > { %2570 = dma.done.wait (%p2166_p2), [#allocation16], 1040  }
  0x37   : > { %2572 = vsyncadd (%p2166_p2), [#allocation16], 4294966256 }
  0x38   : > { %2574 = dma.done.wait (%p2166_p2), [#allocation19], 16  }
  0x39   : > { %2576 = vsyncadd (%p2166_p2), [#allocation19], 4294967280  ;;  %p659_p6 = scmp.lt.s32.totalorder %s2694_s25, 1  ;;  %s3149_s17 = sld [smem:[#allocation27_spill]]  ;;  %v1889_v5 = vld [vmem:[%s3124_s3 + $0xa8] sm:$0xf] }
  0x3a   : > { %v2061_v6 = vld [vmem:[%s3124_s3 + $0xb0] sm:$0xf0]  ;;  %v2060_v7 = vld [vmem:[%s3124_s3 + $0xac] sm:$0xf]  ;;  %v1891_v9 = vld [vmem:[%s3124_s3 + $0xb4] sm:$0xf0] }
  0x3b   : > { %s3152_s25 = smov (!%p659_p6, %s2694_s25), 1  ;;  %v1890_v8 = vor.u32 %v2061_v6, %v1889_v5  ;;  %v1897_v10 = vld [vmem:[%s3124_s3 + $0xb0] sm:$0xf]  ;;  %v2062_v11 = vld [vmem:[%s3124_s3 + $0xb8] sm:$0xf0]  ;;  %v1894_v12 = vor.u32 %v2060_v7, %v1891_v9  ;;  %vm915_vm3 = vcmask 64512  }
  0x3c   : > { %s1801_s26 = sshll.u32 %s3152_s25, 3  ;;  %v1898_v13 = vor.u32 %v2062_v11, %v1897_v10  ;;  %v1877_v14 = vld [vmem:[%s3124_s3 + $0x90] sm:$0xf]  ;;  %v2058_v15 = vld [vmem:[%s3124_s3 + $0x98] sm:$0xf0]  ;;  %s2593_s2 = smov 112  }
  0x3d   : > { %871 = vmatpush.bf16.msra.mxu0 %v1890_v8  ;;  %884 = vmatpush.bf16.msra.mxu1 %v1894_v12  ;;  %v2057_v16 = vld [vmem:[%s3124_s3 + $0x94] sm:$0xf]  ;;  %v1878_v17 = vor.u32 %v2058_v15, %v1877_v14  ;;  %v1879_v18 = vld [vmem:[%s3124_s3 + $0x9c] sm:$0xf0]  ;;  %v1885_v19 = vld [vmem:[%s3124_s3 + $0x98] sm:$0xf] }
  0x3e   : > { %897 = vmatpush.bf16.msra.mxu2 %v1898_v13  ;;  %v2059_v20 = vld [vmem:[%s3124_s3 + $0xa0] sm:$0xf0]  ;;  %v1882_v21 = vor.u32 %v2057_v16, %v1879_v18  ;;  %v1865_v23 = vld [vmem:[%s3124_s3 + $0x78] sm:$0xf]  ;;  %v2054_v25 = vld [vmem:[%s3124_s3 + $0x7c] sm:$0xf] }
  0x3f   : > { %s662_s6 = scalar_lea.vmem %s3149_s17, %s1801_s26  ;;  %v1886_v22 = vor.u32 %v2059_v20, %v1885_v19  ;;  %v2055_v24 = vld [vmem:[%s3124_s3 + $0x80] sm:$0xf0]  ;;  %v1867_v27 = vld [vmem:[%s3124_s3 + $0x84] sm:$0xf0]  ;;  %v1873_v28 = vld [vmem:[%s3124_s3 + $0x80] sm:$0xf]  ;;  %s666_s17 = scalar_lea.vmem %s3137_s16, %s1801_s26 }
  0x40   : > { %v2794_v0 = vld [vmem:[%s662_s6] sm:$0xff]  ;;  %v1866_v26 = vor.u32 %v2055_v24, %v1865_v23  ;;  %v2056_v29 = vld [vmem:[%s3124_s3 + $0x88] sm:$0xf0]  ;;  %v1870_v30 = vor.u32 %v2054_v25, %v1867_v27  ;;  %v1855_v36 = vld [vmem:[%s3124_s3 + $0x6c] sm:$0xf0]  ;;  %s2594_s8 = smov 120  }
  0x41   : > { %671 = vadd.xlane.f32.xlu0 %v2794_v0  ;;  %872 = vmatpush.bf16.msra.mxu0 %v1878_v17  ;;  %v1874_v31 = vor.u32 %v2056_v29, %v1873_v28  ;;  %v1853_v32 = vld [vmem:[%s3124_s3 + $0x60] sm:$0xf]  ;;  %v2052_v33 = vld [vmem:[%s3124_s3 + $0x68] sm:$0xf0]  ;;  %v2051_v34 = vld [vmem:[%s3124_s3 + $0x64] sm:$0xf] }
  0x42   : > { %885 = vmatpush.bf16.msra.mxu1 %v1882_v21  ;;  %898 = vmatpush.bf16.msra.mxu2 %v1886_v22  ;;  %v1854_v35 = vor.u32 %v2052_v33, %v1853_v32  ;;  %v1861_v37 = vld [vmem:[%s3124_s3 + $0x68] sm:$0xf]  ;;  %v2053_v38 = vld [vmem:[%s3124_s3 + $0x70] sm:$0xf0]  ;;  %v1858_v39 = vor.u32 %v2051_v34, %v1855_v36  ;;  %v2048_v43 = vld [vmem:[%s3124_s3 + $0x4c] sm:$0xf] }
  0x43   : > { %v1862_v40 = vor.u32 %v2053_v38, %v1861_v37  ;;  %v1841_v41 = vld [vmem:[%s3124_s3 + $0x48] sm:$0xf]  ;;  %v2049_v42 = vld [vmem:[%s3124_s3 + $0x50] sm:$0xf0]  ;;  %v1843_v45 = vld [vmem:[%s3124_s3 + $0x54] sm:$0xf0] }
  0x44   : > { %v1842_v44 = vor.u32 %v2049_v42, %v1841_v41  ;;  %v1849_v46 = vld [vmem:[%s3124_s3 + $0x50] sm:$0xf]  ;;  %v2050_v47 = vld [vmem:[%s3124_s3 + $0x58] sm:$0xf0]  ;;  %v1846_v48 = vor.u32 %v2048_v43, %v1843_v45  ;;  %v2045_v52 = vld [vmem:[%s3124_s3 + $0x34] sm:$0xf] }
  0x45   : > { %873 = vmatpush.bf16.msra.mxu0 %v1866_v26  ;;  %v1850_v49 = vor.u32 %v2050_v47, %v1849_v46  ;;  %v1829_v50 = vld [vmem:[%s3124_s3 + $0x30] sm:$0xf]  ;;  %v2046_v51 = vld [vmem:[%s3124_s3 + $0x38] sm:$0xf0]  ;;  %v1831_v54 = vld [vmem:[%s3124_s3 + $0x3c] sm:$0xf0] }
  0x46   : > { %886 = vmatpush.bf16.msra.mxu1 %v1870_v30  ;;  %899 = vmatpush.bf16.msra.mxu2 %v1874_v31  ;;  %v1830_v53 = vor.u32 %v2046_v51, %v1829_v50  ;;  %v1837_v55 = vld [vmem:[%s3124_s3 + $0x38] sm:$0xf]  ;;  %v2047_v56 = vld [vmem:[%s3124_s3 + $0x40] sm:$0xf0]  ;;  %v1834_v57 = vor.u32 %v2045_v52, %v1831_v54  ;;  %v2042_v61 = vld [vmem:[%s3124_s3 + $0x1c] sm:$0xf] }
  0x47   : > { %v1838_v58 = vor.u32 %v2047_v56, %v1837_v55  ;;  %v1817_v59 = vld [vmem:[%s3124_s3 + $0x18] sm:$0xf]  ;;  %v2043_v60 = vld [vmem:[%s3124_s3 + $0x20] sm:$0xf0]  ;;  %v1819_v63 = vld [vmem:[%s3124_s3 + $0x24] sm:$0xf0] }
  0x48   : > { %v1818_v62 = vor.u32 %v2043_v60, %v1817_v59  ;;  %v1822_v5 = vor.u32 %v2042_v61, %v1819_v63  ;;  %v1805_v7 = vld [vmem:[%s3124_s3] sm:$0xf]  ;;  %v2040_v8 = vld [vmem:[%s3124_s3 + $0x8] sm:$0xf0]  ;;  %v2039_v9 = vld [vmem:[%s3124_s3 + $0x4] sm:$0xf] }
  0x49   : > { %874 = vmatpush.bf16.msra.mxu0 %v1854_v35  ;;  %v1806_v10 = vor.u32 %v2040_v8, %v1805_v7  ;;  %v1807_v11 = vld [vmem:[%s3124_s3 + $0xc] sm:$0xf0]  ;;  %v1813_v12 = vld [vmem:[%s3124_s3 + $0x8] sm:$0xf]  ;;  %v2041_v13 = vld [vmem:[%s3124_s3 + $0x10] sm:$0xf0] }
  0x4a   : > { %887 = vmatpush.bf16.msra.mxu1 %v1858_v39  ;;  %900 = vmatpush.bf16.msra.mxu2 %v1862_v40  ;;  %v1810_v15 = vor.u32 %v2039_v9, %v1807_v11  ;;  %v1814_v16 = vor.u32 %v2041_v13, %v1813_v12  ;;  %v2213_v28 = vld [vmem:[#allocation4] ss:$0 sm:$0xff]  ;;  %v2214_v30 = vld [vmem:[#allocation6] ss:$0 sm:$0xff]  ;;  %v735_v34 = vld [vmem:[%s3125_s4] sm:$0x7] }
  0x4b   : > { %v738_v35 = vperm.slane %v735_v34, 1  ;;  %v737_v39 = vperm.slane %v735_v34, 0  ;;  %v739_v41 = vperm.slane %v735_v34, 2  ;;  %vm964_vm4 = vcmask 1043456   ;;  %s2595_s29 = smov 104   ;;  %s2597_s27 = smov 16  }
  0x4c   : > { %vm910_vm9 = vcmask 1047808   ;;  %s2598_s19 = smov 8   ;;  %s2599_s18 = smov 24  }
  0x4d   : > { %875 = vmatpush.bf16.msra.mxu0 %v1842_v44 }
  0x4e   : > { %888 = vmatpush.bf16.msra.mxu1 %v1846_v48  ;;  %901 = vmatpush.bf16.msra.mxu2 %v1850_v49 }
  0x51   : > { %876 = vmatpush.bf16.msra.mxu0 %v1830_v53 }
  0x52   : > { %889 = vmatpush.bf16.msra.mxu1 %v1834_v57  ;;  %902 = vmatpush.bf16.msra.mxu2 %v1838_v58 }
  0x55   : > { %877 = vmatpush.bf16.msra.mxu0 %v1818_v62 }
  0x56   : > { %890 = vmatpush.bf16.msra.mxu1 %v1822_v5 }
  0x59   : > { %878 = vmatpush.bf16.msra.mxu0 %v1806_v10 }
  0x5a   : > { %891 = vmatpush.bf16.msra.mxu1 %v1810_v15 }
  0xb4   : > { %v672_v1 = vpop.xlane.xlu0 %671 }
  0xb5   : > { %v2797_v2 = vmul.f32 0.03125, %v672_v1  ;;  %v1825_v1 = vld [vmem:[%s3124_s3 + $0x20] sm:$0xf] }
  0xb7   : > { %v2801_v3 = vsub.f32 %v2794_v0, %v2797_v2  ;;  %v678_v14 = vmul.f32 96.0, %v2797_v2 }
  0xb9   : > { %v675_v4 = vmul.f32 %v2801_v3, %v2801_v3  ;;  %v679_v17 = vmul.f32 %v678_v14, %v2797_v2 }
  0xbb   : > { %676 = vadd.xlane.f32.xlu0 %v675_v4  ;;  %v2044_v4 = vld [vmem:[%s3124_s3 + $0x28] sm:$0xf0] }
  0xbc   : > { %v1826_v6 = vor.u32 %v2044_v4, %v1825_v1 }
  0xbe   : > { %903 = vmatpush.bf16.msra.mxu2 %v1826_v6 }
  0xc2   : > { %904 = vmatpush.bf16.msra.mxu2 %v1814_v16 }
 0x12e   : > { %v677_v18 = vpop.xlane.xlu0 %676 }
 0x12f   : > { %v680_v19 = vsub.f32 %v677_v18, %v679_v17 }
 0x131   : > { %v681_v20 = vmul.f32 0.03125, %v680_v19 }
 0x133   : > { %v682_v21 = vadd.f32 1e-05, %v681_v20 }
 0x135   : > { %2221 = vrsqrt.f32 %v682_v21  ;;  %vm689_vm1 = vweird.f32 %v682_v21 }
 0x13b   : > { %v2222_v22 = vpop.eup %2221 }
 0x13c   : > { %v684_v23 = vmul.f32 %v2222_v22, %v682_v21  ;;  %vm690_vm0 = vweird.f32 %v2222_v22 }
 0x13d   : > { %vm691_vm2 = vmor %vm689_vm1, %vm690_vm0 }
 0x13e   : > { %v685_v24 = vmul.f32 %v2222_v22, %v684_v23 }
 0x140   : > { %v686_v25 = vmul.f32 0.5, %v685_v24 }
 0x142   : > { %v687_v26 = vsub.f32 1.5, %v686_v25 }
 0x144   : > { %v688_v27 = vmul.f32 %v2222_v22, %v687_v26 }
 0x146   : > { %v692_v29 = vsel %vm691_vm2, %v2222_v22, %v688_v27 }
 0x147   : > { %v693_v2 = vmul.f32 %v692_v29, %v2801_v3 }
 0x149   : > { %v697_v31 = vmul.f32 %v2213_v28, %v693_v2  ;;  %v2596_v28 = vmov 0.0  }
 0x14a   : > { %911 = vst.msk [vmem:[#allocation2] sm:$0xff] %vm910_vm9, %v2596_v28 }
 0x14b   : > { %v701_v32 = vadd.f32 %v2214_v30, %v697_v31  ;;  %1479 = vst [vmem:[#allocation3] sm:$0x7] %v2596_v28 }
 0x14c   : > { %1480 = vst [vmem:[#allocation3 + $0xb] sm:$0x7] %v2596_v28 }
 0x14d   : > { %v702_v33 = vpack.c.bf16 %v701_v32, %v701_v32 }
 0x14f   : > { %879 = vmatmul.bf16.vlgmr.msra.gmra.mxu0 %v702_v33  ;;  %892 = vmatmul.bf16.vlgmr.msra.gmra.mxu1 %v702_v33 }
 0x150   : > { %905 = vmatmul.bf16.vlgmr.msra.gmra.mxu2 %v702_v33 }
 0x1cc   : > { %v880_v36 = vpop.f32.mrf.mxu0  ;;  %v893_v37 = vpop.f32.mrf.mxu1 }
 0x1cd   : > { %v894_v38 = vadd.f32 %v893_v37, %v738_v35  ;;  %v881_v42 = vadd.f32 %v880_v36, %v737_v39 }
 0x1cf   : > { %v913_v40 = vpack.c.bf16 %v894_v38, %v894_v38  ;;  %v912_v48 = vpack.c.bf16 %v881_v42, %v881_v42 }
 0x1d1   : > { %1063 = vrot.lane.b32.xlu0 %v913_v40, %s2593_s2  ;;  %986 = vrot.lane.b32.xlu2 %v913_v40, %s2594_s8  ;;  %v920_v3 = vsel %vm915_vm3, %v913_v40, 0 }
 0x1d2   : > { %929 = vmatpush.bf16.xpose.msra.mxu3 %v920_v3 }
 0x1d3   : > { %v906_v43 = vpop.f32.mrf.mxu2 }
 0x1d4   : > { %v907_v44 = vadd.f32 %v906_v43, %v739_v41  ;;  %v882_v45 = vpop.f32.mrf.mxu0  ;;  %v895_v46 = vpop.f32.mrf.mxu1 }
 0x1d6   : > { %v2958_v47 = vpack.c.bf16 %v907_v44, %v907_v44 }
 0x1d8   : > { %v966_v49 = vsel %vm964_vm4, %v2958_v47, 0 }
 0x1d9   : > { %983 = vrot.lane.b32.xlu2 %v912_v48, %s2594_s8  ;;  %1899 = vmatmul.msk.bf16.vlgmr.msra.gmra.mxu3 %vm915_vm3, %v912_v48 }
 0x1da   : > { %975 = vmatpush.bf16.msrb.mxu3 %v966_v49 }
 0x1db   : > { %v908_v50 = vpop.f32.mrf.mxu2 }
 0x1e1   : > { %1061 = vrot.lane.b32.xlu2 %v912_v48, %s2593_s2 }
 0x1e9   : > { %1137 = vrot.lane.b32.xlu2 %v912_v48, %s2595_s29 }
 0x22b   : > { %v987_v51 = vpop.permute.xlu2 %986 }
 0x22c   : > { %v992_v52 = vsel %vm915_vm3, %v987_v51, 0 }
 0x22d   : > { %1001 = vmatpush.bf16.xpose.msra.mxu3 %v992_v52 }
 0x233   : > { %v984_v53 = vpop.permute.xlu2 %983 }
 0x23b   : > { %v1062_v56 = vpop.permute.xlu2 %1061 }
 0x243   : > { %v1064_v54 = vpop.permute.xlu0 %1063  ;;  %v1138_v27 = vpop.permute.xlu2 %1137 }
 0x244   : > { %v1069_v55 = vsel %vm915_vm3, %v1064_v54, 0 }
 0x245   : > { %1078 = vmatpush.bf16.xpose.msrb.mxu1 %v1069_v55 }
 0x24c   : > { %1903 = vmatmul.msk.bf16.vlgmr.msrb.gmra.mxu1 %vm915_vm3, %v1062_v56 }
 0x25c   : > { %v931_v57 = vpop.f32.mrf.mxu3 }
 0x25d   : > { %v935_v58 = vsel %vm915_vm3, %v931_v57, -inf }
 0x25e   : > { %936 = vmax.xlane.f32.xlu1 %v935_v58 }
 0x264   : > { %v933_v59 = vpop.f32.mrf.mxu3 }
 0x2c9   : > { %v1080_v60 = vpop.f32.mrf.mxu1 }
 0x2ca   : > { %v1084_v61 = vsel %vm915_vm3, %v1080_v60, -inf }
 0x2cb   : > { %1085 = vmax.xlane.f32.xlu0 %v1084_v61 }
 0x2d1   : > { %v1082_v62 = vpop.f32.mrf.mxu1  ;;  %v937_v63 = vpop.xlane.xlu1 %936 }
 0x2d2   : > { %v938_v1 = vsub.f32 %v931_v57, %v937_v63 }
 0x2d4   : > { %v939_v4 = vmul.f32 1.442695, %v938_v1 }
 0x2d6   : > { %2223 = vpow2.f32 %v939_v4 }
 0x2dc   : > { %v2224_v5 = vpop.eup %2223 }
 0x2dd   : > { %v941_v6 = vsel %vm915_vm3, %v2224_v5, 0.0 }
 0x2de   : > { %942 = vadd.xlane.f32.xlu1 %v941_v6 }
 0x2f7   : > { %1139 = vrot.lane.b32.xlu1 %v913_v40, %s2595_s29 }
 0x33e   : > { %v1086_v7 = vpop.xlane.xlu0 %1085 }
 0x33f   : > { %v1087_v8 = vsub.f32 %v1080_v60, %v1086_v7 }
 0x341   : > { %v1088_v9 = vmul.f32 1.442695, %v1087_v8 }
 0x343   : > { %2225 = vpow2.f32 %v1088_v9 }
 0x349   : > { %v2226_v10 = vpop.eup %2225 }
 0x34a   : > { %v1090_v11 = vsel %vm915_vm3, %v2226_v10, 0.0 }
 0x34b   : > { %1091 = vadd.xlane.f32.xlu0 %v1090_v11 }
 0x351   : > { %v943_v12 = vpop.xlane.xlu1 %942 }
 0x352   : > { %2227 = vrcp.f32 %v943_v12  ;;  %v955_v16 = vand.u32 2147483648, %v943_v12  ;;  %v953_v18 = vand.u32 2147483647, %v943_v12  ;;  %vm949_vm6 = vweird.f32 %v943_v12 }
 0x354   : > { %v956_v20 = vor.u32 1.1754944e-38, %v955_v16  ;;  %vm954_vm8 = vcmp.eq.f32.partialorder %v953_v18, 8.507059e+37 }
 0x358   : > { %v2228_v13 = vpop.eup %2227 }
 0x359   : > { %v945_v14 = vmul.f32 %v2228_v13, %v943_v12  ;;  %vm950_vm5 = vweird.f32 %v2228_v13 }
 0x35a   : > { %vm951_vm7 = vmor %vm949_vm6, %vm950_vm5 }
 0x35b   : > { %v946_v15 = vsub.f32 1.0, %v945_v14 }
 0x35d   : > { %v947_v17 = vmul.f32 %v2228_v13, %v946_v15 }
 0x35f   : > { %1110 = vrot.lane.b32.xlu0 %v2958_v47, %s2593_s2  ;;  %v948_v19 = vadd.f32 %v2228_v13, %v947_v17 }
 0x361   : > { %v952_v21 = vsel %vm951_vm7, %v2228_v13, %v948_v19 }
 0x362   : > { %v957_v22 = vsel %vm954_vm8, %v956_v20, %v952_v21  ;;  %vm1211_vm8 = vcmask 261312  }
 0x363   : > { %v959_v23 = vmul.f32 %v2224_v5, %v957_v22 }
 0x365   : > { %v960_v24 = vpack.c.bf16 %v959_v23, %v959_v23 }
 0x367   : > { %1900 = vmatmul.msk.bf16.vlgmr.msrb.gmra.mxu3 %vm915_vm3, %v960_v24 }
 0x369   : > { %v1140_v25 = vpop.permute.xlu1 %1139 }
 0x36a   : > { %v1145_v26 = vsel %vm915_vm3, %v1140_v25, 0 }
 0x36b   : > { %1154 = vmatpush.bf16.xpose.msrb.mxu3 %v1145_v26 }
 0x377   : > { %1901 = vmatmul.msk.bf16.vlgmr.msra.gmra.mxu3 %vm915_vm3, %v984_v53 }
 0x387   : > { %1905 = vmatmul.msk.bf16.vlgmr.msrb.gmra.mxu3 %vm915_vm3, %v1138_v27 }
 0x3be   : > { %v1092_v29 = vpop.xlane.xlu0 %1091 }
 0x3bf   : > { %2229 = vrcp.f32 %v1092_v29  ;;  %v1104_v32 = vand.u32 2147483648, %v1092_v29  ;;  %v1102_v34 = vand.u32 2147483647, %v1092_v29  ;;  %vm1098_vm11 = vweird.f32 %v1092_v29 }
 0x3c1   : > { %v1105_v36 = vor.u32 1.1754944e-38, %v1104_v32  ;;  %vm1103_vm13 = vcmp.eq.f32.partialorder %v1102_v34, 8.507059e+37  ;;  %v2068_v32 = vld [vmem:[#allocation8 + $0x28] sm:$0xff] }
 0x3c5   : > { %v2230_v2 = vpop.eup %2229 }
 0x3c6   : > { %v1094_v30 = vmul.f32 %v2230_v2, %v1092_v29  ;;  %vm1099_vm10 = vweird.f32 %v2230_v2 }
 0x3c7   : > { %vm1100_vm12 = vmor %vm1098_vm11, %vm1099_vm10 }
 0x3c8   : > { %v1095_v31 = vsub.f32 1.0, %v1094_v30  ;;  %v2070_v30 = vld [vmem:[#allocation8 + $0x38] sm:$0xff] }
 0x3c9   : > { %1283 = vmatpush.bf16.msra.mxu1 %v2070_v30  ;;  %v2073_v30 = vld [vmem:[%s3130_s9 + $0x14] sm:$0xf] }
 0x3ca   : > { %v1096_v33 = vmul.f32 %v2230_v2, %v1095_v31  ;;  %v2069_v31 = vld [vmem:[#allocation8 + $0x30] sm:$0xff] }
 0x3cc   : > { %v1097_v35 = vadd.f32 %v2230_v2, %v1096_v33 }
 0x3cd   : > { %1284 = vmatpush.bf16.msra.mxu1 %v2069_v31 }
 0x3ce   : > { %v1101_v37 = vsel %vm1100_vm12, %v2230_v2, %v1097_v35 }
 0x3cf   : > { %v1106_v38 = vsel %vm1103_vm13, %v1105_v36, %v1101_v37  ;;  %v2067_v37 = vld [vmem:[#allocation8 + $0x20] sm:$0xff] }
 0x3d0   : > { %v1108_v39 = vmul.f32 %v2226_v10, %v1106_v38  ;;  %v2066_v38 = vld [vmem:[#allocation8 + $0x18] sm:$0xff] }
 0x3d1   : > { %v1111_v40 = vpop.permute.xlu0 %1110  ;;  %1285 = vmatpush.bf16.msra.mxu1 %v2068_v32  ;;  %v1951_v32 = vld [vmem:[%s3130_s9 + $0x18] sm:$0xf0] }
 0x3d2   : > { %v1116_v41 = vsel %vm964_vm4, %v1111_v40, 0  ;;  %v1109_v3 = vpack.c.bf16 %v1108_v39, %v1108_v39  ;;  %v2065_v39 = vld [vmem:[#allocation8 + $0x10] sm:$0xff]  ;;  %v2064_v40 = vld [vmem:[#allocation8 + $0x8] sm:$0xff] }
 0x3d3   : > { %1125 = vmatpush.bf16.msrb.mxu2 %v1116_v41  ;;  %v2063_v41 = vld [vmem:[#allocation8] sm:$0xff] }
 0x3d5   : > { %1286 = vmatpush.bf16.msra.mxu1 %v2067_v37 }
 0x3d6   : > { %1904 = vmatmul.msk.bf16.vlgmr.msrb.gmra.mxu2 %vm915_vm3, %v1109_v3 }
 0x3d9   : > { %1287 = vmatpush.bf16.msra.mxu1 %v2066_v38  ;;  %v1943_v38 = vld [vmem:[%s3130_s9 + $0x8] sm:$0xf0] }
 0x3dd   : > { %1288 = vmatpush.bf16.msra.mxu1 %v2065_v39 }
 0x3e1   : > { %1289 = vmatpush.bf16.msra.mxu1 %v2064_v40 }
 0x3e5   : > { %1290 = vmatpush.bf16.msra.mxu1 %v2063_v41 }
 0x3ea   : > { %v977_v42 = vpop.f32.mrf.mxu3 }
 0x3eb   : > { %981 = vst.msk [vmem:[#allocation2] sm:$0xff] %vm915_vm3, %v977_v42 }
 0x3f2   : > { %v979_v43 = vpop.f32.mrf.mxu3 }
 0x3fa   : > { %v1003_v44 = vpop.f32.mrf.mxu3 }
 0x3fb   : > { %v1007_v45 = vsel %vm915_vm3, %v1003_v44, -inf }
 0x3fc   : > { %1008 = vmax.xlane.f32.xlu2 %v1007_v45 }
 0x402   : > { %v1005_v46 = vpop.f32.mrf.mxu3 }
 0x403   : > { %v2215_v46 = vld [vmem:[#allocation9] ss:$0 sm:$0xff] }
 0x40a   : > { %v1156_v48 = vpop.f32.mrf.mxu3 }
 0x40b   : > { %v1160_v49 = vsel %vm915_vm3, %v1156_v48, -inf }
 0x40c   : > { %1161 = vmax.xlane.f32.xlu1 %v1160_v49 }
 0x412   : > { %v1158_v50 = vpop.f32.mrf.mxu3 }
 0x425   : > { %1034 = vrot.lane.b32.xlu1 %v2958_v47, %s2594_s8 }
 0x459   : > { %v1127_v51 = vpop.f32.mrf.mxu2 }
 0x45a   : > { %1132 = vrot.lane.b32.xlu1 %v1127_v51, %s2597_s27 }
 0x461   : > { %v1129_v52 = vpop.f32.mrf.mxu2 }
 0x46f   : > { %v1009_v53 = vpop.xlane.xlu2 %1008 }
 0x470   : > { %v1010_v54 = vsub.f32 %v1003_v44, %v1009_v53 }
 0x472   : > { %v1011_v55 = vmul.f32 1.442695, %v1010_v54 }
 0x474   : > { %2231 = vpow2.f32 %v1011_v55 }
 0x47a   : > { %v2232_v56 = vpop.eup %2231 }
 0x47b   : > { %v1013_v57 = vsel %vm915_vm3, %v2232_v56, 0.0 }
 0x47c   : > { %1014 = vadd.xlane.f32.xlu2 %v1013_v57  ;;  %v2085_v57 = vld [vmem:[%s3130_s9 + $0x74] sm:$0xf] }
 0x47f   : > { %v1162_v58 = vpop.xlane.xlu1 %1161 }
 0x480   : > { %v1163_v59 = vsub.f32 %v1156_v48, %v1162_v58 }
 0x482   : > { %v1164_v60 = vmul.f32 1.442695, %v1163_v59  ;;  %v1999_v59 = vld [vmem:[%s3130_s9 + $0x78] sm:$0xf0] }
 0x484   : > { %2233 = vpow2.f32 %v1164_v60  ;;  %v2002_v60 = vor.u32 %v2085_v57, %v1999_v59 }
 0x486   : > { %1446 = vmatpush.bf16.msra.mxu3 %v2002_v60  ;;  %v1347_v60 = vld [vmem:[%s3131_s10] sm:$0x3] }
 0x48a   : > { %v2234_v61 = vpop.eup %2233 }
 0x48b   : > { %v1166_v62 = vsel %vm915_vm3, %v2234_v61, 0.0 }
 0x48c   : > { %1167 = vadd.xlane.f32.xlu2 %v1166_v62  ;;  %v2084_v62 = vld [vmem:[%s3130_s9 + $0x64] sm:$0xf0] }
 0x497   : > { %v1035_v63 = vpop.permute.xlu1 %1034 }
 0x498   : > { %v1040_v1 = vsel %vm964_vm4, %v1035_v63, 0  ;;  %v2083_v63 = vld [vmem:[%s3130_s9 + $0x64] sm:$0xf] }
 0x499   : > { %1049 = vmatpush.bf16.msrb.mxu0 %v1040_v1 }
 0x4a4   : > { %1186 = vrot.lane.b32.xlu2 %v2958_v47, %s2595_s29 }
 0x4cc   : > { %v1133_v42 = vpop.permute.xlu1 %1132 }
 0x4ef   : > { %v1015_v4 = vpop.xlane.xlu2 %1014 }
 0x4f0   : > { %2235 = vrcp.f32 %v1015_v4  ;;  %v1027_v9 = vand.u32 2147483648, %v1015_v4  ;;  %v1025_v10 = vand.u32 2147483647, %v1015_v4  ;;  %vm1021_vm15 = vweird.f32 %v1015_v4 }
 0x4f2   : > { %v1028_v12 = vor.u32 1.1754944e-38, %v1027_v9  ;;  %vm1026_vm1 = vcmp.eq.f32.partialorder %v1025_v10, 8.507059e+37  ;;  %v1983_v10 = vld [vmem:[%s3130_s9 + $0x58] sm:$0xf0] }
 0x4f6   : > { %v2236_v5 = vpop.eup %2235 }
 0x4f7   : > { %v1017_v6 = vmul.f32 %v2236_v5, %v1015_v4  ;;  %vm1022_vm14 = vweird.f32 %v2236_v5  ;;  %v1991_v4 = vld [vmem:[%s3130_s9 + $0x68] sm:$0xf0] }
 0x4f8   : > { %vm1023_vm0 = vmor %vm1021_vm15, %vm1022_vm14 }
 0x4f9   : > { %v1018_v7 = vsub.f32 1.0, %v1017_v6  ;;  %v1981_v6 = vld [vmem:[%s3130_s9 + $0x50] sm:$0xf] }
 0x4fb   : > { %v1019_v8 = vmul.f32 %v2236_v5, %v1018_v7  ;;  %v2082_v7 = vld [vmem:[%s3130_s9 + $0x54] sm:$0xf0] }
 0x4fc   : > { %v1982_v9 = vor.u32 %v2082_v7, %v1981_v6  ;;  %v2093_v6 = vld [vmem:[#allocation17 + $0x30] sm:$0xff] }
 0x4fd   : > { %v1020_v11 = vadd.f32 %v2236_v5, %v1019_v8  ;;  %v2081_v8 = vld [vmem:[%s3130_s9 + $0x54] sm:$0xf] }
 0x4ff   : > { %v1168_v13 = vpop.xlane.xlu2 %1167  ;;  %v1024_v14 = vsel %vm1023_vm0, %v2236_v5, %v1020_v11  ;;  %v1994_v5 = vor.u32 %v2083_v63, %v1991_v4  ;;  %v1986_v11 = vor.u32 %v2081_v8, %v1983_v10  ;;  %v2094_v4 = vld [vmem:[#allocation17 + $0x38] sm:$0xff]  ;;  %v2091_v10 = vld [vmem:[#allocation17 + $0x20] sm:$0xff] }
 0x500   : > { %2237 = vrcp.f32 %v1168_v13  ;;  %v1029_v15 = vsel %vm1026_vm1, %v1028_v12, %v1024_v14  ;;  %v1180_v22 = vand.u32 2147483648, %v1168_v13  ;;  %v1178_v24 = vand.u32 2147483647, %v1168_v13  ;;  %v1973_v12 = vld [vmem:[%s3130_s9 + $0x40] sm:$0xf] }
 0x501   : > { %v1031_v16 = vmul.f32 %v2232_v56, %v1029_v15  ;;  %vm1174_vm5 = vweird.f32 %v1168_v13  ;;  %v1997_v56 = vld [vmem:[%s3130_s9 + $0x70] sm:$0xf]  ;;  %1447 = vmatpush.bf16.msra.mxu3 %v1994_v5  ;;  %v2079_v14 = vld [vmem:[%s3130_s9 + $0x44] sm:$0xf] }
 0x502   : > { %v1181_v26 = vor.u32 1.1754944e-38, %v1180_v22  ;;  %vm1179_vm7 = vcmp.eq.f32.partialorder %v1178_v24, 8.507059e+37  ;;  %v2076_v24 = vld [vmem:[%s3130_s9 + $0x24] sm:$0xf0] }
 0x503   : > { %v1032_v47 = vpack.c.bf16 %v1031_v16, %v1031_v16  ;;  %v1975_v16 = vld [vmem:[%s3130_s9 + $0x48] sm:$0xf0] }
 0x505   : > { %1902 = vmatmul.msk.bf16.vlgmr.msrb.gmra.mxu0 %vm915_vm3, %v1032_v47  ;;  %1448 = vmatpush.bf16.msra.mxu3 %v1986_v11  ;;  %v1978_v47 = vor.u32 %v2079_v14, %v1975_v16 }
 0x506   : > { %v2238_v17 = vpop.eup %2237 }
 0x507   : > { %v1170_v18 = vmul.f32 %v2238_v17, %v1168_v13  ;;  %v1187_v19 = vpop.permute.xlu2 %1186  ;;  %vm1175_vm2 = vweird.f32 %v2238_v17  ;;  %v2080_v13 = vld [vmem:[%s3130_s9 + $0x44] sm:$0xf0] }
 0x508   : > { %v1192_v20 = vsel %vm964_vm4, %v1187_v19, 0  ;;  %vm1176_vm6 = vmor %vm1174_vm5, %vm1175_vm2  ;;  %vm1135_vm4 = vcmask 195712   ;;  %v1974_v15 = vor.u32 %v2080_v13, %v1973_v12  ;;  %v2077_v19 = vld [vmem:[%s3130_s9 + $0x34] sm:$0xf]  ;;  %v2090_v12 = vld [vmem:[#allocation17 + $0x18] sm:$0xff] }
 0x509   : > { %v1171_v21 = vsub.f32 1.0, %v1170_v18  ;;  %1201 = vmatpush.bf16.msra.mxu0 %v1192_v20  ;;  %1449 = vmatpush.bf16.msra.mxu3 %v1978_v47  ;;  %v2078_v18 = vld [vmem:[%s3130_s9 + $0x34] sm:$0xf0]  ;;  %v2088_v47 = vld [vmem:[#allocation17 + $0x8] sm:$0xff] }
 0x50a   : > { %v2089_v13 = vld [vmem:[#allocation17 + $0x10] sm:$0xff] }
 0x50b   : > { %v1172_v23 = vmul.f32 %v2238_v17, %v1171_v21  ;;  %v1967_v21 = vld [vmem:[%s3130_s9 + $0x38] sm:$0xf0] }
 0x50c   : > { %v1970_v22 = vor.u32 %v2077_v19, %v1967_v21 }
 0x50d   : > { %v1173_v25 = vadd.f32 %v2238_v17, %v1172_v23  ;;  %v1957_v23 = vld [vmem:[%s3130_s9 + $0x20] sm:$0xf]  ;;  %1610 = vmatpush.bf16.msrb.mxu0 %v2094_v4 }
 0x50e   : > { %1450 = vmatpush.bf16.msra.mxu3 %v1970_v22  ;;  %v2087_v22 = vld [vmem:[#allocation17] sm:$0xff] }
 0x50f   : > { %v1177_v27 = vsel %vm1176_vm6, %v2238_v17, %v1173_v25  ;;  %v1965_v17 = vld [vmem:[%s3130_s9 + $0x30] sm:$0xf]  ;;  %v2075_v25 = vld [vmem:[%s3130_s9 + $0x24] sm:$0xf] }
 0x510   : > { %v1182_v28 = vsel %vm1179_vm7, %v1181_v26, %v1177_v27  ;;  %v1966_v20 = vor.u32 %v2078_v18, %v1965_v17  ;;  %v1958_v26 = vor.u32 %v2076_v24, %v1957_v23  ;;  %v1959_v27 = vld [vmem:[%s3130_s9 + $0x28] sm:$0xf0]  ;;  %v1349_v18 = vperm.slane %v1347_v60, 0 }
 0x511   : > { %v1184_v29 = vmul.f32 %v2234_v61, %v1182_v28  ;;  %v1989_v61 = vld [vmem:[%s3130_s9 + $0x60] sm:$0xf]  ;;  %v1962_v28 = vor.u32 %v2075_v25, %v1959_v27  ;;  %1611 = vmatpush.bf16.msrb.mxu0 %v2093_v6 }
 0x512   : > { %v1990_v1 = vor.u32 %v2084_v62, %v1989_v61  ;;  %v1350_v61 = vperm.slane %v1347_v60, 1 }
 0x513   : > { %v1185_v2 = vpack.c.bf16 %v1184_v29, %v1184_v29  ;;  %1451 = vmatpush.bf16.msra.mxu3 %v1962_v28  ;;  %v1949_v29 = vld [vmem:[%s3130_s9 + $0x10] sm:$0xf]  ;;  %v1482_v28 = vld [vmem:[%s3132_s11] sm:$0x7f] }
 0x515   : > { %1906 = vmatmul.msk.bf16.vlgmr.msra.gmra.mxu0 %vm915_vm3, %v1185_v2  ;;  %vm1059_vm3 = vcmask 130112   ;;  %v2074_v2 = vld [vmem:[%s3130_s9 + $0x14] sm:$0xf0] }
 0x516   : > { %v1950_v31 = vor.u32 %v2074_v2, %v1949_v29  ;;  %v1484_v29 = vperm.slane %v1482_v28, 0  ;;  %v1488_v2 = vperm.slane %v1482_v28, 1 }
 0x582   : > { %v1051_v33 = vpop.f32.mrf.mxu0 }
 0x583   : > { %1056 = vrot.lane.b32.xlu0 %v1051_v33, %s2598_s19  ;;  %v1954_v33 = vor.u32 %v2073_v30, %v1951_v32  ;;  %v1492_v30 = vperm.slane %v1482_v28, 2 }
 0x585   : > { %1452 = vmatpush.bf16.msra.mxu3 %v1954_v33 }
 0x58a   : > { %v1053_v34 = vpop.f32.mrf.mxu0 }
 0x58b   : > { %v1941_v34 = vld [vmem:[%s3130_s9] sm:$0xf] }
 0x592   : > { %v1203_v35 = vpop.f32.mrf.mxu0 }
 0x593   : > { %1208 = vrot.lane.b32.xlu2 %v1203_v35, %s2599_s18  ;;  %v2072_v35 = vld [vmem:[%s3130_s9 + $0x4] sm:$0xf0] }
 0x594   : > { %v1942_v37 = vor.u32 %v2072_v35, %v1941_v34 }
 0x59a   : > { %v1205_v36 = vpop.f32.mrf.mxu0 }
 0x59b   : > { %v2071_v36 = vld [vmem:[%s3130_s9 + $0x4] sm:$0xf] }
 0x59c   : > { %v1946_v40 = vor.u32 %v2071_v36, %v1943_v38  ;;  %v1496_v36 = vperm.slane %v1482_v28, 3 }
 0x59e   : > { %1453 = vmatpush.bf16.msra.mxu3 %v1946_v40 }
 0x5ed   : > { %v1209_v43 = vpop.permute.xlu2 %1208 }
 0x5f5   : > { %v1057_v3 = vpop.permute.xlu0 %1056 }
 0x5f6   : > { %1060 = vst.msk [vmem:[#allocation2] sm:$0xff] %vm1059_vm3, %v1057_v3 }
 0x5f7   : > { %1136 = vst.msk [vmem:[#allocation2] sm:$0xff] %vm1135_vm4, %v1133_v42 }
 0x5f8   : > { %1212 = vst.msk [vmem:[#allocation2] sm:$0xff] %vm1211_vm8, %v1209_v43 }
 0x5ff   : > { %v1213_v44 = vld [vmem:[#allocation2] sm:$0xff] }
 0x600   : > { %v1214_v45 = vpack.c.bf16 %v1213_v44, %v1213_v44 }
 0x602   : > { %1291 = vmatmul.bf16.vlgmr.msra.gmra.mxu1 %v1214_v45 }
 0x67f   : > { %v1292_v48 = vpop.f32.mrf.mxu1 }
 0x680   : > { %v1293_v49 = vadd.f32 %v2215_v46, %v1292_v48 }
 0x682   : > { %v2996_v50 = vadd.f32 %v1293_v49, %v2794_v0  ;;  %v2086_v0 = vld [vmem:[%s3130_s9 + $0x74] sm:$0xf0] }
 0x683   : > { %v1998_v58 = vor.u32 %v2086_v0, %v1997_v56 }
 0x684   : > { %1299 = vadd.xlane.f32.xlu0 %v2996_v50 }
 0x685   : > { %1433 = vmatpush.bf16.msra.mxu2 %v1998_v58 }
 0x687   : > { %v1294_v51 = vpop.f32.mrf.mxu1 }
 0x689   : > { %1434 = vmatpush.bf16.msra.mxu2 %v1990_v1 }
 0x68d   : > { %1435 = vmatpush.bf16.msra.mxu2 %v1982_v9 }
 0x691   : > { %1436 = vmatpush.bf16.msra.mxu2 %v1974_v15 }
 0x695   : > { %1437 = vmatpush.bf16.msra.mxu2 %v1966_v20 }
 0x699   : > { %1438 = vmatpush.bf16.msra.mxu2 %v1958_v26 }
 0x69d   : > { %1439 = vmatpush.bf16.msra.mxu2 %v1950_v31 }
 0x6a1   : > { %1440 = vmatpush.bf16.msra.mxu2 %v1942_v37 }
 0x6f7   : > { %v1300_v52 = vpop.xlane.xlu0 %1299 }
 0x6f8   : > { %v2999_v53 = vmul.f32 0.03125, %v1300_v52 }
 0x6fa   : > { %v3003_v54 = vsub.f32 %v2996_v50, %v2999_v53  ;;  %v1306_v39 = vmul.f32 96.0, %v2999_v53 }
 0x6fc   : > { %v1303_v55 = vmul.f32 %v3003_v54, %v3003_v54  ;;  %v1307_v41 = vmul.f32 %v1306_v39, %v2999_v53  ;;  %v2217_v53 = vld [vmem:[#allocation12] ss:$0 sm:$0xff]  ;;  %v1500_v39 = vperm.slane %v1482_v28, 4 }
 0x6fe   : > { %1304 = vadd.xlane.f32.xlu1 %v1303_v55  ;;  %v2216_v55 = vld [vmem:[#allocation11] ss:$0 sm:$0xff] }
 0x771   : > { %v1305_v3 = vpop.xlane.xlu1 %1304 }
 0x772   : > { %v1308_v42 = vsub.f32 %v1305_v3, %v1307_v41 }
 0x774   : > { %v1309_v43 = vmul.f32 0.03125, %v1308_v42  ;;  %v1504_v42 = vperm.slane %v1482_v28, 5 }
 0x776   : > { %v1310_v44 = vadd.f32 1e-05, %v1309_v43 }
 0x778   : > { %2239 = vrsqrt.f32 %v1310_v44  ;;  %vm1317_vm10 = vweird.f32 %v1310_v44 }
 0x77e   : > { %v2240_v45 = vpop.eup %2239 }
 0x77f   : > { %v1312_v46 = vmul.f32 %v2240_v45, %v1310_v44  ;;  %vm1318_vm9 = vweird.f32 %v2240_v45 }
 0x780   : > { %vm1319_vm11 = vmor %vm1317_vm10, %vm1318_vm9 }
 0x781   : > { %v1313_v48 = vmul.f32 %v2240_v45, %v1312_v46  ;;  %v1508_v46 = vperm.slane %v1482_v28, 6 }
 0x783   : > { %v1314_v49 = vmul.f32 0.5, %v1313_v48 }
 0x785   : > { %v1315_v51 = vsub.f32 1.5, %v1314_v49 }
 0x787   : > { %v1316_v52 = vmul.f32 %v2240_v45, %v1315_v51 }
 0x789   : > { %v1320_v56 = vsel %vm1319_vm11, %v2240_v45, %v1316_v52 }
 0x78a   : > { %v1321_v0 = vmul.f32 %v1320_v56, %v3003_v54  ;;  %v2092_v54 = vld [vmem:[#allocation17 + $0x28] sm:$0xff]  ;;  %v2218_v56 = vld [vmem:[#allocation14] ss:$0 sm:$0xff] }
 0x78b   : > { %1612 = vmatpush.bf16.msrb.mxu0 %v2092_v54 }
 0x78c   : > { %v1325_v57 = vmul.f32 %v2216_v55, %v1321_v0 }
 0x78e   : > { %v1329_v58 = vadd.f32 %v2217_v53, %v1325_v57  ;;  %v2219_v53 = vld [vmem:[#allocation15] ss:$0 sm:$0xff] }
 0x78f   : > { %1613 = vmatpush.bf16.msrb.mxu0 %v2091_v10 }
 0x790   : > { %v1330_v59 = vpack.c.bf16 %v1329_v58, %v1329_v58 }
 0x792   : > { %1441 = vmatmul.bf16.vlgmr.msra.gmra.mxu2 %v1330_v59  ;;  %1454 = vmatmul.bf16.vlgmr.msra.gmra.mxu3 %v1330_v59 }
 0x793   : > { %1614 = vmatpush.bf16.msrb.mxu0 %v2090_v12  ;;  %v2220_v12 = vld [vmem:[#allocation18] ss:$0 sm:$0xff] }
 0x797   : > { %1615 = vmatpush.bf16.msrb.mxu0 %v2089_v13 }
 0x79b   : > { %1616 = vmatpush.bf16.msrb.mxu0 %v2088_v47 }
 0x79f   : > { %1617 = vmatpush.bf16.msrb.mxu0 %v2087_v22 }
 0x815   : > { %v1442_v62 = vpop.f32.mrf.mxu2  ;;  %v1455_v63 = vpop.f32.mrf.mxu3 }
 0x816   : > { %v1456_v1 = vadd.f32 %v1455_v63, %v1350_v61  ;;  %v1443_v24 = vadd.f32 %v1442_v62, %v1349_v18 }
 0x818   : > { %v2003_v5 = vmul.f32 -1.442695, %v1456_v1 }
 0x81a   : > { %2241 = vpow2.f32 %v2003_v5 }
 0x81d   : > { %v1444_v7 = vpop.f32.mrf.mxu2  ;;  %v1457_v8 = vpop.f32.mrf.mxu3 }
 0x820   : > { %v2242_v9 = vpop.eup %2241 }
 0x821   : > { %v1462_v11 = vadd.f32 1.0, %v2242_v9 }
 0x823   : > { %2243 = vrcp.f32 %v1462_v11  ;;  %v1474_v17 = vand.u32 2147483648, %v1462_v11  ;;  %v1472_v20 = vand.u32 2147483647, %v1462_v11  ;;  %vm1468_vm13 = vweird.f32 %v1462_v11 }
 0x825   : > { %v1475_v23 = vor.u32 1.1754944e-38, %v1474_v17  ;;  %vm1473_vm15 = vcmp.eq.f32.partialorder %v1472_v20, 8.507059e+37 }
 0x829   : > { %v2244_v14 = vpop.eup %2243 }
 0x82a   : > { %v1464_v15 = vmul.f32 %v2244_v14, %v1462_v11  ;;  %vm1469_vm12 = vweird.f32 %v2244_v14 }
 0x82b   : > { %vm1470_vm14 = vmor %vm1468_vm13, %vm1469_vm12 }
 0x82c   : > { %v1465_v16 = vsub.f32 1.0, %v1464_v15 }
 0x82e   : > { %v1466_v19 = vmul.f32 %v2244_v14, %v1465_v16 }
 0x830   : > { %v1467_v21 = vadd.f32 %v2244_v14, %v1466_v19 }
 0x832   : > { %v1471_v25 = vsel %vm1470_vm14, %v2244_v14, %v1467_v21 }
 0x833   : > { %v1476_v26 = vsel %vm1473_vm15, %v1475_v23, %v1471_v25 }
 0x834   : > { %v1478_v27 = vmul.f32 %v1476_v26, %v1443_v24 }
 0x836   : > { %1481 = vst [vmem:[#allocation3 + $0x3] sm:$0xff] %v1478_v27  ;;  %v1497_v3 = vmul.f32 %v1496_v36, %v1478_v27 }
 0x83d   : > { %v1483_v31 = vld [vmem:[#allocation3] sm:$0xff] }
 0x83e   : > { %v1487_v32 = vld [vmem:[#allocation3 + $0x1] sm:$0xff]  ;;  %v1485_v34 = vmul.f32 %v1484_v29, %v1483_v31 }
 0x83f   : > { %v1491_v33 = vld [vmem:[#allocation3 + $0x2] sm:$0xff]  ;;  %v1489_v35 = vmul.f32 %v1488_v2, %v1487_v32 }
 0x840   : > { %v1493_v38 = vmul.f32 %v1492_v30, %v1491_v33  ;;  %v1499_v40 = vld [vmem:[#allocation3 + $0x4] sm:$0xff] }
 0x841   : > { %v1490_v37 = vadd.f32 %v1489_v35, %v1485_v34  ;;  %v1503_v43 = vld [vmem:[#allocation3 + $0x5] sm:$0xff]  ;;  %v1501_v45 = vmul.f32 %v1500_v39, %v1499_v40 }
 0x842   : > { %v1507_v48 = vld [vmem:[#allocation3 + $0x6] sm:$0xff]  ;;  %v1505_v51 = vmul.f32 %v1504_v42, %v1503_v43 }
 0x843   : > { %v1494_v41 = vadd.f32 %v1493_v38, %v1490_v37  ;;  %v1509_v55 = vmul.f32 %v1508_v46, %v1507_v48 }
 0x845   : > { %v1498_v44 = vadd.f32 %v1497_v3, %v1494_v41 }
 0x847   : > { %v1502_v49 = vadd.f32 %v1501_v45, %v1498_v44 }
 0x849   : > { %v1506_v52 = vadd.f32 %v1505_v51, %v1502_v49 }
 0x84b   : > { %v1510_v0 = vadd.f32 %v1509_v55, %v1506_v52 }
 0x84d   : > { %v1515_v57 = vmul.f32 %v2218_v56, %v1510_v0 }
 0x84f   : > { %v1520_v58 = vadd.f32 %v2219_v53, %v1515_v57 }
 0x851   : > { %v2004_v59 = vmul.f32 -1.442695, %v1520_v58 }
 0x853   : > { %2245 = vpow2.f32 %v2004_v59 }
 0x859   : > { %v2246_v60 = vpop.eup %2245 }
 0x85a   : > { %v1524_v61 = vadd.f32 1.0, %v2246_v60 }
 0x85c   : > { %2247 = vrcp.f32 %v1524_v61  ;;  %v1536_v4 = vand.u32 2147483648, %v1524_v61  ;;  %v1534_v6 = vand.u32 2147483647, %v1524_v61  ;;  %vm1530_vm1 = vweird.f32 %v1524_v61 }
 0x85e   : > { %v1537_v7 = vor.u32 1.1754944e-38, %v1536_v4  ;;  %vm1535_vm5 = vcmp.eq.f32.partialorder %v1534_v6, 8.507059e+37 }
 0x862   : > { %v2248_v62 = vpop.eup %2247 }
 0x863   : > { %v1526_v63 = vmul.f32 %v2248_v62, %v1524_v61  ;;  %vm1531_vm0 = vweird.f32 %v2248_v62 }
 0x864   : > { %vm1532_vm2 = vmor %vm1530_vm1, %vm1531_vm0 }
 0x865   : > { %v1527_v1 = vsub.f32 1.0, %v1526_v63 }
 0x867   : > { %v1528_v5 = vmul.f32 %v2248_v62, %v1527_v1 }
 0x869   : > { %v1529_v54 = vadd.f32 %v2248_v62, %v1528_v5 }
 0x86b   : > { %v1533_v8 = vsel %vm1532_vm2, %v2248_v62, %v1529_v54 }
 0x86c   : > { %v1538_v9 = vsel %vm1535_vm5, %v1537_v7, %v1533_v8 }
 0x86d   : > { %v1540_v10 = vmul.f32 %v1538_v9, %v1520_v58 }
 0x86f   : > { %v1541_v11 = vpack.c.bf16 %v1540_v10, %v1540_v10 }
 0x871   : > { %1618 = vmatmul.bf16.vlgmr.msrb.gmra.mxu0 %v1541_v11 }
 0x8ee   : > { %v1619_v13 = vpop.f32.mrf.mxu0 }
 0x8ef   : > { %v1620_v14 = vadd.f32 %v2220_v12, %v1619_v13 }
 0x8f1   : > { %v1623_v15 = vadd.f32 %v1620_v14, %v2996_v50 }
 0x8f3   : > { %1624 = vst [vmem:[%s666_s17] sm:$0xff] %v1623_v15 }
 0x8f6   : > { %v1621_v16 = vpop.f32.mrf.mxu0 }
 0x8f7 PF: > { %s3150_s6 = sld [smem:[#allocation26_spill]] }
 0x8fd   : > { %s32_s21 = sadd.s32 1, %s3150_s6  }
 0x8fe   : > { %p29_p7 = scmp.ge.s32.totalorder %s32_s21, 4  }
 0x900   :  { %31 = sbr.rel (!%p29_p7) target bundleno = 11 (0xb), region = 155 }
 0x905   :  { %1644 = vsyncpa [#allocation5], 1 }
 0x906   :  { %1646 = vsyncpa [#allocation5 + $0x1], 1 }
 0x907   :  { %1647 = vsyncpa [#allocation7], 1 }
 0x908   :  { %1648 = vsyncpa [#allocation10], 1 }
 0x909   :  { %1649 = vsyncpa [#allocation13], 1 }
 0x90a   :  { %1650 = vsyncpa [#allocation16], 1 }
 0x90b   :  { %1651 = vsyncpa [#allocation19], 1 }

</bundles_post_ra>
